<compile_context>
chip_gen: v5e
topology: v5e:2x2
jax: 0.10.0
libtpu: 0.0.40
codegen_flags: <defaults>
</compile_context>

<pallas_src>
import functools

import jax
import jax.numpy as jnp
from jax import lax
from jax.experimental import pallas as pl
from jax.experimental.pallas import tpu as pltpu

EMBEDDING_SIZE = 32          # RelationalGraphNeuralNetworkConfig.embedding_size default
MAXIMUM_SMOOTHNESS = 12.0    # hard-coded in SmoothMaximumRelationMessagePassing.forward
NEG_FILL = -1e30             # finite stand-in for the amax identity (never reaches output)


def _mish(x):
    # mish(x) = x * tanh(softplus(x)), guarded softplus
    sp = jnp.maximum(x, 0.0) + jnp.log1p(jnp.exp(-jnp.abs(x)))
    return x * jnp.tanh(sp)


def _smooth_max_mp_kernel(emb_ref, idx_ref, hasmsg_ref, w_ref, out_ref, msg_ref,
                          *, t1, t2, chunk):
    f32, bf16 = jnp.float32, jnp.bfloat16
    N, E = emb_ref.shape
    J = idx_ref.shape[0]

    emb = emb_ref[...]                                   # [N, E] f32
    idx = idx_ref[...]                                   # [J, 1] i32 (-1 == padding row)

    # ---- one-hot gather operator built in-kernel (never shipped via HBM) ------
    Gb = (lax.broadcasted_iota(jnp.int32, (J, N), 1) == idx).astype(bf16)    # [J, N]

    # ---- packed weight slab: static (free) ref views ---------------------------
    def w(r0, nr, nc):
        return w_ref[r0:r0 + nr, 0:nc]

    w1a, w1b = w(0, E, E), w(E, E, E)
    w2a0, w2a1 = w(2 * E, E, 2 * E), w(3 * E, E, 2 * E)
    w2b0, w2b1 = w(4 * E, 2 * E, E), w(6 * E, 2 * E, E)
    wu1m, wu1e = w(8 * E, E, 2 * E), w(9 * E, E, 2 * E)
    wu2 = w(10 * E, 2 * E, E)
    B0 = 12 * E
    b1a, b1b = w(B0, 1, E), w(B0 + 8, 1, E)
    b2a = w(B0 + 16, 1, 2 * E)
    b2b0, b2b1 = w(B0 + 24, 1, E), w(B0 + 32, 1, E)
    bu1, bu2 = w(B0 + 40, 1, 2 * E), w(B0 + 48, 1, E)

    # ---- fused gather: one bf16 single-pass MXU matmul for all relation args ---
    x_all = jnp.dot(Gb, emb.astype(bf16), preferred_element_type=f32)        # [J, E]
    x1, x20, x21 = x_all[:t1], x_all[t1:t1 + t2], x_all[t1 + t2:]

    # ---- PredicateMLP messages (residual); weights pre-split -> no lane concat -
    h1 = _mish(jnp.dot(x1, w1a, preferred_element_type=f32) + b1a)
    m1 = x1 + jnp.dot(h1, w1b, preferred_element_type=f32) + b1b
    h2 = _mish(jnp.dot(x20, w2a0, preferred_element_type=f32)
               + jnp.dot(x21, w2a1, preferred_element_type=f32) + b2a)       # [T2, 2E]
    m2a = x20 + jnp.dot(h2, w2b0, preferred_element_type=f32) + b2b0
    m2b = x21 + jnp.dot(h2, w2b1, preferred_element_type=f32) + b2b1
    m_all = jnp.concatenate([m1, m2a, m2b], axis=0)                          # [J, E]
    msg_ref[...] = m_all              # VMEM scratch: dynamic chunk slices below

    # ---- index_reduce_('amax', include_self=False) ------------------------------
    # lane-dense layout: [E, N] accumulator (nodes on the lane axis); per-chunk
    # masks rebuilt from the index ref, so no [N, J, E] or transposed temporaries.
    def smax_body(i, run):
        start = pl.multiple_of(i * chunk, chunk)
        idx_c = idx_ref[pl.ds(start, chunk), :]                              # [c, 1]
        gc = lax.broadcasted_iota(jnp.int32, (chunk, N), 1) == idx_c         # [c, N]
        mc = msg_ref[pl.ds(start, chunk), :]                                 # [c, E]
        cand = jnp.where(gc[:, None, :], mc[:, :, None], NEG_FILL)           # [c, E, N]
        return jnp.maximum(run, jnp.max(cand, axis=0))

    run_t = lax.fori_loop(0, J // chunk, smax_body,
                          jnp.full((E, N), NEG_FILL, f32))                   # [E, N]
    # include_self=False: nodes with no incoming message keep their initial 0.
    exps_max = jnp.where(hasmsg_ref[...] > 0.0, run_t.T, 0.0)                # [N, E]

    # ---- smooth maximum ---------------------------------------------------------
    # Stabilize with the bf16-rounded maxima and add the SAME value back, so the
    # result does not depend on the rounding of the stabilization point.
    exps_max_b = exps_max.astype(bf16)
    off_all = jnp.dot(Gb, exps_max_b, preferred_element_type=f32)            # [J, E]
    scaled = MAXIMUM_SMOOTHNESS * (m_all - off_all)
    scaled = jnp.where(idx >= 0, scaled, -100.0)  # padded rows: exp -> 0, never inf/NaN
    exps_all = jnp.exp(scaled)                                               # [J, E]

    # index_add_ as a transposed contraction (G^T @ exps) on the MXU: the [N, J]
    # scatter operand is never materialized.
    exps_sum = jnp.float32(1e-16) + lax.dot_general(
        Gb, exps_all.astype(bf16), (((0,), (0,)), ((), ())),
        preferred_element_type=f32)                                          # [N, E]
    max_msg = (jnp.log(exps_sum) * (1.0 / MAXIMUM_SMOOTHNESS)
               + exps_max_b.astype(f32))

    # ---- update MLP on cat(max_msg, node_embeddings); first layer row-split ----
    hu = _mish(jnp.dot(max_msg, wu1m, preferred_element_type=f32)
               + jnp.dot(emb, wu1e, preferred_element_type=f32) + bu1)       # [N, 2E]
    out_ref[...] = jnp.dot(hu, wu2, preferred_element_type=f32) + bu2


def _pack_weights(params, E):
    """Pack all weights/biases into one sublane-aligned f32 slab of width 2E."""
    (w1a, b1a, w1b, b1b, w2a, b2a, w2b, b2b, wu1, bu1, wu2, bu2) = params
    w2a0, w2a1 = w2a[:E], w2a[E:]
    w2b0, w2b1 = w2b[:, :E], w2b[:, E:]
    b2b0, b2b1 = b2b[:, :E], b2b[:, E:]
    wu1m, wu1e = wu1[:E], wu1[E:]

    slab = jnp.zeros((12 * E + 56, 2 * E), jnp.float32)

    def put(s, r, x):
        return s.at[r:r + x.shape[0], 0:x.shape[1]].set(x)

    for r, x in ((0, w1a), (E, w1b), (2 * E, w2a0), (3 * E, w2a1),
                 (4 * E, w2b0), (6 * E, w2b1), (8 * E, wu1m), (9 * E, wu1e),
                 (10 * E, wu2)):
        slab = put(slab, r, x)
    B0 = 12 * E
    for k, b in enumerate((b1a, b1b, b2a, b2b0, b2b1, bu1, bu2)):
        slab = put(slab, B0 + 8 * k, b)
    return slab


def init_params(key, E):
    """Deterministic PyTorch-Linear-style init of all weights."""
    def lin(k, fan_in, fan_out):
        k1, k2 = jax.random.split(k)
        bound = 1.0 / float(fan_in) ** 0.5
        w = jax.random.uniform(k1, (fan_in, fan_out), jnp.float32, -bound, bound)
        b = jax.random.uniform(k2, (1, fan_out), jnp.float32, -bound, bound)
        return w, b

    keys = jax.random.split(key, 6)
    w1a, b1a = lin(keys[0], E, E)            # relation MLP (arity 1), inner
    w1b, b1b = lin(keys[1], E, E)            # relation MLP (arity 1), outer
    w2a, b2a = lin(keys[2], 2 * E, 2 * E)    # relation MLP (arity 2), inner
    w2b, b2b = lin(keys[3], 2 * E, 2 * E)    # relation MLP (arity 2), outer
    wu1, bu1 = lin(keys[4], 2 * E, 2 * E)    # update MLP, inner
    wu2, bu2 = lin(keys[5], 2 * E, E)        # update MLP, outer
    return (w1a, b1a, w1b, b1b, w2a, b2a, w2b, b2b, wu1, bu1, wu2, bu2)


def smooth_max_message_passing(params, node_embeddings, idx_unary, idx_binary, *,
                               chunk=32):
    """Plain-JAX glue: pad indices, pack weights, call the single-program kernel."""
    N, E = node_embeddings.shape

    def pad_idx(ix):
        ix = ix.astype(jnp.int32)
        pad = (-ix.shape[0]) % chunk
        return jnp.pad(ix, (0, pad), constant_values=-1) if pad else ix

    # pad each group to a multiple of `chunk` (>= 16) so all sublane row splits,
    # chunk slices, and the fori_loop trip count are aligned; padded entries = -1.
    i1, i20, i21 = pad_idx(idx_unary), pad_idx(idx_binary[:, 0]), pad_idx(idx_binary[:, 1])
    t1, t2 = int(i1.shape[0]), int(i20.shape[0])
    flat_idx = jnp.concatenate([i1, i20, i21])[:, None]                # [J, 1] i32
    J = t1 + 2 * t2

    real_idx = jnp.concatenate(
        [idx_unary, idx_binary[:, 0], idx_binary[:, 1]]).astype(jnp.int32)
    deg = jnp.zeros((N,), jnp.float32).at[real_idx].add(1.0)
    has_msg = (deg > 0).astype(jnp.float32)[:, None]                   # [N, 1]

    wslab = _pack_weights(params, E)                                   # [12E+56, 2E]

    inputs = (node_embeddings, flat_idx, has_msg, wslab)

    # VMEM budget: operands + in-kernel temporaries (mask, chunk temp, accumulators),
    # clamped to the device capacity minus headroom (no grid -> no double buffering).
    operand_bytes = sum(int(x.size) * x.dtype.itemsize for x in inputs) + N * E * 4
    temp_bytes = (J * N * 2                # bf16 gather mask
                  + 8 * J * E * 4          # x_all / messages / offsets / exps
                  + chunk * E * N * 4      # per-chunk masked temp
                  + 8 * N * E * 4          # accumulators / exps_sum / update MLP
                  + J * E * 4)             # message scratch
    needed = operand_bytes + temp_bytes + (4 << 20)
    try:
        cap = int(pltpu.get_tpu_info().vmem_capacity_bytes)
    except Exception:
        cap = 64 << 20
    vmem_limit = int(max(16 << 20, min(cap - (8 << 20), needed)))

    kernel = functools.partial(_smooth_max_mp_kernel, t1=t1, t2=t2, chunk=chunk)
    return pl.pallas_call(
        kernel,
        out_shape=jax.ShapeDtypeStruct((N, E), jnp.float32),
        in_specs=[pl.BlockSpec(memory_space=pltpu.MemorySpace.VMEM)] * len(inputs),
        out_specs=pl.BlockSpec(memory_space=pltpu.MemorySpace.VMEM),
        scratch_shapes=[pltpu.VMEM((J, E), jnp.float32)],
        compiler_params=pltpu.CompilerParams(vmem_limit_bytes=vmem_limit),
    )(*inputs)


def reference_forward(params, emb, idx_unary, idx_binary):
    """Pure-JAX reference of SmoothMaximumRelationMessagePassing.forward."""
    (w1a, b1a, w1b, b1b, w2a, b2a, w2b, b2b, wu1, bu1, wu2, bu2) = params
    N, E = emb.shape
    hp = jax.lax.Precision.HIGHEST

    def mlp(x, wa, ba, wb, bb):
        h = _mish(jnp.dot(x, wa, precision=hp) + ba)
        return jnp.dot(h, wb, precision=hp) + bb

    x1 = emb[idx_unary]
    m1 = x1 + mlp(x1, w1a, b1a, w1b, b1b)
    flat_bin = idx_binary.reshape(-1)
    x2 = emb[flat_bin].reshape(-1, 2 * E)
    m2 = (x2 + mlp(x2, w2a, b2a, w2b, b2b)).reshape(-1, E)
    msgs = jnp.concatenate([m1, m2], axis=0)
    idxs = jnp.concatenate([idx_unary, flat_bin], axis=0)

    seg_max = jax.ops.segment_max(msgs, idxs, num_segments=N)
    counts = jax.ops.segment_sum(jnp.ones((idxs.shape[0],), jnp.float32), idxs,
                                 num_segments=N)
    exps_max = jnp.where((counts > 0)[:, None], seg_max, 0.0)
    exps = jnp.exp(MAXIMUM_SMOOTHNESS * (msgs - exps_max[idxs]))
    exps_sum = 1e-16 + jax.ops.segment_sum(exps, idxs, num_segments=N)
    max_msg = jnp.log(exps_sum) / MAXIMUM_SMOOTHNESS + exps_max
    return mlp(jnp.concatenate([max_msg, emb], axis=1), wu1, bu1, wu2, bu2)


if __name__ == "__main__":
    key = jax.random.PRNGKey(0)
    k_par, k_emb, k_un, k_bin = jax.random.split(key, 4)

    N = 64                    # total graph nodes (small batch of instances, concatenated)
    E = EMBEDDING_SIZE
    T1 = 40                   # unary-relation ground atoms
    T2 = 24                   # binary-relation ground atoms

    params = init_params(k_par, E)
    node_embeddings = 0.1 * jax.random.normal(k_emb, (N, E), jnp.float32)
    idx_unary = jax.random.randint(k_un, (T1,), 0, N, dtype=jnp.int32)
    idx_binary = jax.random.randint(k_bin, (T2, 2), 0, N, dtype=jnp.int32)

    out = smooth_max_message_passing(params, node_embeddings, idx_unary, idx_binary)
    jax.block_until_ready(out)

    ref = reference_forward(params, node_embeddings, idx_unary, idx_binary)
    assert out.shape == (N, E)
    assert bool(jnp.all(jnp.isfinite(out)))
    assert bool(jnp.allclose(out, ref, atol=1e-2, rtol=1e-2))
    print("KERNEL_OK")
</pallas_src>

<mosaic_0001>
module attributes {stable_mosaic.version = 11 : i64} {
  func.func @_smooth_max_mp_kernel(%arg0: memref<64x32xf32, #tpu.memory_space<vmem>>, %arg1: memref<128x1xi32, #tpu.memory_space<vmem>>, %arg2: memref<64x1xf32, #tpu.memory_space<vmem>>, %arg3: memref<440x64xf32, #tpu.memory_space<vmem>>, %arg4: memref<64x32xf32, #tpu.memory_space<vmem>>, %arg5: memref<128x32xf32, #tpu.memory_space<vmem>>) attributes {dimension_semantics = [], scalar_prefetch = 0 : i64, scratch_operands = 1 : i64, tpu.core_type = #tpu.core_type<tc>} {
    %c0 = arith.constant 0 : index
    %c0_0 = arith.constant 0 : index
    %0 = vector.load %arg0[%c0, %c0_0] : memref<64x32xf32, #tpu.memory_space<vmem>>, vector<64x32xf32>
    %c0_1 = arith.constant 0 : index
    %c0_2 = arith.constant 0 : index
    %1 = vector.load %arg1[%c0_1, %c0_2] : memref<128x1xi32, #tpu.memory_space<vmem>>, vector<128x1xi32>
    %2 = tpu.iota {dimensions = array<i32: 1>} : vector<128x64xi32>
    %3 = vector.broadcast %1 : vector<128x1xi32> to vector<128x64xi32>
    %4 = arith.cmpi eq, %2, %3 : vector<128x64xi32>
    %5 = arith.extui %4 : vector<128x64xi1> to vector<128x64xi32>
    %6 = arith.sitofp %5 : vector<128x64xi32> to vector<128x64xf32>
    %7 = arith.truncf %6 : vector<128x64xf32> to vector<128x64xbf16>
    %c0_3 = arith.constant 0 : index
    %c0_4 = arith.constant 0 : index
    %8 = vector.load %arg3[%c0_3, %c0_4] : memref<440x64xf32, #tpu.memory_space<vmem>>, vector<32x32xf32>
    %c32 = arith.constant 32 : index
    %c0_5 = arith.constant 0 : index
    %9 = vector.load %arg3[%c32, %c0_5] : memref<440x64xf32, #tpu.memory_space<vmem>>, vector<32x32xf32>
    %c64 = arith.constant 64 : index
    %c0_6 = arith.constant 0 : index
    %10 = vector.load %arg3[%c64, %c0_6] : memref<440x64xf32, #tpu.memory_space<vmem>>, vector<32x64xf32>
    %c96 = arith.constant 96 : index
    %c0_7 = arith.constant 0 : index
    %11 = vector.load %arg3[%c96, %c0_7] : memref<440x64xf32, #tpu.memory_space<vmem>>, vector<32x64xf32>
    %c128 = arith.constant 128 : index
    %c0_8 = arith.constant 0 : index
    %12 = vector.load %arg3[%c128, %c0_8] : memref<440x64xf32, #tpu.memory_space<vmem>>, vector<64x32xf32>
    %c192 = arith.constant 192 : index
    %c0_9 = arith.constant 0 : index
    %13 = vector.load %arg3[%c192, %c0_9] : memref<440x64xf32, #tpu.memory_space<vmem>>, vector<64x32xf32>
    %c256 = arith.constant 256 : index
    %c0_10 = arith.constant 0 : index
    %14 = vector.load %arg3[%c256, %c0_10] : memref<440x64xf32, #tpu.memory_space<vmem>>, vector<32x64xf32>
    %c288 = arith.constant 288 : index
    %c0_11 = arith.constant 0 : index
    %15 = vector.load %arg3[%c288, %c0_11] : memref<440x64xf32, #tpu.memory_space<vmem>>, vector<32x64xf32>
    %c320 = arith.constant 320 : index
    %c0_12 = arith.constant 0 : index
    %16 = vector.load %arg3[%c320, %c0_12] : memref<440x64xf32, #tpu.memory_space<vmem>>, vector<64x32xf32>
    %c384 = arith.constant 384 : index
    %c0_13 = arith.constant 0 : index
    %17 = vector.load %arg3[%c384, %c0_13] : memref<440x64xf32, #tpu.memory_space<vmem>>, vector<1x32xf32>
    %c392 = arith.constant 392 : index
    %c0_14 = arith.constant 0 : index
    %18 = vector.load %arg3[%c392, %c0_14] : memref<440x64xf32, #tpu.memory_space<vmem>>, vector<1x32xf32>
    %c400 = arith.constant 400 : index
    %c0_15 = arith.constant 0 : index
    %19 = vector.load %arg3[%c400, %c0_15] : memref<440x64xf32, #tpu.memory_space<vmem>>, vector<1x64xf32>
    %c408 = arith.constant 408 : index
    %c0_16 = arith.constant 0 : index
    %20 = vector.load %arg3[%c408, %c0_16] : memref<440x64xf32, #tpu.memory_space<vmem>>, vector<1x32xf32>
    %c416 = arith.constant 416 : index
    %c0_17 = arith.constant 0 : index
    %21 = vector.load %arg3[%c416, %c0_17] : memref<440x64xf32, #tpu.memory_space<vmem>>, vector<1x32xf32>
    %c424 = arith.constant 424 : index
    %c0_18 = arith.constant 0 : index
    %22 = vector.load %arg3[%c424, %c0_18] : memref<440x64xf32, #tpu.memory_space<vmem>>, vector<1x64xf32>
    %c432 = arith.constant 432 : index
    %c0_19 = arith.constant 0 : index
    %23 = vector.load %arg3[%c432, %c0_19] : memref<440x64xf32, #tpu.memory_space<vmem>>, vector<1x32xf32>
    %24 = arith.truncf %0 : vector<64x32xf32> to vector<64x32xbf16>
    %cst = arith.constant dense<0.000000e+00> : vector<128x32xf32>
    %25 = tpu.matmul %7, %24, %cst {dimension_numbers = #tpu.dot_dimension_numbers<[1], [0], [0], [1], [0, 0, 1, 1], [], []>} : vector<128x64xbf16>, vector<64x32xbf16>, vector<128x32xf32> -> vector<128x32xf32>
    %26 = vector.extract_strided_slice %25 {offsets = [0, 0], sizes = [64, 32], strides = [1, 1]} : vector<128x32xf32> to vector<64x32xf32>
    %27 = vector.extract_strided_slice %25 {offsets = [64, 0], sizes = [32, 32], strides = [1, 1]} : vector<128x32xf32> to vector<32x32xf32>
    %28 = vector.extract_strided_slice %25 {offsets = [96, 0], sizes = [32, 32], strides = [1, 1]} : vector<128x32xf32> to vector<32x32xf32>
    %cst_20 = arith.constant dense<0.000000e+00> : vector<64x32xf32>
    %29 = tpu.matmul %26, %8, %cst_20 {dimension_numbers = #tpu.dot_dimension_numbers<[1], [0], [0], [1], [0, 0, 1, 1], [], []>} : vector<64x32xf32>, vector<32x32xf32>, vector<64x32xf32> -> vector<64x32xf32>
    %30 = vector.broadcast %17 : vector<1x32xf32> to vector<64x32xf32>
    %31 = arith.addf %29, %30 : vector<64x32xf32>
    %cst_21 = arith.constant 0.000000e+00 : f32
    %32 = vector.broadcast %cst_21 : f32 to vector<64x32xf32>
    %33 = arith.maximumf %31, %32 : vector<64x32xf32>
    %34 = math.absf %31 : vector<64x32xf32>
    %cst_22 = arith.constant 0.000000e+00 : f32
    %35 = vector.broadcast %cst_22 : f32 to vector<64x32xf32>
    %36 = arith.subf %35, %34 : vector<64x32xf32>
    %37 = math.exp %36 : vector<64x32xf32>
    %38 = math.log1p %37 : vector<64x32xf32>
    %39 = arith.addf %33, %38 : vector<64x32xf32>
    %40 = math.tanh %39 : vector<64x32xf32>
    %41 = arith.mulf %31, %40 : vector<64x32xf32>
    %cst_23 = arith.constant dense<0.000000e+00> : vector<64x32xf32>
    %42 = tpu.matmul %41, %9, %cst_23 {dimension_numbers = #tpu.dot_dimension_numbers<[1], [0], [0], [1], [0, 0, 1, 1], [], []>} : vector<64x32xf32>, vector<32x32xf32>, vector<64x32xf32> -> vector<64x32xf32>
    %43 = arith.addf %26, %42 : vector<64x32xf32>
    %44 = vector.broadcast %18 : vector<1x32xf32> to vector<64x32xf32>
    %45 = arith.addf %43, %44 : vector<64x32xf32>
    %cst_24 = arith.constant dense<0.000000e+00> : vector<32x64xf32>
    %46 = tpu.matmul %27, %10, %cst_24 {dimension_numbers = #tpu.dot_dimension_numbers<[1], [0], [0], [1], [0, 0, 1, 1], [], []>} : vector<32x32xf32>, vector<32x64xf32>, vector<32x64xf32> -> vector<32x64xf32>
    %cst_25 = arith.constant dense<0.000000e+00> : vector<32x64xf32>
    %47 = tpu.matmul %28, %11, %cst_25 {dimension_numbers = #tpu.dot_dimension_numbers<[1], [0], [0], [1], [0, 0, 1, 1], [], []>} : vector<32x32xf32>, vector<32x64xf32>, vector<32x64xf32> -> vector<32x64xf32>
    %48 = arith.addf %46, %47 : vector<32x64xf32>
    %49 = vector.broadcast %19 : vector<1x64xf32> to vector<32x64xf32>
    %50 = arith.addf %48, %49 : vector<32x64xf32>
    %cst_26 = arith.constant 0.000000e+00 : f32
    %51 = vector.broadcast %cst_26 : f32 to vector<32x64xf32>
    %52 = arith.maximumf %50, %51 : vector<32x64xf32>
    %53 = math.absf %50 : vector<32x64xf32>
    %cst_27 = arith.constant 0.000000e+00 : f32
    %54 = vector.broadcast %cst_27 : f32 to vector<32x64xf32>
    %55 = arith.subf %54, %53 : vector<32x64xf32>
    %56 = math.exp %55 : vector<32x64xf32>
    %57 = math.log1p %56 : vector<32x64xf32>
    %58 = arith.addf %52, %57 : vector<32x64xf32>
    %59 = math.tanh %58 : vector<32x64xf32>
    %60 = arith.mulf %50, %59 : vector<32x64xf32>
    %cst_28 = arith.constant dense<0.000000e+00> : vector<32x32xf32>
    %61 = tpu.matmul %60, %12, %cst_28 {dimension_numbers = #tpu.dot_dimension_numbers<[1], [0], [0], [1], [0, 0, 1, 1], [], []>} : vector<32x64xf32>, vector<64x32xf32>, vector<32x32xf32> -> vector<32x32xf32>
    %62 = arith.addf %27, %61 : vector<32x32xf32>
    %63 = vector.broadcast %20 : vector<1x32xf32> to vector<32x32xf32>
    %64 = arith.addf %62, %63 : vector<32x32xf32>
    %cst_29 = arith.constant dense<0.000000e+00> : vector<32x32xf32>
    %65 = tpu.matmul %60, %13, %cst_29 {dimension_numbers = #tpu.dot_dimension_numbers<[1], [0], [0], [1], [0, 0, 1, 1], [], []>} : vector<32x64xf32>, vector<64x32xf32>, vector<32x32xf32> -> vector<32x32xf32>
    %66 = arith.addf %28, %65 : vector<32x32xf32>
    %67 = vector.broadcast %21 : vector<1x32xf32> to vector<32x32xf32>
    %68 = arith.addf %66, %67 : vector<32x32xf32>
    %69 = tpu.concatenate %45, %64, %68 in 0 : vector<64x32xf32>, vector<32x32xf32>, vector<32x32xf32> -> vector<128x32xf32>
    %c0_30 = arith.constant 0 : index
    %c0_31 = arith.constant 0 : index
    %70 = vector.load %arg5[%c0_30, %c0_31] : memref<128x32xf32, #tpu.memory_space<vmem>>, vector<128x32xf32>
    tpu.vector_store %arg5[%c0_30, %c0_31], %69 {strides = array<i32>} : memref<128x32xf32, #tpu.memory_space<vmem>>, vector<128x32xf32>,
    %cst_32 = arith.constant -1.000000e+30 : f32
    %71 = vector.broadcast %cst_32 : f32 to vector<32x64xf32>
    %c0_i32 = arith.constant 0 : i32
    %c4_i32 = arith.constant 4 : i32
    %72 = arith.addi %c0_i32, %c4_i32 : i32
    %c1_i32 = arith.constant 1 : i32
    %73 = scf.for %arg6 = %c0_i32 to %72 step %c1_i32 iter_args(%arg7 = %71) -> (vector<32x64xf32>)  : i32 {
      %c32_i32 = arith.constant 32 : i32
      %122 = arith.muli %arg6, %c32_i32 : i32
      %123 = tpu.assume_multiple %122, 32 : i32
      %124 = arith.index_cast %123 : i32 to index
      %c0_52 = arith.constant 0 : index
      %125 = vector.load %arg1[%124, %c0_52] : memref<128x1xi32, #tpu.memory_space<vmem>>, vector<32x1xi32>
      %126 = tpu.iota {dimensions = array<i32: 1>} : vector<32x64xi32>
      %127 = vector.broadcast %125 : vector<32x1xi32> to vector<32x64xi32>
      %128 = arith.cmpi eq, %126, %127 : vector<32x64xi32>
      %129 = arith.index_cast %123 : i32 to index
      %c0_53 = arith.constant 0 : index
      %130 = vector.load %arg5[%129, %c0_53] : memref<128x32xf32, #tpu.memory_space<vmem>>, vector<32x32xf32>
      %131 = vector.shape_cast %128 : vector<32x64xi1> to vector<32x1x64xi1>
      %132 = vector.shape_cast %130 : vector<32x32xf32> to vector<32x32x1xf32>
      %cst_54 = arith.constant -1.000000e+30 : f32
      %133 = vector.shape_cast %131 : vector<32x1x64xi1> to vector<32x1x64xi1>
      %134 = vector.broadcast %133 : vector<32x1x64xi1> to vector<32x32x64xi1>
      %135 = vector.shape_cast %132 : vector<32x32x1xf32> to vector<32x32x1xf32>
      %136 = vector.broadcast %135 : vector<32x32x1xf32> to vector<32x32x64xf32>
      %137 = vector.broadcast %cst_54 : f32 to vector<32x32x64xf32>
      %138 = arith.select %134, %136, %137 : vector<32x32x64xi1>, vector<32x32x64xf32>
      %cst_55 = arith.constant dense<0xFF800000> : vector<32x64xf32>
      %139 = vector.multi_reduction <maximumf>, %138, %cst_55 [0] : vector<32x32x64xf32> to vector<32x64xf32>
      %140 = arith.maximumf %arg7, %139 : vector<32x64xf32>
      scf.yield %140 : vector<32x64xf32>
    }
    %c4_i32_33 = arith.constant 4 : i32
    %c0_34 = arith.constant 0 : index
    %c0_35 = arith.constant 0 : index
    %74 = vector.load %arg2[%c0_34, %c0_35] : memref<64x1xf32, #tpu.memory_space<vmem>>, vector<64x1xf32>
    %cst_36 = arith.constant 0.000000e+00 : f32
    %75 = vector.broadcast %cst_36 : f32 to vector<64x1xf32>
    %76 = arith.cmpf ogt, %74, %75 : vector<64x1xf32>
    %77 = tpu.transpose %73, [1, 0] : vector<32x64xf32> -> vector<64x32xf32>
    %cst_37 = arith.constant 0.000000e+00 : f32
    %78 = vector.shape_cast %76 : vector<64x1xi1> to vector<64x1xi1>
    %79 = vector.broadcast %78 : vector<64x1xi1> to vector<64x32xi1>
    %80 = vector.broadcast %cst_37 : f32 to vector<64x32xf32>
    %81 = arith.select %79, %77, %80 : vector<64x32xi1>, vector<64x32xf32>
    %82 = arith.truncf %81 : vector<64x32xf32> to vector<64x32xbf16>
    %cst_38 = arith.constant dense<0.000000e+00> : vector<128x32xf32>
    %83 = tpu.matmul %7, %82, %cst_38 {dimension_numbers = #tpu.dot_dimension_numbers<[1], [0], [0], [1], [0, 0, 1, 1], [], []>} : vector<128x64xbf16>, vector<64x32xbf16>, vector<128x32xf32> -> vector<128x32xf32>
    %84 = arith.subf %69, %83 : vector<128x32xf32>
    %cst_39 = arith.constant 1.200000e+01 : f32
    %85 = vector.broadcast %cst_39 : f32 to vector<128x32xf32>
    %86 = arith.mulf %85, %84 : vector<128x32xf32>
    %c0_i32_40 = arith.constant 0 : i32
    %87 = vector.broadcast %c0_i32_40 : i32 to vector<128x1xi32>
    %88 = arith.cmpi sge, %1, %87 : vector<128x1xi32>
    %cst_41 = arith.constant -1.000000e+02 : f32
    %89 = vector.shape_cast %88 : vector<128x1xi1> to vector<128x1xi1>
    %90 = vector.broadcast %89 : vector<128x1xi1> to vector<128x32xi1>
    %91 = vector.broadcast %cst_41 : f32 to vector<128x32xf32>
    %92 = arith.select %90, %86, %91 : vector<128x32xi1>, vector<128x32xf32>
    %93 = math.exp %92 : vector<128x32xf32>
    %94 = arith.truncf %93 : vector<128x32xf32> to vector<128x32xbf16>
    %cst_42 = arith.constant dense<0.000000e+00> : vector<64x32xf32>
    %95 = tpu.matmul %7, %94, %cst_42 {dimension_numbers = #tpu.dot_dimension_numbers<[0], [0], [1], [1], [0, 1, 1, 1], [], []>} : vector<128x64xbf16>, vector<128x32xbf16>, vector<64x32xf32> -> vector<64x32xf32>
    %cst_43 = arith.constant 1.000000e-16 : f32
    %96 = vector.broadcast %cst_43 : f32 to vector<64x32xf32>
    %97 = arith.addf %96, %95 : vector<64x32xf32>
    %98 = math.log %97 : vector<64x32xf32>
    %cst_44 = arith.constant 0.0833333358 : f32
    %99 = vector.broadcast %cst_44 : f32 to vector<64x32xf32>
    %100 = arith.mulf %98, %99 : vector<64x32xf32>
    %101 = arith.extf %82 : vector<64x32xbf16> to vector<64x32xf32>
    %102 = arith.addf %100, %101 : vector<64x32xf32>
    %cst_45 = arith.constant dense<0.000000e+00> : vector<64x64xf32>
    %103 = tpu.matmul %102, %14, %cst_45 {dimension_numbers = #tpu.dot_dimension_numbers<[1], [0], [0], [1], [0, 0, 1, 1], [], []>} : vector<64x32xf32>, vector<32x64xf32>, vector<64x64xf32> -> vector<64x64xf32>
    %cst_46 = arith.constant dense<0.000000e+00> : vector<64x64xf32>
    %104 = tpu.matmul %0, %15, %cst_46 {dimension_numbers = #tpu.dot_dimension_numbers<[1], [0], [0], [1], [0, 0, 1, 1], [], []>} : vector<64x32xf32>, vector<32x64xf32>, vector<64x64xf32> -> vector<64x64xf32>
    %105 = arith.addf %103, %104 : vector<64x64xf32>
    %106 = vector.broadcast %22 : vector<1x64xf32> to vector<64x64xf32>
    %107 = arith.addf %105, %106 : vector<64x64xf32>
    %cst_47 = arith.constant 0.000000e+00 : f32
    %108 = vector.broadcast %cst_47 : f32 to vector<64x64xf32>
    %109 = arith.maximumf %107, %108 : vector<64x64xf32>
    %110 = math.absf %107 : vector<64x64xf32>
    %cst_48 = arith.constant 0.000000e+00 : f32
    %111 = vector.broadcast %cst_48 : f32 to vector<64x64xf32>
    %112 = arith.subf %111, %110 : vector<64x64xf32>
    %113 = math.exp %112 : vector<64x64xf32>
    %114 = math.log1p %113 : vector<64x64xf32>
    %115 = arith.addf %109, %114 : vector<64x64xf32>
    %116 = math.tanh %115 : vector<64x64xf32>
    %117 = arith.mulf %107, %116 : vector<64x64xf32>
    %cst_49 = arith.constant dense<0.000000e+00> : vector<64x32xf32>
    %118 = tpu.matmul %117, %16, %cst_49 {dimension_numbers = #tpu.dot_dimension_numbers<[1], [0], [0], [1], [0, 0, 1, 1], [], []>} : vector<64x64xf32>, vector<64x32xf32>, vector<64x32xf32> -> vector<64x32xf32>
    %119 = vector.broadcast %23 : vector<1x32xf32> to vector<64x32xf32>
    %120 = arith.addf %118, %119 : vector<64x32xf32>
    %c0_50 = arith.constant 0 : index
    %c0_51 = arith.constant 0 : index
    %121 = vector.load %arg4[%c0_50, %c0_51] : memref<64x32xf32, #tpu.memory_space<vmem>>, vector<64x32xf32>
    tpu.vector_store %arg4[%c0_50, %c0_51], %120 {strides = array<i32>} : memref<64x32xf32, #tpu.memory_space<vmem>>, vector<64x32xf32>,
    return
  }
}

</mosaic_0001>

<bundles_post_ra>
// kernel: tpu_custom_call.1
= control target key start
LH: loop header
LB: loop body
LE: loop exit
PB: predicated region body
PF: predicated region fallthrough
CT: control target
= control target key end

     0   :  { %v5744_v0 = vmov 0   ;;  %v5746_v31 = vlaneseq  ;;  %v3518_v34 = vmov 0.0   ;;  %vm207_vm4 = vcmask 523264   ;;  %s5738_s1 = inlined_call_operand.vmem [shape: s32[128,1], index: 1, kind: input, shape index: {}]   ;;  %s5739_s2 = inlined_call_operand.vmem [shape: f32[64,1], index: 2, kind: input, shape index: {}]   ;;  %s5740_s4 = inlined_call_operand.vmem [shape: f32[64,32], index: 4, kind: output, shape index: {}]   ;;  %s5741_s0 = inlined_call_operand.vmem [shape: f32[64,32], index: 0, kind: input, shape index: {}]   ;;  %s5742_s3 = inlined_call_operand.vmem [shape: f32[440,64], index: 3, kind: input, shape index: {}]  }
   0x1   :  { %3188 = vset.pattern.permute.xlu1 %v5744_v0  ;;  %3187 = vset.pattern.permute.xlu0 %v5744_v0  ;;  %v3552_v1 = vld [vmem:[%s5738_s1 + $0x10] sm:$0xff]  ;;  %v3557_v2 = vld [vmem:[%s5738_s1] sm:$0xff]  ;;  %v3571_v4 = vld [vmem:[%s5738_s1 + $0x18] sm:$0xff] }
   0x2   :  { %5834 = vst [vmem:[#allocation3_spill] sm:$0xff] %v3552_v1  ;;  %51 = vperm.xlu1 %3188, %v3552_v1   ;;  %45 = vperm.xlu0 %3187, %v3557_v2   ;;  %v3565_v3 = vld [vmem:[%s5738_s1 + $0x20] sm:$0xff]  ;;  %v3576_v5 = vld [vmem:[%s5738_s1 + $0x8] sm:$0xff]  ;;  %v3588_v7 = vld [vmem:[%s5741_s0 + $0x30] sm:$0xff]  ;;  %v3699_v32 = vand.u32 127, %v5746_v31 }
   0x3   :  { %5835 = vst [vmem:[#allocation4_spill] sm:$0xff] %v3557_v2  ;;  %3189 = vset.pattern.permute.xlu2 %v5744_v0  ;;  %v3581_v6 = vld [vmem:[%s5738_s1 + $0x28] sm:$0xff]  ;;  %v3593_v8 = vld [vmem:[%s5741_s0 + $0x38] sm:$0xff]  ;;  %v3606_v11 = vld [vmem:[%s5738_s1 + $0x30] sm:$0xff] }
   0x4   :  { %5836 = vst [vmem:[#allocation5_spill] sm:$0xff] %v3565_v3  ;;  %57 = vperm.xlu2 %3189, %v3565_v3   ;;  %v206_v9 = vpack.c.bf16 %v3593_v8, %v3588_v7  ;;  %v3601_v10 = vld [vmem:[%s5738_s1 + $0x38] sm:$0xff]  ;;  %v3611_v12 = vld [vmem:[%s5738_s1 + $0x40] sm:$0xff]  ;;  %v3619_v13 = vld [vmem:[%s5738_s1 + $0x50] sm:$0xff] }
   0x5   :  { %5837 = vst [vmem:[#allocation6_spill] sm:$0xff] %v3571_v4  ;;  %v3624_v14 = vld [vmem:[%s5738_s1 + $0x48] sm:$0xff]  ;;  %v3629_v15 = vld [vmem:[%s5738_s1 + $0x58] sm:$0xff]  ;;  %v3642_v17 = vld [vmem:[%s5738_s1 + $0x60] sm:$0xff] }
   0x6   :  { %5838 = vst [vmem:[#allocation7_spill] sm:$0xff] %v3576_v5  ;;  %236 = vmatpush.bf16.msra.mxu0 %v206_v9  ;;  %v3637_v16 = vld [vmem:[%s5738_s1 + $0x68] sm:$0xff]  ;;  %v3647_v18 = vld [vmem:[%s5738_s1 + $0x70] sm:$0xff]  ;;  %v3655_v19 = vld [vmem:[%s5738_s1 + $0x78] sm:$0xff] }
   0x7   :  { %5839 = vst [vmem:[#allocation8_spill] sm:$0xff] %v3581_v6  ;;  %v3661_v20 = vld [vmem:[%s5741_s0 + $0x20] sm:$0xff]  ;;  %v3666_v21 = vld [vmem:[%s5741_s0 + $0x28] sm:$0xff]  ;;  %v3673_v23 = vld [vmem:[%s5741_s0 + $0x10] sm:$0xff] }
   0x8   :  { %5840 = vst [vmem:[#allocation9_spill] sm:$0xff] %v3588_v7  ;;  %v205_v22 = vpack.c.bf16 %v3666_v21, %v3661_v20  ;;  %v3678_v24 = vld [vmem:[%s5741_s0 + $0x18] sm:$0xff]  ;;  %v3685_v26 = vld [vmem:[%s5741_s0] sm:$0xff]  ;;  %v3690_v27 = vld [vmem:[%s5741_s0 + $0x8] sm:$0xff] }
   0x9   :  { %5841 = vst [vmem:[#allocation10_spill] sm:$0xff] %v3593_v8  ;;  %v204_v25 = vpack.c.bf16 %v3678_v24, %v3673_v23  ;;  %v203_v28 = vpack.c.bf16 %v3690_v27, %v3685_v26  ;;  %v3908_v0 = vld [vmem:[%s5742_s3 + $0x168] sm:$0xff]  ;;  %v3913_v31 = vld [vmem:[%s5742_s3 + $0x170] sm:$0xff] }
   0xa   :  { %54 = vperm.xlu1 %3188, %v3571_v4   ;;  %48 = vperm.xlu0 %3187, %v3576_v5   ;;  %5842 = vst [vmem:[#allocation11_spill] sm:$0xff] %v3601_v10 }
   0xb   :  { %5843 = vst [vmem:[#allocation12_spill] sm:$0xff] %v3606_v11  ;;  %237 = vmatpush.bf16.msra.mxu0 %v205_v22 }
   0xc   :  { %60 = vperm.xlu2 %3189, %v3581_v6   ;;  %5844 = vst [vmem:[#allocation13_spill] sm:$0xff] %v3611_v12 }
   0xd   :  { %5845 = vst [vmem:[#allocation14_spill] sm:$0xff] %v3619_v13 }
   0xe   :  { %5846 = vst [vmem:[#allocation15_spill] sm:$0xff] %v3624_v14 }
   0xf   :  { %5847 = vst [vmem:[#allocation16_spill] sm:$0xff] %v3629_v15  ;;  %238 = vmatpush.bf16.msra.mxu0 %v204_v25 }
  0x10   :  { %5848 = vst [vmem:[#allocation17_spill] sm:$0xff] %v3637_v16 }
  0x11   :  { %5849 = vst [vmem:[#allocation18_spill] sm:$0xff] %v3642_v17 }
  0x12   :  { %66 = vperm.xlu1 %3188, %v3601_v10   ;;  %63 = vperm.xlu0 %3187, %v3606_v11   ;;  %5850 = vst [vmem:[#allocation19_spill] sm:$0xff] %v3647_v18 }
  0x13   :  { %5851 = vst [vmem:[#allocation20_spill] sm:$0xff] %v3655_v19  ;;  %239 = vmatpush.bf16.msra.mxu0 %v203_v28 }
  0x14   :  { %69 = vperm.xlu2 %3189, %v3611_v12   ;;  %5852 = vst [vmem:[#allocation21_spill] sm:$0xff] %v3661_v20 }
  0x15   :  { %5853 = vst [vmem:[#allocation22_spill] sm:$0xff] %v3666_v21 }
  0x16   :  { %5854 = vst [vmem:[#allocation23_spill] sm:$0xff] %v3673_v23 }
  0x17   :  { %5855 = vst [vmem:[#allocation24_spill] sm:$0xff] %v3678_v24 }
  0x18   :  { %5856 = vst [vmem:[#allocation25_spill] sm:$0xff] %v3685_v26 }
  0x19   :  { %5857 = vst [vmem:[#allocation26_spill] sm:$0xff] %v3690_v27 }
  0x1a   :  { %75 = vperm.xlu1 %3188, %v3619_v13   ;;  %72 = vperm.xlu0 %3187, %v3624_v14   ;;  %5860 = vst [vmem:[#allocation29_spill] sm:$0xff] %v3699_v32 }
  0x1b   :  { %5896 = vst [vmem:[#allocation65_spill] sm:$0xff] %v3908_v0  ;;  %v148_v0 = vld [vmem:[%s5742_s3] sm:$0xff] }
  0x1c   :  { %78 = vperm.xlu2 %3189, %v3629_v15   ;;  %5897 = vst [vmem:[#allocation66_spill] sm:$0xff] %v3913_v31 }
  0x22   :  { %84 = vperm.xlu1 %3188, %v3637_v16   ;;  %81 = vperm.xlu0 %3187, %v3642_v17  }
  0x24   :  { %87 = vperm.xlu2 %3189, %v3647_v18  }
  0x2a   :  { %90 = vperm.xlu0 %3187, %v3655_v19  }
  0x5e   :  { %v3694_v29 = vpop.permute.xlu2 %57 }
  0x5f   :  { %5858 = vst [vmem:[#allocation27_spill] sm:$0xff] %v3694_v29  ;;  %vm5800_vm12 = vcmp.eq.s32.totalorder %v3699_v32, %v3694_v29 }
  0x60   :  { %v3022_v63 = vsel %vm5800_vm12, 1.0, %v3518_v34 }
  0x66   :  { %v3696_v30 = vpop.permute.xlu2 %60 }
  0x67   :  { %5859 = vst [vmem:[#allocation28_spill] sm:$0xff] %v3696_v30  ;;  %vm5798_vm13 = vcmp.eq.s32.totalorder %v3699_v32, %v3696_v30  ;;  %v160_v30 = vld [vmem:[%s5742_s3 + $0x60] sm:$0xff] }
  0x68   :  { %v3023_v9 = vsel %vm5798_vm13, 1.0, %v3518_v34 }
  0x69   :  { %v3813_v28 = vpack.c.bf16 %v3023_v9, %v3022_v63  ;;  %v3878_v63 = vld [vmem:[%s5742_s3 + $0x138] sm:$0xff]  ;;  %v3883_v9 = vld [vmem:[%s5742_s3 + $0x140] sm:$0xff] }
  0x6a   :  { %5890 = vst [vmem:[#allocation59_spill] sm:$0xff] %v3878_v63 }
  0x6b   :  { %5880 = vst [vmem:[#allocation49_spill] sm:$0xff] %v3813_v28 }
  0x6c   :  { %5891 = vst [vmem:[#allocation60_spill] sm:$0xff] %v3883_v9  ;;  %v3918_v9 = vld [vmem:[%s5742_s3 + $0x178] sm:$0xff] }
  0x6d   :  { %5898 = vst [vmem:[#allocation67_spill] sm:$0xff] %v3918_v9 }
  0x6e   :  { %v3701_v33 = vpop.permute.xlu2 %69 }
  0x6f   :  { %5861 = vst [vmem:[#allocation30_spill] sm:$0xff] %v3701_v33  ;;  %vm5817_vm0 = vcmp.eq.s32.totalorder %v3699_v32, %v3701_v33 }
  0x70   :  { %v3026_v35 = vsel %vm5817_vm0, 1.0, %v3518_v34 }
  0x74   :  { %v3708_v36 = vpop.permute.xlu1 %51  ;;  %v3710_v37 = vpop.permute.xlu0 %45 }
  0x75   :  { %5862 = vst [vmem:[#allocation31_spill] sm:$0xff] %v3708_v36  ;;  %vm5747_vm2 = vcmp.eq.s32.totalorder %v3699_v32, %v3710_v37  ;;  %vm5784_vm6 = vcmp.eq.s32.totalorder %v3699_v32, %v3708_v36  ;;  %v161_v36 = vld [vmem:[%s5742_s3 + $0x68] sm:$0xff] }
  0x76   :  { %5863 = vst [vmem:[#allocation32_spill] sm:$0xff] %v3710_v37  ;;  %v3712_v38 = vpop.permute.xlu2 %78  ;;  %v3018_v42 = vsel %vm5747_vm2, 1.0, %v3518_v34  ;;  %v3020_v49 = vsel %vm5784_vm6, 1.0, %v3518_v34  ;;  %vm5831_vm2 = vcmask 261120   ;;  %v163_v37 = vld [vmem:[%s5742_s3 + $0x78] sm:$0xff] }
  0x77   :  { %5864 = vst [vmem:[#allocation33_spill] sm:$0xff] %v3712_v38  ;;  %vm5824_vm1 = vcmp.eq.s32.totalorder %v3699_v32, %v3712_v38  ;;  %590 = vmatpush.msra.mxu3 %v163_v37  ;;  %v158_v37 = vld [vmem:[%s5742_s3 + $0x50] sm:$0xff]  ;;  %v155_v38 = vld [vmem:[%s5742_s3 + $0x38] sm:$0xff] }
  0x78   :  { %v3029_v39 = vsel %vm5824_vm1, 1.0, %v3518_v34  ;;  %520 = vmatpush.msra.mxu2 %v155_v38  ;;  %v152_v38 = vld [vmem:[%s5742_s3 + $0x20] sm:$0xff] }
  0x7c   :  { %v3721_v40 = vpop.permute.xlu1 %54  ;;  %v3723_v41 = vpop.permute.xlu0 %48 }
  0x7d   :  { %5865 = vst [vmem:[#allocation34_spill] sm:$0xff] %v3721_v40  ;;  %vm5743_vm3 = vcmp.eq.s32.totalorder %v3699_v32, %v3723_v41  ;;  %vm5777_vm7 = vcmp.eq.s32.totalorder %v3699_v32, %v3721_v40  ;;  %v162_v40 = vld [vmem:[%s5742_s3 + $0x70] sm:$0xff] }
  0x7e   :  { %5866 = vst [vmem:[#allocation35_spill] sm:$0xff] %v3723_v41  ;;  %v3019_v43 = vsel %vm5743_vm3, 1.0, %v3518_v34  ;;  %v3733_v44 = vpop.permute.xlu2 %87  ;;  %v3021_v50 = vsel %vm5777_vm7, 1.0, %v3518_v34  ;;  %591 = vmatpush.msra.mxu3 %v162_v40  ;;  %v157_v40 = vld [vmem:[%s5742_s3 + $0x48] sm:$0xff] }
  0x7f   :  { %5867 = vst [vmem:[#allocation36_spill] sm:$0xff] %v3733_v44  ;;  %v3735_v45 = vpack.c.bf16 %v3019_v43, %v3018_v42  ;;  %vm5830_vm5 = vcmp.eq.s32.totalorder %v3699_v32, %v3733_v44  ;;  %v3772_v55 = vpack.c.bf16 %v3021_v50, %v3020_v49  ;;  %v3843_v49 = vld [vmem:[%s5742_s3 + $0x100] sm:$0xff]  ;;  %v3853_v50 = vld [vmem:[%s5742_s3 + $0x110] sm:$0xff]  ;;  %v153_v44 = vld [vmem:[%s5742_s3 + $0x28] sm:$0xff] }
  0x80   :  { %v3032_v46 = vsel %vm5830_vm5, 1.0, %v3518_v34  ;;  %5883 = vst [vmem:[#allocation52_spill] sm:$0xff] %v3843_v49  ;;  %592 = vmatpush.msra.mxu3 %v161_v36 }
  0x81   :  { %5868 = vst [vmem:[#allocation37_spill] sm:$0xff] %v3735_v45  ;;  %3034 = vmatmul.msk.bf16.vlgmr.msra.gmra.mxu0 %vm207_vm4, %v3735_v45 }
  0x82   :  { %5873 = vst [vmem:[#allocation42_spill] sm:$0xff] %v3772_v55  ;;  %593 = vmatpush.msra.mxu3 %v160_v30 }
  0x83   :  { %5885 = vst [vmem:[#allocation54_spill] sm:$0xff] %v3853_v50 }
  0x84   :  { %v3744_v47 = vpop.permute.xlu1 %66  ;;  %v3746_v48 = vpop.permute.xlu0 %63 }
  0x85   :  { %5869 = vst [vmem:[#allocation38_spill] sm:$0xff] %v3744_v47  ;;  %vm5809_vm15 = vcmp.eq.s32.totalorder %v3699_v32, %v3744_v47  ;;  %vm5810_vm3 = vcmp.eq.s32.totalorder %v3699_v32, %v3746_v48  ;;  %v159_v47 = vld [vmem:[%s5742_s3 + $0x58] sm:$0xff] }
  0x86   :  { %5870 = vst [vmem:[#allocation39_spill] sm:$0xff] %v3746_v48  ;;  %v3024_v42 = vsel %vm5810_vm3, 1.0, %v3518_v34  ;;  %631 = vmatpush.msrb.mxu3 %v159_v47  ;;  %v156_v47 = vld [vmem:[%s5742_s3 + $0x40] sm:$0xff] }
  0x88   :  { %632 = vmatpush.msrb.mxu3 %v158_v37 }
  0x8a   :  { %633 = vmatpush.msrb.mxu3 %v157_v40 }
  0x8c   :  { %v3758_v51 = vpop.permute.xlu1 %75  ;;  %v3760_v52 = vpop.permute.xlu0 %72  ;;  %634 = vmatpush.msrb.mxu3 %v156_v47  ;;  %v4026_v47 = vld [vmem:[%s5742_s3 + $0x180] ss:$0 sm:$0xff] }
  0x8d   :  { %5871 = vst [vmem:[#allocation40_spill] sm:$0xff] %v3758_v51  ;;  %vm5825_vm8 = vcmp.eq.s32.totalorder %v3699_v32, %v3758_v51  ;;  %vm5816_vm9 = vcmp.eq.s32.totalorder %v3699_v32, %v3760_v52 }
  0x8e   :  { %5872 = vst [vmem:[#allocation41_spill] sm:$0xff] %v3760_v52  ;;  %v3028_v53 = vsel %vm5825_vm8, 1.0, %v3518_v34  ;;  %v3027_v54 = vsel %vm5816_vm9, 1.0, %v3518_v34 }
  0x8f   :  { %v3774_v56 = vpack.c.bf16 %v3029_v39, %v3028_v53  ;;  %v3776_v57 = vpack.c.bf16 %v3027_v54, %v3026_v35  ;;  %v3025_v39 = vsel %vm5809_vm15, 1.0, %v3518_v34  ;;  %v3858_v53 = vld [vmem:[%s5742_s3 + $0x118] sm:$0xff]  ;;  %v3863_v54 = vld [vmem:[%s5742_s3 + $0x120] sm:$0xff] }
  0x90   :  { %v3829_v43 = vpack.c.bf16 %v3025_v39, %v3024_v42  ;;  %5886 = vst [vmem:[#allocation55_spill] sm:$0xff] %v3858_v53  ;;  %v3893_v39 = vld [vmem:[%s5742_s3 + $0x150] sm:$0xff]  ;;  %v3898_v42 = vld [vmem:[%s5742_s3 + $0x158] sm:$0xff] }
  0x91   :  { %5874 = vst [vmem:[#allocation43_spill] sm:$0xff] %v3774_v56  ;;  %3035 = vmatmul.msk.bf16.gmra.mxu0 %vm207_vm4, %v3772_v55 }
  0x92   :  { %5875 = vst [vmem:[#allocation44_spill] sm:$0xff] %v3776_v57 }
  0x93   :  { %5882 = vst [vmem:[#allocation51_spill] sm:$0xff] %v3829_v43 }
  0x94   :  { %v3780_v58 = vpop.permute.xlu1 %84  ;;  %v3782_v59 = vpop.permute.xlu0 %81  ;;  %5887 = vst [vmem:[#allocation56_spill] sm:$0xff] %v3863_v54 }
  0x95   :  { %5876 = vst [vmem:[#allocation45_spill] sm:$0xff] %v3780_v58  ;;  %vm5827_vm10 = vcmp.eq.s32.totalorder %v3699_v32, %v3780_v58  ;;  %vm5828_vm11 = vcmp.eq.s32.totalorder %v3699_v32, %v3782_v59 }
  0x96   :  { %5877 = vst [vmem:[#allocation46_spill] sm:$0xff] %v3782_v59  ;;  %v3031_v60 = vsel %vm5827_vm10, 1.0, %v3518_v34  ;;  %v3030_v61 = vsel %vm5828_vm11, 1.0, %v3518_v34  ;;  %v154_v59 = vld [vmem:[%s5742_s3 + $0x30] sm:$0xff] }
  0x97   :  { %v3794_v62 = vpack.c.bf16 %v3031_v60, %v3030_v61  ;;  %v3868_v60 = vld [vmem:[%s5742_s3 + $0x128] sm:$0xff]  ;;  %v3873_v61 = vld [vmem:[%s5742_s3 + $0x130] sm:$0xff]  ;;  %5893 = vst [vmem:[#allocation62_spill] sm:$0xff] %v3893_v39  ;;  %521 = vmatpush.msra.mxu2 %v154_v59 }
  0x98   :  { %5888 = vst [vmem:[#allocation57_spill] sm:$0xff] %v3868_v60  ;;  %v3928_v39 = vld [vmem:[%s5742_s3 + $0x1b0] sm:$0x1] }
  0x99   :  { %5878 = vst [vmem:[#allocation47_spill] sm:$0xff] %v3794_v62  ;;  %522 = vmatpush.msra.mxu2 %v153_v44 }
  0x9a   :  { %5889 = vst [vmem:[#allocation58_spill] sm:$0xff] %v3873_v61 }
  0x9b   :  { %5894 = vst [vmem:[#allocation63_spill] sm:$0xff] %v3898_v42  ;;  %v150_v42 = vld [vmem:[%s5742_s3 + $0x10] sm:$0xff]  ;;  %523 = vmatpush.msra.mxu2 %v152_v38 }
  0x9c   :  { %v3806_v22 = vpop.permute.xlu0 %90  ;;  %5900 = vst [vmem:[#allocation69_spill] sm:$0xff] %v3928_v39 }
  0x9d   :  { %5879 = vst [vmem:[#allocation48_spill] sm:$0xff] %v3806_v22  ;;  %vm5829_vm14 = vcmp.eq.s32.totalorder %v3699_v32, %v3806_v22 }
  0x9e   :  { %v3033_v25 = vsel %vm5829_vm14, 1.0, %v3518_v34  ;;  %v3848_v34 = vld [vmem:[%s5742_s3 + $0x108] sm:$0xff] }
  0x9f   :  { %v3815_v35 = vpack.c.bf16 %v3033_v25, %v3032_v46  ;;  %v151_v46 = vld [vmem:[%s5742_s3 + $0x18] sm:$0xff]  ;;  %5884 = vst [vmem:[#allocation53_spill] sm:$0xff] %v3848_v34  ;;  %v3888_v25 = vld [vmem:[%s5742_s3 + $0x148] sm:$0xff] }
  0xa0   :  { %319 = vmatpush.msra.mxu1 %v151_v46  ;;  %5892 = vst [vmem:[#allocation61_spill] sm:$0xff] %v3888_v25  ;;  %v3903_v46 = vld [vmem:[%s5742_s3 + $0x160] sm:$0xff]  ;;  %v3923_v25 = vld [vmem:[%s5742_s3 + $0x1a8] sm:$0x1] }
  0xa1   :  { %5881 = vst [vmem:[#allocation50_spill] sm:$0xff] %v3815_v35  ;;  %3036 = vmatmul.msk.bf16.gmra.mxu0 %vm207_vm4, %v3813_v28 }
  0xa2   :  { %5895 = vst [vmem:[#allocation64_spill] sm:$0xff] %v3903_v46  ;;  %v149_v46 = vld [vmem:[%s5742_s3 + $0x8] sm:$0xff]  ;;  %320 = vmatpush.msra.mxu1 %v150_v42 }
  0xa3   :  { %5899 = vst [vmem:[#allocation68_spill] sm:$0xff] %v3923_v25 }
  0xa4   :  { %321 = vmatpush.msra.mxu1 %v149_v46 }
  0xa6   :  { %322 = vmatpush.msra.mxu1 %v148_v0 }
  0xb1   :  { %3037 = vmatmul.msk.bf16.gmra.mxu0 %vm207_vm4, %v3829_v43 }
  0xc1   :  { %3038 = vmatmul.msk.bf16.gmra.mxu0 %vm207_vm4, %v3776_v57 }
  0xd1   :  { %3039 = vmatmul.msk.bf16.gmra.mxu0 %vm207_vm4, %v3774_v56 }
  0xe1   :  { %3040 = vmatmul.msk.bf16.gmra.mxu0 %vm207_vm4, %v3794_v62 }
  0xf1   :  { %3041 = vmatmul.msk.bf16.gmra.mxu0 %vm207_vm4, %v3815_v35 }
  0xfe   :  { %v3943_v39 = vpop.f32.mrf.mxu0 }
  0xff   :  { %3042 = vmatmul.msk.f32.vlgmr.msra.gmra.mxu1 %vm5831_vm2, %v3943_v39 }
 0x106   :  { %v3947_v25 = vpop.f32.mrf.mxu0 }
 0x107   :  { %3043 = vmatmul.msk.f32.gmra.mxu1 %vm5831_vm2, %v3947_v25 }
 0x10e   :  { %v3951_v42 = vpop.f32.mrf.mxu0 }
 0x10f   :  { %3044 = vmatmul.msk.f32.gmra.mxu1 %vm5831_vm2, %v3951_v42 }
 0x116   :  { %v3955_v0 = vpop.f32.mrf.mxu0 }
 0x117   :  { %3045 = vmatmul.msk.f32.gmra.mxu1 %vm5831_vm2, %v3955_v0 }
 0x11e   :  { %v3959_v46 = vpop.f32.mrf.mxu0 }
 0x11f   :  { %3046 = vmatmul.msk.f32.gmra.mxu1 %vm5831_vm2, %v3959_v46 }
 0x126   :  { %v3963_v31 = vpop.f32.mrf.mxu0 }
 0x127   :  { %3047 = vmatmul.msk.f32.gmra.mxu1 %vm5831_vm2, %v3963_v31 }
 0x12e   :  { %v3967_v9 = vpop.f32.mrf.mxu0 }
 0x12f   :  { %3048 = vmatmul.msk.f32.gmra.mxu1 %vm5831_vm2, %v3967_v9 }
 0x136   :  { %v3971_v41 = vpop.f32.mrf.mxu0 }
 0x137   :  { %3049 = vmatmul.msk.f32.gmra.mxu1 %vm5831_vm2, %v3971_v41 }
 0x13e   :  { %v3987_v29 = vpop.f32.mrf.mxu0 }
 0x146   :  { %v3992_v48 = vpop.f32.mrf.mxu0 }
 0x14e   :  { %v3997_v36 = vpop.f32.mrf.mxu0 }
 0x156   :  { %v4002_v30 = vpop.f32.mrf.mxu0 }
 0x15e   :  { %v4007_v52 = vpop.f32.mrf.mxu0 }
 0x15f   :  { %3058 = vmatmul.msk.f32.vlgmr.msra.gmra.mxu3 %vm5831_vm2, %v4007_v52 }
 0x166   :  { %v4011_v37 = vpop.f32.mrf.mxu0 }
 0x167   :  { %3059 = vmatmul.msk.f32.gmra.mxu3 %vm5831_vm2, %v4011_v37 }
 0x16e   :  { %v4015_v33 = vpop.f32.mrf.mxu0 }
 0x16f   :  { %3060 = vmatmul.msk.f32.gmra.mxu3 %vm5831_vm2, %v4015_v33 }
 0x176   :  { %v4019_v40 = vpop.f32.mrf.mxu0 }
 0x177   :  { %3061 = vmatmul.msk.f32.gmra.mxu3 %vm5831_vm2, %v4019_v40 }
 0x17c   :  { %v324_v51 = vpop.f32.mrf.mxu1 }
 0x17d   :  { %v4032_v58 = vadd.f32 %v4026_v47, %v324_v51 }
 0x17f   :  { %v356_v22 = vand.u32 2147483647, %v4032_v58  ;;  %3062 = vmatmul.msk.f32.vlgmr.msrb.gmra.mxu3 %vm5831_vm2, %v3987_v29 }
 0x181   :  { %v364_v35 = vsub.f32 0.0, %v356_v22 }
 0x183   :  { %v372_v51 = vmul.f32 1.442695, %v364_v35 }
 0x184   :  { %v327_v19 = vpop.f32.mrf.mxu1 }
 0x185   :  { %3195 = vpow2.f32 %v372_v51  ;;  %v4047_v59 = vadd.f32 %v4026_v47, %v327_v19 }
 0x187   :  { %v357_v62 = vand.u32 2147483647, %v4047_v59  ;;  %3063 = vmatmul.msk.f32.gmra.mxu3 %vm5831_vm2, %v3992_v48 }
 0x189   :  { %v365_v56 = vsub.f32 0.0, %v357_v62 }
 0x18b   :  { %v3196_v57 = vpop.eup %3195  ;;  %v374_v44 = vmul.f32 1.442695, %v365_v56 }
 0x18c   :  { %v388_v22 = vadd.f32 1.0, %v3196_v57  ;;  %v391_v43 = vmul.f32 -0.5, %v3196_v57  ;;  %v330_v28 = vpop.f32.mrf.mxu1  ;;  %v394_v55 = vand.u32 2147483647, %v3196_v57 }
 0x18d   :  { %3197 = vpow2.f32 %v374_v44  ;;  %v4053_v38 = vadd.f32 %v4026_v47, %v330_v28 }
 0x18e   :  { %3199 = vlog2.f32 %v388_v22  ;;  %v392_v19 = vadd.f32 1.0, %v391_v43  ;;  %v348_v22 = vmax.f32 %v4032_v58, 0.0  ;;  %vm395_vm7 = vcmp.lt.f32.partialorder %v394_v55, 0.0004427343 }
 0x18f   :  { %v358_v35 = vand.u32 2147483647, %v4053_v38  ;;  %3064 = vmatmul.msk.f32.gmra.mxu3 %vm5831_vm2, %v3997_v36 }
 0x190   :  { %v393_v56 = vmul.f32 %v3196_v57, %v392_v19 }
 0x191   :  { %v366_v51 = vsub.f32 0.0, %v358_v35 }
 0x193   :  { %v3198_v45 = vpop.eup %3197  ;;  %v376_v62 = vmul.f32 1.442695, %v366_v51 }
 0x194   :  { %v3200_v5 = vpop.eup %3199  ;;  %v397_v2 = vadd.f32 1.0, %v3198_v45  ;;  %v333_v4 = vpop.f32.mrf.mxu1  ;;  %v400_v44 = vmul.f32 -0.5, %v3198_v45 }
 0x195   :  { %v390_v1 = vmul.f32 0.6931472, %v3200_v5  ;;  %3201 = vpow2.f32 %v376_v62  ;;  %v4059_v28 = vadd.f32 %v4026_v47, %v333_v4  ;;  %v403_v5 = vand.u32 2147483647, %v3198_v45 }
 0x196   :  { %3203 = vlog2.f32 %v397_v2  ;;  %v401_v57 = vadd.f32 1.0, %v400_v44  ;;  %v349_v2 = vmax.f32 %v4047_v59, 0.0 }
 0x197   :  { %v396_v6 = vsel %vm395_vm7, %v393_v56, %v390_v1  ;;  %v359_v43 = vand.u32 2147483647, %v4059_v28  ;;  %3065 = vmatmul.msk.f32.gmra.mxu3 %vm5831_vm2, %v4002_v30  ;;  %vm404_vm7 = vcmp.lt.f32.partialorder %v403_v5, 0.0004427343 }
 0x198   :  { %v460_v35 = vadd.f32 %v396_v6, %v348_v22  ;;  %v402_v55 = vmul.f32 %v3198_v45, %v401_v57 }
 0x199   :  { %v367_v19 = vsub.f32 0.0, %v359_v43 }
 0x19a   :  { %3205 = vtanh.f32 %v460_v35 }
 0x19b   :  { %v3202_v51 = vpop.eup %3201  ;;  %v378_v62 = vmul.f32 1.442695, %v367_v19 }
 0x19c   :  { %v3204_v8 = vpop.eup %3203  ;;  %v406_v4 = vadd.f32 1.0, %v3202_v51  ;;  %v409_v3 = vmul.f32 -0.5, %v3202_v51  ;;  %v336_v10 = vpop.f32.mrf.mxu1 }
 0x19d   :  { %v399_v7 = vmul.f32 0.6931472, %v3204_v8  ;;  %3207 = vpow2.f32 %v378_v62  ;;  %v4066_v1 = vadd.f32 %v4026_v47, %v336_v10  ;;  %v412_v8 = vand.u32 2147483647, %v3202_v51 }
 0x19e   :  { %3209 = vlog2.f32 %v406_v4  ;;  %v410_v43 = vadd.f32 1.0, %v409_v3  ;;  %v350_v3 = vmax.f32 %v4053_v38, 0.0 }
 0x19f   :  { %v405_v6 = vsel %vm404_vm7, %v402_v55, %v399_v7  ;;  %v360_v56 = vand.u32 2147483647, %v4066_v1  ;;  %vm413_vm7 = vcmp.lt.f32.partialorder %v412_v8, 0.0004427343 }
 0x1a0   :  { %v3206_v44 = vpop.eup %3205  ;;  %v461_v22 = vadd.f32 %v405_v6, %v349_v2  ;;  %v411_v62 = vmul.f32 %v3202_v51, %v410_v43 }
 0x1a1   :  { %v368_v35 = vsub.f32 0.0, %v360_v56  ;;  %v476_v19 = vmul.f32 %v3206_v44, %v4032_v58 }
 0x1a2   :  { %3211 = vtanh.f32 %v461_v22 }
 0x1a3   :  { %v3208_v45 = vpop.eup %3207  ;;  %v380_v57 = vmul.f32 1.442695, %v368_v35  ;;  %3050 = vmatmul.msk.f32.vlgmr.msra.gmra.mxu2 %vm5831_vm2, %v476_v19 }
 0x1a4   :  { %v3210_v10 = vpop.eup %3209  ;;  %v415_v11 = vadd.f32 1.0, %v3208_v45  ;;  %v339_v5 = vpop.f32.mrf.mxu1  ;;  %v418_v7 = vmul.f32 -0.5, %v3208_v45  ;;  %v421_v43 = vand.u32 2147483647, %v3208_v45 }
 0x1a5   :  { %v408_v4 = vmul.f32 0.6931472, %v3210_v10  ;;  %3213 = vpow2.f32 %v380_v57  ;;  %v4073_v55 = vadd.f32 %v4026_v47, %v339_v5 }
 0x1a6   :  { %3215 = vlog2.f32 %v415_v11  ;;  %v419_v44 = vadd.f32 1.0, %v418_v7  ;;  %v351_v7 = vmax.f32 %v4059_v28, 0.0 }
 0x1a7   :  { %v414_v58 = vsel %vm413_vm7, %v411_v62, %v408_v4  ;;  %v361_v2 = vand.u32 2147483647, %v4073_v55  ;;  %vm422_vm7 = vcmp.lt.f32.partialorder %v421_v43, 0.0004427343 }
 0x1a8   :  { %v3212_v6 = vpop.eup %3211  ;;  %v462_v56 = vadd.f32 %v414_v58, %v350_v3  ;;  %v420_v62 = vmul.f32 %v3208_v45, %v419_v44 }
 0x1a9   :  { %v369_v22 = vsub.f32 0.0, %v361_v2  ;;  %v477_v51 = vmul.f32 %v3212_v6, %v4047_v59 }
 0x1aa   :  { %3217 = vtanh.f32 %v462_v56 }
 0x1ab   :  { %v3214_v35 = vpop.eup %3213  ;;  %v382_v19 = vmul.f32 1.442695, %v369_v22  ;;  %3051 = vmatmul.msk.f32.gmra.mxu2 %vm5831_vm2, %v477_v51 }
 0x1ac   :  { %v3216_v57 = vpop.eup %3215  ;;  %v424_v10 = vadd.f32 1.0, %v3214_v35  ;;  %v427_v5 = vmul.f32 -0.5, %v3214_v35  ;;  %v342_v8 = vpop.f32.mrf.mxu1  ;;  %v430_v51 = vand.u32 2147483647, %v3214_v35 }
 0x1ad   :  { %v417_v11 = vmul.f32 0.6931472, %v3216_v57  ;;  %3219 = vpow2.f32 %v382_v19  ;;  %v4080_v4 = vadd.f32 %v4026_v47, %v342_v8 }
 0x1ae   :  { %3221 = vlog2.f32 %v424_v10  ;;  %v428_v6 = vadd.f32 1.0, %v427_v5  ;;  %v352_v5 = vmax.f32 %v4066_v1, 0.0 }
 0x1af   :  { %v423_v59 = vsel %vm422_vm7, %v420_v62, %v417_v11  ;;  %v362_v3 = vand.u32 2147483647, %v4080_v4  ;;  %vm431_vm7 = vcmp.lt.f32.partialorder %v430_v51, 0.0004427343 }
 0x1b0   :  { %v3218_v58 = vpop.eup %3217  ;;  %v463_v2 = vadd.f32 %v423_v59, %v351_v7  ;;  %v429_v57 = vmul.f32 %v3214_v35, %v428_v6 }
 0x1b1   :  { %v370_v56 = vsub.f32 0.0, %v362_v3  ;;  %v478_v22 = vmul.f32 %v3218_v58, %v4053_v38 }
 0x1b2   :  { %3223 = vtanh.f32 %v463_v2 }
 0x1b3   :  { %v3220_v45 = vpop.eup %3219  ;;  %v384_v44 = vmul.f32 1.442695, %v370_v56  ;;  %3052 = vmatmul.msk.f32.gmra.mxu2 %vm5831_vm2, %v478_v22 }
 0x1b4   :  { %v3222_v19 = vpop.eup %3221  ;;  %v433_v8 = vadd.f32 1.0, %v3220_v45  ;;  %v345_v43 = vpop.f32.mrf.mxu1  ;;  %v436_v11 = vmul.f32 -0.5, %v3220_v45  ;;  %v439_v6 = vand.u32 2147483647, %v3220_v45 }
 0x1b5   :  { %v426_v10 = vmul.f32 0.6931472, %v3222_v19  ;;  %3225 = vpow2.f32 %v384_v44  ;;  %v4087_v62 = vadd.f32 %v4026_v47, %v345_v43 }
 0x1b6   :  { %3227 = vlog2.f32 %v433_v8  ;;  %v437_v58 = vadd.f32 1.0, %v436_v11 }
 0x1b7   :  { %v432_v38 = vsel %vm431_vm7, %v429_v57, %v426_v10  ;;  %v363_v7 = vand.u32 2147483647, %v4087_v62  ;;  %v353_v57 = vmax.f32 %v4073_v55, 0.0  ;;  %vm440_vm7 = vcmp.lt.f32.partialorder %v439_v6, 0.0004427343 }
 0x1b8   :  { %v3224_v59 = vpop.eup %3223  ;;  %v464_v3 = vadd.f32 %v432_v38, %v352_v5  ;;  %v438_v51 = vmul.f32 %v3220_v45, %v437_v58 }
 0x1b9   :  { %v371_v2 = vsub.f32 0.0, %v363_v7  ;;  %v479_v35 = vmul.f32 %v3224_v59, %v4059_v28 }
 0x1ba   :  { %3229 = vtanh.f32 %v464_v3 }
 0x1bb   :  { %v3226_v56 = vpop.eup %3225  ;;  %v386_v22 = vmul.f32 1.442695, %v371_v2  ;;  %3053 = vmatmul.msk.f32.gmra.mxu2 %vm5831_vm2, %v479_v35  ;;  %v354_v35 = vmax.f32 %v4080_v4, 0.0 }
 0x1bc   :  { %v3228_v47 = vpop.eup %3227  ;;  %v442_v44 = vadd.f32 1.0, %v3226_v56  ;;  %v445_v8 = vmul.f32 -0.5, %v3226_v56  ;;  %v448_v38 = vand.u32 2147483647, %v3226_v56 }
 0x1bd   :  { %v435_v19 = vmul.f32 0.6931472, %v3228_v47  ;;  %3231 = vpow2.f32 %v386_v22 }
 0x1be   :  { %3233 = vlog2.f32 %v442_v44  ;;  %v446_v28 = vadd.f32 1.0, %v445_v8  ;;  %vm449_vm6 = vcmp.lt.f32.partialorder %v448_v38, 0.0004427343 }
 0x1bf   :  { %v441_v43 = vsel %vm440_vm7, %v438_v51, %v435_v19  ;;  %v171_v51 = vld [vmem:[%s5742_s3 + $0xb8] sm:$0xff] }
 0x1c0   :  { %v3230_v10 = vpop.eup %3229  ;;  %v465_v11 = vadd.f32 %v441_v43, %v353_v57  ;;  %v447_v58 = vmul.f32 %v3226_v56, %v446_v28  ;;  %741 = vmatpush.msrb.mxu2 %v171_v51  ;;  %v355_v43 = vmax.f32 %v4087_v62, 0.0 }
 0x1c1   :  { %v480_v5 = vmul.f32 %v3230_v10, %v4066_v1 }
 0x1c2   :  { %3235 = vtanh.f32 %v465_v11 }
 0x1c3   :  { %v3232_v7 = vpop.eup %3231  ;;  %3054 = vmatmul.msk.f32.gmra.mxu2 %vm5831_vm2, %v480_v5  ;;  %v170_v5 = vld [vmem:[%s5742_s3 + $0xb0] sm:$0xff] }
 0x1c4   :  { %v3234_v59 = vpop.eup %3233  ;;  %v451_v3 = vadd.f32 1.0, %v3232_v7  ;;  %v454_v2 = vmul.f32 -0.5, %v3232_v7  ;;  %v457_v19 = vand.u32 2147483647, %v3232_v7  ;;  %742 = vmatpush.msrb.mxu2 %v170_v5 }
 0x1c5   :  { %v444_v45 = vmul.f32 0.6931472, %v3234_v59 }
 0x1c6   :  { %3237 = vlog2.f32 %v451_v3  ;;  %v455_v44 = vadd.f32 1.0, %v454_v2  ;;  %v3191_v2 = vld [vmem:[%s5742_s3 + $0x190] ss:$0 sm:$0xff] }
 0x1c7   :  { %v450_v6 = vsel %vm449_vm6, %v447_v58, %v444_v45  ;;  %vm458_vm6 = vcmp.lt.f32.partialorder %v457_v19, 0.0004427343  ;;  %v165_v19 = vld [vmem:[%s5742_s3 + $0x88] sm:$0xff] }
 0x1c8   :  { %v3236_v22 = vpop.eup %3235  ;;  %v466_v47 = vadd.f32 %v450_v6, %v354_v35  ;;  %v456_v57 = vmul.f32 %v3232_v7, %v455_v44  ;;  %v169_v7 = vld [vmem:[%s5742_s3 + $0xa8] sm:$0xff]  ;;  %v168_v35 = vld [vmem:[%s5742_s3 + $0xa0] sm:$0xff]  ;;  %v166_v44 = vld [vmem:[%s5742_s3 + $0x90] sm:$0xff] }
 0x1c9   :  { %v481_v1 = vmul.f32 %v3236_v22, %v4073_v55  ;;  %743 = vmatpush.msrb.mxu2 %v169_v7  ;;  %v167_v22 = vld [vmem:[%s5742_s3 + $0x98] sm:$0xff] }
 0x1ca   :  { %3239 = vtanh.f32 %v466_v47 }
 0x1cb   :  { %3055 = vmatmul.msk.f32.gmra.mxu2 %vm5831_vm2, %v481_v1 }
 0x1cc   :  { %v3238_v56 = vpop.eup %3237  ;;  %744 = vmatpush.msrb.mxu2 %v168_v35 }
 0x1cd   :  { %v453_v8 = vmul.f32 0.6931472, %v3238_v56  ;;  %v164_v56 = vld [vmem:[%s5742_s3 + $0x80] sm:$0xff] }
 0x1ce   :  { %745 = vmatpush.msrb.mxu2 %v167_v22 }
 0x1cf   :  { %v459_v10 = vsel %vm458_vm6, %v456_v57, %v453_v8 }
 0x1d0   :  { %v3240_v11 = vpop.eup %3239  ;;  %v467_v28 = vadd.f32 %v459_v10, %v355_v43  ;;  %746 = vmatpush.msrb.mxu2 %v166_v44 }
 0x1d1   :  { %v482_v55 = vmul.f32 %v3240_v11, %v4080_v4 }
 0x1d2   :  { %3241 = vtanh.f32 %v467_v28  ;;  %747 = vmatpush.msrb.mxu2 %v165_v19 }
 0x1d3   :  { %3056 = vmatmul.msk.f32.gmra.mxu2 %vm5831_vm2, %v482_v55 }
 0x1d4   :  { %748 = vmatpush.msrb.mxu2 %v164_v56 }
 0x1d8   :  { %v3242_v38 = vpop.eup %3241 }
 0x1d9   :  { %v483_v59 = vmul.f32 %v3242_v38, %v4087_v62 }
 0x1db   :  { %3057 = vmatmul.msk.f32.gmra.mxu2 %vm5831_vm2, %v483_v59 }
 0x1e2   :  { %v595_v3 = vpop.f32.mrf.mxu3 }
 0x1ea   :  { %v598_v4 = vpop.f32.mrf.mxu3 }
 0x1f2   :  { %v601_v45 = vpop.f32.mrf.mxu3 }
 0x1fa   :  { %v604_v58 = vpop.f32.mrf.mxu3 }
 0x202   :  { %v636_v62 = vpop.f32.mrf.mxu3 }
 0x203   :  { %v637_v6 = vadd.f32 %v636_v62, %v595_v3 }
 0x205   :  { %v4122_v47 = vadd.f32 %v3191_v2, %v637_v6 }
 0x207   :  { %v657_v1 = vand.u32 2147483647, %v4122_v47 }
 0x209   :  { %v661_v51 = vsub.f32 0.0, %v657_v1  ;;  %v179_v1 = vld [vmem:[%s5742_s3 + $0xf8] sm:$0xff] }
 0x20a   :  { %v639_v8 = vpop.f32.mrf.mxu3  ;;  %779 = vmatpush.msra.mxu2 %v179_v1  ;;  %v174_v1 = vld [vmem:[%s5742_s3 + $0xd0] sm:$0xff] }
 0x20b   :  { %v665_v57 = vmul.f32 1.442695, %v661_v51  ;;  %v640_v43 = vadd.f32 %v639_v8, %v598_v4 }
 0x20d   :  { %3243 = vpow2.f32 %v665_v57  ;;  %v4134_v10 = vadd.f32 %v3191_v2, %v640_v43 }
 0x20f   :  { %v658_v11 = vand.u32 2147483647, %v4134_v10 }
 0x211   :  { %v662_v28 = vsub.f32 0.0, %v658_v11  ;;  %v177_v11 = vld [vmem:[%s5742_s3 + $0xe8] sm:$0xff] }
 0x212   :  { %v642_v55 = vpop.f32.mrf.mxu3 }
 0x213   :  { %v3244_v5 = vpop.eup %3243  ;;  %v667_v38 = vmul.f32 1.442695, %v662_v28  ;;  %v643_v59 = vadd.f32 %v642_v55, %v601_v45  ;;  %v178_v45 = vld [vmem:[%s5742_s3 + $0xf0] sm:$0xff] }
 0x214   :  { %v673_v7 = vadd.f32 1.0, %v3244_v5  ;;  %v676_v3 = vmul.f32 -0.5, %v3244_v5  ;;  %v679_v22 = vand.u32 2147483647, %v3244_v5  ;;  %780 = vmatpush.msra.mxu2 %v178_v45 }
 0x215   :  { %3245 = vpow2.f32 %v667_v38  ;;  %v4137_v35 = vadd.f32 %v3191_v2, %v643_v59  ;;  %v653_v59 = vmax.f32 %v4122_v47, 0.0 }
 0x216   :  { %3247 = vlog2.f32 %v673_v7  ;;  %v677_v6 = vadd.f32 1.0, %v676_v3  ;;  %vm680_vm7 = vcmp.lt.f32.partialorder %v679_v22, 0.0004427343  ;;  %781 = vmatpush.msra.mxu2 %v177_v11  ;;  %v4168_v11 = vld [vmem:[%s5742_s3 + $0x188] ss:$0 sm:$0xff] }
 0x217   :  { %v659_v62 = vand.u32 2147483647, %v4137_v35 }
 0x218   :  { %v678_v57 = vmul.f32 %v3244_v5, %v677_v6 }
 0x219   :  { %v663_v4 = vsub.f32 0.0, %v659_v62  ;;  %v175_v62 = vld [vmem:[%s5742_s3 + $0xd8] sm:$0xff] }
 0x21a   :  { %v645_v44 = vpop.f32.mrf.mxu3 }
 0x21b   :  { %v3246_v19 = vpop.eup %3245  ;;  %v669_v51 = vmul.f32 1.442695, %v663_v4  ;;  %v646_v56 = vadd.f32 %v645_v44, %v604_v58  ;;  %v176_v58 = vld [vmem:[%s5742_s3 + $0xe0] sm:$0xff] }
 0x21c   :  { %v3248_v8 = vpop.eup %3247  ;;  %v682_v43 = vadd.f32 1.0, %v3246_v19  ;;  %v685_v55 = vmul.f32 -0.5, %v3246_v19  ;;  %782 = vmatpush.msra.mxu2 %v176_v58  ;;  %v688_v4 = vand.u32 2147483647, %v3246_v19 }
 0x21d   :  { %v675_v28 = vmul.f32 0.6931472, %v3248_v8  ;;  %3249 = vpow2.f32 %v669_v51  ;;  %v4149_v38 = vadd.f32 %v3191_v2, %v646_v56  ;;  %v173_v56 = vld [vmem:[%s5742_s3 + $0xc8] sm:$0xff] }
 0x21e   :  { %3251 = vlog2.f32 %v682_v43  ;;  %v686_v2 = vadd.f32 1.0, %v685_v55  ;;  %783 = vmatpush.msra.mxu2 %v175_v62  ;;  %vm689_vm6 = vcmp.lt.f32.partialorder %v688_v4, 0.0004427343 }
 0x21f   :  { %v681_v5 = vsel %vm680_vm7, %v678_v57, %v675_v28  ;;  %v660_v7 = vand.u32 2147483647, %v4149_v38  ;;  %v654_v28 = vmax.f32 %v4134_v10, 0.0 }
 0x220   :  { %v709_v3 = vadd.f32 %v681_v5, %v653_v59  ;;  %v687_v57 = vmul.f32 %v3246_v19, %v686_v2  ;;  %784 = vmatpush.msra.mxu2 %v174_v1  ;;  %v172_v2 = vld [vmem:[%s5742_s3 + $0xc0] sm:$0xff] }
 0x221   :  { %v664_v6 = vsub.f32 0.0, %v660_v7 }
 0x222   :  { %3253 = vtanh.f32 %v709_v3  ;;  %785 = vmatpush.msra.mxu2 %v173_v56 }
 0x223   :  { %v3250_v22 = vpop.eup %3249  ;;  %v671_v44 = vmul.f32 1.442695, %v664_v6 }
 0x224   :  { %v3252_v45 = vpop.eup %3251  ;;  %v691_v51 = vadd.f32 1.0, %v3250_v22  ;;  %v694_v43 = vmul.f32 -0.5, %v3250_v22  ;;  %v697_v6 = vand.u32 2147483647, %v3250_v22  ;;  %786 = vmatpush.msra.mxu2 %v172_v2 }
 0x225   :  { %v684_v8 = vmul.f32 0.6931472, %v3252_v45  ;;  %3255 = vpow2.f32 %v671_v44 }
 0x226   :  { %3257 = vlog2.f32 %v691_v51  ;;  %v525_v55 = vpop.f32.mrf.mxu2  ;;  %v695_v3 = vadd.f32 1.0, %v694_v43  ;;  %v655_v51 = vmax.f32 %v4137_v35, 0.0  ;;  %vm698_vm7 = vcmp.lt.f32.partialorder %v697_v6, 0.0004427343 }
 0x227   :  { %v690_v59 = vsel %vm689_vm6, %v687_v57, %v684_v8  ;;  %v549_v58 = vadd.f32 %v525_v55, %v3943_v39 }
 0x228   :  { %v3254_v5 = vpop.eup %3253  ;;  %v710_v7 = vadd.f32 %v690_v59, %v654_v28  ;;  %v696_v1 = vmul.f32 %v3250_v22, %v695_v3 }
 0x229   :  { %v717_v19 = vmul.f32 %v3254_v5, %v4122_v47  ;;  %v4174_v62 = vadd.f32 %v4168_v11, %v549_v58 }
 0x22a   :  { %3259 = vtanh.f32 %v710_v7 }
 0x22b   :  { %5901 = vst [vmem:[#allocation70_spill] sm:$0xff] %v4174_v62  ;;  %v3256_v4 = vpop.eup %3255  ;;  %3066 = vmatmul.msk.f32.vlgmr.msrb.gmra.mxu2 %vm207_vm4, %v717_v19 }
 0x22c   :  { %809 = vst.msk [vmem:[#allocation2] sm:$0xff] %vm5831_vm2, %v4174_v62  ;;  %v3258_v39 = vpop.eup %3257  ;;  %v700_v44 = vadd.f32 1.0, %v3256_v4  ;;  %v703_v45 = vmul.f32 -0.5, %v3256_v4  ;;  %v706_v5 = vand.u32 2147483647, %v3256_v4 }
 0x22d   :  { %v693_v47 = vmul.f32 0.6931472, %v3258_v39 }
 0x22e   :  { %3261 = vlog2.f32 %v700_v44  ;;  %v528_v56 = vpop.f32.mrf.mxu2  ;;  %v704_v55 = vadd.f32 1.0, %v703_v45  ;;  %vm707_vm6 = vcmp.lt.f32.partialorder %v706_v5, 0.0004427343 }
 0x22f   :  { %v699_v8 = vsel %vm698_vm7, %v696_v1, %v693_v47  ;;  %v550_v57 = vadd.f32 %v528_v56, %v3947_v25  ;;  %v656_v25 = vmax.f32 %v4149_v38, 0.0 }
 0x230   :  { %v3260_v43 = vpop.eup %3259  ;;  %v711_v28 = vadd.f32 %v699_v8, %v655_v51  ;;  %v705_v3 = vmul.f32 %v3256_v4, %v704_v55 }
 0x231   :  { %v4185_v59 = vadd.f32 %v4168_v11, %v550_v57  ;;  %v718_v58 = vmul.f32 %v3260_v43, %v4134_v10 }
 0x232   :  { %3263 = vtanh.f32 %v711_v28 }
 0x233   :  { %5902 = vst [vmem:[#allocation71_spill] sm:$0xff] %v4185_v59  ;;  %3067 = vmatmul.msk.f32.gmra.mxu2 %vm207_vm4, %v718_v58 }
 0x234   :  { %810 = vst.msk [vmem:[#allocation2 + $0x8] sm:$0xff] %vm5831_vm2, %v4185_v59  ;;  %v3262_v22 = vpop.eup %3261 }
 0x235   :  { %v702_v7 = vmul.f32 0.6931472, %v3262_v22 }
 0x236   :  { %v531_v2 = vpop.f32.mrf.mxu2 }
 0x237   :  { %v708_v6 = vsel %vm707_vm6, %v705_v3, %v702_v7  ;;  %v551_v39 = vadd.f32 %v531_v2, %v3951_v42 }
 0x238   :  { %v3264_v44 = vpop.eup %3263  ;;  %v712_v47 = vadd.f32 %v708_v6, %v656_v25 }
 0x239   :  { %v4194_v10 = vadd.f32 %v4168_v11, %v551_v39  ;;  %v719_v1 = vmul.f32 %v3264_v44, %v4137_v35 }
 0x23a   :  { %3265 = vtanh.f32 %v712_v47 }
 0x23b   :  { %5903 = vst [vmem:[#allocation72_spill] sm:$0xff] %v4194_v10  ;;  %3068 = vmatmul.msk.f32.gmra.mxu2 %vm207_vm4, %v719_v1 }
 0x23c   :  { %811 = vst.msk [vmem:[#allocation2 + $0x10] sm:$0xff] %vm5831_vm2, %v4194_v10 }
 0x23e   :  { %v534_v4 = vpop.f32.mrf.mxu2 }
 0x23f   :  { %v552_v45 = vadd.f32 %v534_v4, %v3955_v0 }
 0x240   :  { %v3266_v51 = vpop.eup %3265 }
 0x241   :  { %v4202_v56 = vadd.f32 %v4168_v11, %v552_v45  ;;  %v720_v42 = vmul.f32 %v3266_v51, %v4149_v38 }
 0x243   :  { %5904 = vst [vmem:[#allocation73_spill] sm:$0xff] %v4202_v56  ;;  %3069 = vmatmul.msk.f32.gmra.mxu2 %vm207_vm4, %v720_v42 }
 0x244   :  { %812 = vst.msk [vmem:[#allocation2 + $0x18] sm:$0xff] %vm5831_vm2, %v4202_v56 }
 0x246   :  { %v537_v35 = vpop.f32.mrf.mxu2 }
 0x247   :  { %v553_v8 = vadd.f32 %v537_v35, %v3959_v46 }
 0x249   :  { %v4210_v57 = vadd.f32 %v4168_v11, %v553_v8 }
 0x24b   :  { %5905 = vst [vmem:[#allocation74_spill] sm:$0xff] %v4210_v57  ;;  %3070 = vmatmul.msk.f32.vlgmr.msra.gmra.mxu2 %vm207_vm4, %v717_v19 }
 0x24c   :  { %813 = vst.msk [vmem:[#allocation2 + $0x20] sm:$0xff] %vm5831_vm2, %v4210_v57 }
 0x24e   :  { %v540_v0 = vpop.f32.mrf.mxu2 }
 0x24f   :  { %v554_v43 = vadd.f32 %v540_v0, %v3963_v31 }
 0x251   :  { %v4217_v38 = vadd.f32 %v4168_v11, %v554_v43  ;;  %v4284_v43 = vmov -1e+30  }
 0x253   :  { %5906 = vst [vmem:[#allocation75_spill] sm:$0xff] %v4217_v38  ;;  %3071 = vmatmul.msk.f32.gmra.mxu2 %vm207_vm4, %v718_v58 }
 0x254   :  { %814 = vst.msk [vmem:[#allocation2 + $0x28] sm:$0xff] %vm5831_vm2, %v4217_v38 }
 0x256   :  { %v543_v46 = vpop.f32.mrf.mxu2 }
 0x257   :  { %v555_v28 = vadd.f32 %v543_v46, %v3967_v9  ;;  %v3193_v9 = vld [vmem:[%s5742_s3 + $0x198] ss:$0 sm:$0xff]  ;;  %v4286_v46 = vmov -1e+30  }
 0x259   :  { %v4224_v55 = vadd.f32 %v4168_v11, %v555_v28 }
 0x25b   :  { %5907 = vst [vmem:[#allocation76_spill] sm:$0xff] %v4224_v55  ;;  %3072 = vmatmul.msk.f32.gmra.mxu2 %vm207_vm4, %v719_v1 }
 0x25c   :  { %815 = vst.msk [vmem:[#allocation2 + $0x30] sm:$0xff] %vm5831_vm2, %v4224_v55 }
 0x25e   :  { %v546_v31 = vpop.f32.mrf.mxu2 }
 0x25f   :  { %v556_v19 = vadd.f32 %v546_v31, %v3971_v41 }
 0x261   :  { %v4231_v5 = vadd.f32 %v4168_v11, %v556_v19 }
 0x263   :  { %5908 = vst [vmem:[#allocation77_spill] sm:$0xff] %v4231_v5  ;;  %3073 = vmatmul.msk.f32.gmra.mxu2 %vm207_vm4, %v720_v42 }
 0x264   :  { %816 = vst.msk [vmem:[#allocation2 + $0x38] sm:$0xff] %vm5831_vm2, %v4231_v5 }
 0x2ae   :  { %v750_v58 = vpop.f32.mrf.mxu2 }
 0x2af   :  { %v762_v22 = vadd.f32 %v750_v58, %v3987_v29 }
 0x2b1   :  { %v4240_v7 = vadd.f32 %v3193_v9, %v762_v22 }
 0x2b3   :  { %5909 = vst [vmem:[#allocation78_spill] sm:$0xff] %v4240_v7 }
 0x2b4   :  { %817 = vst.msk [vmem:[#allocation2 + $0x40] sm:$0xff] %vm5831_vm2, %v4240_v7 }
 0x2b6   :  { %v753_v41 = vpop.f32.mrf.mxu2 }
 0x2b7   :  { %v763_v11 = vadd.f32 %v753_v41, %v3992_v48  ;;  %v3194_v48 = vld [vmem:[%s5742_s3 + $0x1a0] ss:$0 sm:$0xff]  ;;  %s4290_s3 = smov 0  }
 0x2b9   :  { %v4245_v3 = vadd.f32 %v3193_v9, %v763_v11 }
 0x2bb   :  { %5910 = vst [vmem:[#allocation79_spill] sm:$0xff] %v4245_v3 }
 0x2bc   :  { %818 = vst.msk [vmem:[#allocation2 + $0x48] sm:$0xff] %vm5831_vm2, %v4245_v3 }
 0x2be   :  { %v756_v25 = vpop.f32.mrf.mxu2 }
 0x2bf   :  { %v764_v2 = vadd.f32 %v756_v25, %v3997_v36 }
 0x2c1   :  { %v4250_v6 = vadd.f32 %v3193_v9, %v764_v2 }
 0x2c3   :  { %5911 = vst [vmem:[#allocation80_spill] sm:$0xff] %v4250_v6 }
 0x2c4   :  { %819 = vst.msk [vmem:[#allocation2 + $0x50] sm:$0xff] %vm5831_vm2, %v4250_v6 }
 0x2c6   :  { %v759_v29 = vpop.f32.mrf.mxu2 }
 0x2c7   :  { %v765_v39 = vadd.f32 %v759_v29, %v4002_v30 }
 0x2c9   :  { %v4255_v44 = vadd.f32 %v3193_v9, %v765_v39 }
 0x2cb   :  { %5912 = vst [vmem:[#allocation81_spill] sm:$0xff] %v4255_v44 }
 0x2cc   :  { %820 = vst.msk [vmem:[#allocation2 + $0x58] sm:$0xff] %vm5831_vm2, %v4255_v44 }
 0x2ce   :  { %v788_v47 = vpop.f32.mrf.mxu2 }
 0x2cf   :  { %v800_v36 = vadd.f32 %v788_v47, %v4007_v52 }
 0x2d1   :  { %v4263_v1 = vadd.f32 %v3194_v48, %v800_v36 }
 0x2d3   :  { %5913 = vst [vmem:[#allocation82_spill] sm:$0xff] %v4263_v1 }
 0x2d4   :  { %821 = vst.msk [vmem:[#allocation2 + $0x60] sm:$0xff] %vm5831_vm2, %v4263_v1 }
 0x2d6   :  { %v791_v4 = vpop.f32.mrf.mxu2 }
 0x2d7   :  { %v801_v30 = vadd.f32 %v791_v4, %v4011_v37  ;;  %v4282_v37 = vmov -1e+30  }
 0x2d9   :  { %v4268_v45 = vadd.f32 %v3194_v48, %v801_v30 }
 0x2db   :  { %5914 = vst [vmem:[#allocation83_spill] sm:$0xff] %v4268_v45 }
 0x2dc   :  { %822 = vst.msk [vmem:[#allocation2 + $0x68] sm:$0xff] %vm5831_vm2, %v4268_v45 }
 0x2de   :  { %v794_v51 = vpop.f32.mrf.mxu2 }
 0x2df   :  { %v802_v42 = vadd.f32 %v794_v51, %v4015_v33  ;;  %v4288_v33 = vmov -1e+30  }
 0x2e1   :  { %v4273_v35 = vadd.f32 %v3194_v48, %v802_v42 }
 0x2e3   :  { %5915 = vst [vmem:[#allocation84_spill] sm:$0xff] %v4273_v35 }
 0x2e4   :  { %823 = vst.msk [vmem:[#allocation2 + $0x70] sm:$0xff] %vm5831_vm2, %v4273_v35 }
 0x2e6   :  { %v797_v52 = vpop.f32.mrf.mxu2 }
 0x2e7   :  { %v803_v8 = vadd.f32 %v797_v52, %v4019_v40 }
 0x2e9   :  { %v4278_v0 = vadd.f32 %v3194_v48, %v803_v8 }
 0x2eb   :  { %5916 = vst [vmem:[#allocation85_spill] sm:$0xff] %v4278_v0 }
 0x2ec   :  { %824 = vst.msk [vmem:[#allocation2 + $0x78] sm:$0xff] %vm5831_vm2, %v4278_v0 }
 0x2ed LB: > { %v5917_v32 = vld [vmem:[#allocation29_spill] sm:$0xff]  ;;  %5918 = vst [vmem:[#allocation86_spill] sm:$0xff] %v3499_v37  ;;  %v5921_v40 = vlaneseq  ;;  %v5785_v31 = vmov 0   ;;  %s3074_s12 = sshll.u32 %s3515_s3, 5  ;;  %v5922_v3 = vmov 0   ;;  %s830_s3 = sadd.s32 1, %s3515_s3   ;;  %v3499_v37 = vphi %v4282_v37, %v5996_v37   ;;  %s3515_s3 = sphi %s4290_s3, %s830_s3   ;;  %v3511_v33 = vphi %v4288_v33, %v5999_v33   ;;  %v3507_v46 = vphi %v4286_v46, %v5998_v46   ;;  %v3503_v43 = vphi %v4284_v43, %v5997_v43  }
 0x2ee   : > { %5919 = vst [vmem:[#allocation87_spill] sm:$0xff] %v3503_v43  ;;  %3268 = vset.pattern.permute.xlu1 %v5785_v31  ;;  %3267 = vset.pattern.permute.xlu0 %v5785_v31  ;;  %s836_s15 = scalar_lea.vmem %s5738_s1, %s3074_s12  ;;  %s4317_s16 = scalar_lea.vmem [#allocation2], %s3074_s12 }
 0x2ef   : > { %5920 = vst [vmem:[#allocation88_spill] sm:$0xff] %v3507_v46  ;;  %v4308_v28 = vshrl.u32 %v5921_v40, 7  ;;  %v839_v19 = vld [vmem:[%s836_s15 + $0x10] sm:$0xff]  ;;  %v837_v58 = vld [vmem:[%s836_s15] sm:$0xff]  ;;  %v840_v41 = vld [vmem:[%s836_s15 + $0x18] sm:$0xff]  ;;  %p827_p0 = scmp.ge.s32.totalorder %s830_s3, 4  }
 0x2f0   : > { %848 = vperm.xlu1 %3268, %v839_v19   ;;  %842 = vperm.xlu0 %3267, %v837_v58   ;;  %v838_v11 = vld [vmem:[%s836_s15 + $0x8] sm:$0xff] }
 0x2f1   : > { %3269 = vset.pattern.permute.xlu2 %v4308_v28  ;;  %v4327_v25 = vadd.s32 8, %v4308_v28  ;;  %v4330_v2 = vadd.s32 24, %v4308_v28  ;;  %v4352_v36 = vadd.s32 16, %v4308_v28 }
 0x2f3   : > { %v4320_v9 = vld [vmem:[%s4317_s16] sm:$0xff]  ;;  %v4345_v48 = vld [vmem:[%s4317_s16 + $0x8] sm:$0xff]  ;;  %v4355_v4 = vld [vmem:[%s4317_s16 + $0x10] sm:$0xff] }
 0x2f4   : > { %v4323_v22 = vperm.slane %v4320_v9, 0  ;;  %v947_v29 = vperm.slane %v4320_v9, 1  ;;  %v4340_v39 = vperm.slane %v4320_v9, 6  ;;  %v4348_v47 = vperm.slane %v4345_v48, 3  ;;  %v4369_v52 = vld [vmem:[%s4317_s16 + $0x18] sm:$0xff] }
 0x2f5   : > { %v4359_v30 = vperm.slane %v4355_v4, 0  ;;  %v972_v51 = vperm.slane %v4320_v9, 2  ;;  %v4365_v42 = vperm.slane %v4355_v4, 5  ;;  %v4373_v8 = vperm.slane %v4369_v52, 2 }
 0x2f6   : > { %v997_v40 = vperm.slane %v4320_v9, 3  ;;  %v4382_v19 = vperm.slane %v4345_v48, 0  ;;  %v4387_v58 = vperm.slane %v4345_v48, 5  ;;  %v4405_v31 = vperm.slane %v4369_v52, 4 }
 0x2f7   : > { %v4421_v5 = vperm.slane %v4320_v9, 5 }
 0x2f8   : > { %851 = vperm.xlu1 %3268, %v840_v41   ;;  %845 = vperm.xlu0 %3267, %v838_v11   ;;  %v4392_v41 = vperm.slane %v4355_v4, 2  ;;  %v4397_v11 = vperm.slane %v4355_v4, 7 }
 0x2f9   : > { %927 = vperm.xlu2 %3269, %v4323_v22  }
 0x300   : > { %3271 = vset.pattern.permute.xlu1 %v4330_v2  ;;  %3275 = vset.pattern.permute.xlu0 %v4330_v2 }
 0x301   : > { %3270 = vset.pattern.permute.xlu2 %v4327_v25 }
 0x308   : > { %945 = vperm.xlu1 %3271, %v4323_v22   ;;  %970 = vperm.xlu0 %3275, %v947_v29  }
 0x309   : > { %933 = vperm.xlu2 %3270, %v4323_v22  }
 0x310   : > { %3273 = vset.pattern.permute.xlu1 %v4327_v25  ;;  %1095 = vperm.xlu0 %3275, %v4340_v39  }
 0x311   : > { %3272 = vset.pattern.permute.xlu2 %v4308_v28 }
 0x318   : > { %958 = vperm.xlu1 %3273, %v947_v29   ;;  %1220 = vperm.xlu0 %3275, %v4348_v47  }
 0x319   : > { %952 = vperm.xlu2 %3272, %v947_v29  }
 0x320   : > { %3276 = vset.pattern.permute.xlu1 %v4308_v28  ;;  %1345 = vperm.xlu0 %3275, %v4359_v30  }
 0x321   : > { %3274 = vset.pattern.permute.xlu2 %v4352_v36 }
 0x328   : > { %977 = vperm.xlu1 %3276, %v972_v51   ;;  %1470 = vperm.xlu0 %3275, %v4365_v42  }
 0x329   : > { %964 = vperm.xlu2 %3274, %v947_v29   ;;  %v1022_v29 = vperm.slane %v4320_v9, 4 }
 0x330   : > { %3278 = vset.pattern.permute.xlu1 %v4352_v36  ;;  %1595 = vperm.xlu0 %3275, %v4373_v8  }
 0x331   : > { %3277 = vset.pattern.permute.xlu2 %v4327_v25 }
 0x338   : > { %989 = vperm.xlu1 %3278, %v972_v51   ;;  %3356 = vset.pattern.permute.xlu0 %v4308_v28 }
 0x339   : > { %983 = vperm.xlu2 %3277, %v972_v51  }
 0x340   : > { %3280 = vset.pattern.permute.xlu1 %v4327_v25  ;;  %1002 = vperm.xlu0 %3356, %v997_v40  }
 0x341   : > { %3279 = vset.pattern.permute.xlu2 %v4330_v2 }
 0x348   : > { %1008 = vperm.xlu1 %3280, %v997_v40   ;;  %1127 = vperm.xlu0 %3356, %v4382_v19  }
 0x349   : > { %995 = vperm.xlu2 %3279, %v972_v51  }
 0x350   : > { %3282 = vset.pattern.permute.xlu1 %v4330_v2  ;;  %1252 = vperm.xlu0 %3356, %v4387_v58  }
 0x351   : > { %3281 = vset.pattern.permute.xlu2 %v4352_v36 }
 0x353   : > { %v4402_v51 = vpop.permute.xlu2 %927 }
 0x358   : > { %1020 = vperm.xlu1 %3282, %v997_v40   ;;  %1377 = vperm.xlu0 %3356, %v4392_v41  }
 0x359   : > { %1014 = vperm.xlu2 %3281, %v997_v40  }
 0x360   : > { %3284 = vset.pattern.permute.xlu1 %v4352_v36  ;;  %1502 = vperm.xlu0 %3356, %v4397_v11  }
 0x361   : > { %3283 = vset.pattern.permute.xlu2 %v4308_v28 }
 0x362   : > { %v843_v40 = vpop.permute.xlu0 %842  ;;  %v849_v7 = vpop.permute.xlu1 %848 }
 0x363   : > { %vm853_vm7 = vcmp.eq.s32.totalorder %v5917_v32, %v843_v40  ;;  %v934_v6 = vpop.permute.xlu2 %933  ;;  %vm855_vm3 = vcmp.eq.s32.totalorder %v5917_v32, %v849_v7 }
 0x364   : > { %v4410_v0 = vsel %vm853_vm7, 1, %v5922_v3 }
 0x365   : > { %v866_v44 = vrot.slane %v4410_v0, 1  ;;  %v871_v40 = vrot.slane %v4410_v0, 6  ;;  %v1750_v55 = vperm.slane %v4410_v0, 0  ;;  %v868_v49 = vrot.slane %v4410_v0, 3 }
 0x367   : > { %vm894_vm6 = vcmp.ne.s32.totalorder %v866_v44, 0  ;;  %vm899_vm13 = vcmp.ne.s32.totalorder %v871_v40, 0  ;;  %vm4431_vm12 = vcmp.eq.s32.totalorder %v1750_v55, 1  ;;  %vm896_vm1 = vcmp.ne.s32.totalorder %v868_v49, 0 }
 0x368   : > { %1039 = vperm.xlu1 %3284, %v1022_v29   ;;  %1627 = vperm.xlu0 %3356, %v4405_v31   ;;  %v1722_v35 = vsel %vm894_vm6, 1, %v5922_v3 }
 0x369   : > { %1027 = vperm.xlu2 %3283, %v1022_v29   ;;  %v1751_v44 = vperm.slane %v1722_v35, 0 }
 0x36a   : > { %v846_v1 = vpop.permute.xlu0 %845  ;;  %v4416_v45 = vpop.permute.xlu1 %851 }
 0x36b   : > { %vm854_vm7 = vcmp.eq.s32.totalorder %v5917_v32, %v846_v1  ;;  %v1727_v1 = vsel %vm899_vm13, 1, %v5922_v3  ;;  %vm4436_vm6 = vcmp.eq.s32.totalorder %v1751_v44, 1  ;;  %v4449_v44 = vperm.slane %v4345_v48, 1 }
 0x36c   : > { %v4428_v57 = vsel %vm854_vm7, 1, %v5922_v3  ;;  %v1756_v21 = vperm.slane %v1727_v1, 0 }
 0x36d   : > { %v875_v62 = vrot.slane %v4428_v57, 3 }
 0x36e   : > { %vm4459_vm7 = vcmp.eq.s32.totalorder %v1756_v21, 1 }
 0x36f   : > { %vm903_vm13 = vcmp.ne.s32.totalorder %v875_v62, 0 }
 0x370   : > { %3286 = vset.pattern.permute.xlu1 %v4308_v28  ;;  %3361 = vset.pattern.permute.xlu0 %v4327_v25  ;;  %v1731_v1 = vsel %vm903_vm13, 1, %v5922_v3 }
 0x371   : > { %3285 = vset.pattern.permute.xlu2 %v4330_v2 }
 0x373   : > { %v4425_v38 = vpop.permute.xlu2 %952 }
 0x378   : > { %1052 = vperm.xlu1 %3286, %v4421_v5   ;;  %1033 = vperm.xlu0 %3361, %v1022_v29  }
 0x379   : > { %1045 = vperm.xlu2 %3285, %v1022_v29  }
 0x37a   : > { %v946_v10 = vpop.permute.xlu1 %945  ;;  %v971_v40 = vpop.permute.xlu0 %970 }
 0x37b   : > { %v1817_v35 = vsel %vm4431_vm12, %v946_v10, -1e+30  ;;  %v1821_v55 = vsel %vm4436_vm6, %v971_v40, -1e+30  ;;  %v867_v10 = vrot.slane %v4410_v0, 2 }
 0x37c   : > { %v2131_v14 = vsel %vm207_vm4, %v1817_v35, -inf  ;;  %v2132_v29 = vsel %vm207_vm4, %v1821_v55, -inf  ;;  %v1761_v35 = vperm.slane %v1731_v1, 0 }
 0x37d   : > { %v2133_v12 = vmax.f32 %v2131_v14, %v2132_v29  ;;  %vm895_vm15 = vcmp.ne.s32.totalorder %v867_v10, 0  ;;  %v4469_v29 = vperm.slane %v4345_v48, 6  ;;  %v4475_v10 = vsel %vm855_vm3, 1, %v5922_v3 }
 0x37e   : > { %v1723_v20 = vsel %vm895_vm15, 1, %v5922_v3  ;;  %vm4480_vm13 = vcmp.eq.s32.totalorder %v1761_v35, 1  ;;  %vm856_vm15 = vcmp.eq.s32.totalorder %v5917_v32, %v4416_v45 }
 0x37f   : > { %v1752_v1 = vperm.slane %v1723_v20, 0 }
 0x380   : > { %3288 = vset.pattern.permute.xlu1 %v4330_v2  ;;  %1158 = vperm.xlu0 %3361, %v4449_v44  }
 0x381   : > { %3287 = vset.pattern.permute.xlu2 %v4327_v25  ;;  %vm4493_vm3 = vcmp.eq.s32.totalorder %v1752_v1, 1  ;;  %v4509_v1 = vsel %vm856_vm15, 1, %v5922_v3 }
 0x382   : > { %v1096_v14 = vpop.permute.xlu0 %1095 }
 0x383   : > { %v4451_v15 = vpop.permute.xlu2 %964  ;;  %v1841_v62 = vsel %vm4459_vm7, %v1096_v14, -1e+30  ;;  %v1815_v14 = vsel %vm4431_vm12, %v934_v6, -1e+30  ;;  %v884_v6 = vrot.slane %v4475_v10, 5 }
 0x384   : > { %v2142_v55 = vsel %vm207_vm4, %v1841_v62, -inf }
 0x385   : > { %v2135_v21 = vmax.f32 %v2133_v12, %v2142_v55  ;;  %v2005_v55 = vsel %vm207_vm4, %v1815_v14, -inf  ;;  %vm912_vm9 = vcmp.ne.s32.totalorder %v884_v6, 0 }
 0x388   : > { %1070 = vperm.xlu1 %3288, %v4421_v5   ;;  %1283 = vperm.xlu0 %3361, %v4469_v29  }
 0x389   : > { %1058 = vperm.xlu2 %3287, %v4421_v5  }
 0x38a   : > { %v959_v13 = vpop.permute.xlu1 %958  ;;  %v1221_v7 = vpop.permute.xlu0 %1220 }
 0x38b   : > { %v1819_v12 = vsel %vm4436_vm6, %v959_v13, -1e+30  ;;  %v1861_v24 = vsel %vm4480_vm13, %v1221_v7, -1e+30  ;;  %v4498_v13 = vperm.slane %v4355_v4, 3  ;;  %v1766_v7 = vperm.slane %v4475_v10, 0 }
 0x38c   : > { %v2006_v16 = vsel %vm207_vm4, %v1819_v12, -inf  ;;  %v2152_v35 = vsel %vm207_vm4, %v1861_v24, -inf }
 0x38d   : > { %v2007_v17 = vmax.f32 %v2005_v55, %v2006_v16  ;;  %v2137_v14 = vmax.f32 %v2135_v21, %v2152_v35  ;;  %vm4513_vm0 = vcmp.eq.s32.totalorder %v1766_v7, 1  ;;  %v888_v7 = vrot.slane %v4509_v1, 2 }
 0x390   : > { %3290 = vset.pattern.permute.xlu1 %v4327_v25  ;;  %1408 = vperm.xlu0 %3361, %v4498_v13  }
 0x391   : > { %3289 = vset.pattern.permute.xlu2 %v4308_v28 }
 0x392   : > { %v1346_v55 = vpop.permute.xlu0 %1345 }
 0x393   : > { %v984_v12 = vpop.permute.xlu2 %983  ;;  %v1881_v35 = vsel %vm4513_vm0, %v1346_v55, -1e+30  ;;  %v1814_v55 = vsel %vm4431_vm12, %v4402_v51, -1e+30 }
 0x394   : > { %v1823_v16 = vsel %vm4493_vm3, %v984_v12, -1e+30  ;;  %v1740_v12 = vsel %vm912_vm9, 1, %v5922_v3  ;;  %v2162_v6 = vsel %vm207_vm4, %v1881_v35, -inf  ;;  %vm916_vm9 = vcmp.ne.s32.totalorder %v888_v7, 0 }
 0x395   : > { %v2008_v24 = vsel %vm207_vm4, %v1823_v16, -inf  ;;  %v1818_v16 = vsel %vm4436_vm6, %v4425_v38, -1e+30  ;;  %v1771_v32 = vperm.slane %v1740_v12, 0  ;;  %v1942_v38 = vsel %vm207_vm4, %v1814_v55, -inf }
 0x396   : > { %v4511_v21 = vmax.f32 %v2007_v17, %v2008_v24  ;;  %v4526_v17 = vperm.slane %v4369_v52, 0  ;;  %v2139_v24 = vmax.f32 %v2137_v14, %v2162_v6  ;;  %v1943_v18 = vsel %vm207_vm4, %v1818_v16, -inf }
 0x397   : > { %v1944_v23 = vmax.f32 %v1942_v38, %v1943_v18  ;;  %vm4538_vm15 = vcmp.eq.s32.totalorder %v1771_v32, 1  ;;  %v1744_v6 = vsel %vm916_vm9, 1, %v5922_v3  ;;  %v4551_v18 = vperm.slane %v4369_v52, 5 }
 0x398   : > { %1083 = vperm.xlu1 %3290, %v4340_v39   ;;  %1533 = vperm.xlu0 %3361, %v4526_v17  }
 0x399   : > { %1077 = vperm.xlu2 %3289, %v4340_v39  }
 0x39a   : > { %v978_v35 = vpop.permute.xlu1 %977  ;;  %v1471_v51 = vpop.permute.xlu0 %1470 }
 0x39b   : > { %v1822_v27 = vsel %vm4493_vm3, %v978_v35, -1e+30  ;;  %v1901_v16 = vsel %vm4538_vm15, %v1471_v51, -1e+30  ;;  %v1776_v35 = vperm.slane %v1744_v6, 0  ;;  %v1097_v6 = vperm.slane %v4320_v9, 7 }
 0x39c   : > { %v1945_v12 = vsel %vm207_vm4, %v1822_v27, -inf  ;;  %v2172_v55 = vsel %vm207_vm4, %v1901_v16, -inf  ;;  %v5939_v9 = vsel %vm4436_vm6, %v4451_v15, -1e+30 }
 0x39d   : > { %v4546_v7 = vmax.f32 %v1944_v23, %v1945_v12  ;;  %v2141_v32 = vmax.f32 %v2139_v24, %v2172_v55  ;;  %vm4561_vm9 = vcmp.eq.s32.totalorder %v1776_v35, 1 }
 0x3a0   : > { %3292 = vset.pattern.permute.xlu1 %v4308_v28  ;;  %1658 = vperm.xlu0 %3361, %v4551_v18  }
 0x3a1   : > { %3291 = vset.pattern.permute.xlu2 %v4352_v36 }
 0x3a2   : > { %v1596_v24 = vpop.permute.xlu0 %1595 }
 0x3a3   : > { %v996_v38 = vpop.permute.xlu2 %995  ;;  %v1921_v16 = vsel %vm4561_vm9, %v1596_v24, -1e+30 }
 0x3a4   : > { %v1825_v27 = vsel %vm4493_vm3, %v996_v38, -1e+30  ;;  %v4569_v55 = vsel %vm207_vm4, %v1921_v16, -inf  ;;  %v1724_v38 = vsel %vm896_vm1, 1, %v5922_v3 }
 0x3a5   : > { %v2134_v23 = vsel %vm207_vm4, %v1825_v27, -inf  ;;  %v1753_v35 = vperm.slane %v1724_v38, 0 }
 0x3a6   : > { %v4559_v51 = vmax.f32 %v2141_v32, %v2134_v23  ;;  %v2069_v23 = vsel %vm207_vm4, %v5939_v9, -inf  ;;  %v869_v32 = vrot.slane %v4410_v0, 4 }
 0x3a7   : > { %vm4585_vm1 = vcmp.eq.s32.totalorder %v1753_v35, 1  ;;  %v877_v35 = vrot.slane %v4428_v57, 5 }
 0x3a8   : > { %1102 = vperm.xlu1 %3292, %v1097_v6   ;;  %3366 = vset.pattern.permute.xlu0 %v4352_v36  ;;  %vm897_vm6 = vcmp.ne.s32.totalorder %v869_v32, 0 }
 0x3a9   : > { %1089 = vperm.xlu2 %3291, %v4340_v39  }
 0x3aa   : > { %v990_v49 = vpop.permute.xlu1 %989 }
 0x3ab   : > { %v1824_v27 = vsel %vm4493_vm3, %v990_v49, -1e+30  ;;  %vm905_vm3 = vcmp.ne.s32.totalorder %v877_v35, 0 }
 0x3ac   : > { %v2071_v39 = vsel %vm207_vm4, %v1824_v27, -inf }
 0x3ad   : > { %v2070_v24 = vmax.f32 %v2071_v39, %v2069_v23  ;;  %v1758_v23 = vperm.slane %v4428_v57, 0 }
 0x3af   : > { %vm4605_vm8 = vcmp.eq.s32.totalorder %v1758_v23, 1 }
 0x3b0   : > { %3294 = vset.pattern.permute.xlu1 %v4352_v36  ;;  %939 = vperm.xlu0 %3366, %v4323_v22   ;;  %v1725_v22 = vsel %vm897_vm6, 1, %v5922_v3 }
 0x3b1   : > { %3293 = vset.pattern.permute.xlu2 %v4327_v25 }
 0x3b2   : > { %v1003_v49 = vpop.permute.xlu0 %1002 }
 0x3b3   : > { %v1015_v38 = vpop.permute.xlu2 %1014  ;;  %v1826_v27 = vsel %vm4585_vm1, %v1003_v49, -1e+30 }
 0x3b4   : > { %v1828_v59 = vsel %vm4585_vm1, %v1015_v38, -1e+30  ;;  %v1947_v9 = vsel %vm207_vm4, %v1826_v27, -inf  ;;  %v881_v27 = vrot.slane %v4475_v10, 2 }
 0x3b5   : > { %v2073_v15 = vsel %vm207_vm4, %v1828_v59, -inf  ;;  %v1948_v39 = vmax.f32 %v4546_v7, %v1947_v9  ;;  %v1733_v59 = vsel %vm905_vm3, 1, %v5922_v3 }
 0x3b6   : > { %v4595_v20 = vmax.f32 %v2070_v24, %v2073_v15  ;;  %v1754_v24 = vperm.slane %v1725_v22, 0  ;;  %vm909_vm10 = vcmp.ne.s32.totalorder %v881_v27, 0 }
 0x3b8   : > { %1114 = vperm.xlu1 %3294, %v1097_v6   ;;  %1064 = vperm.xlu0 %3366, %v4421_v5   ;;  %v4618_v5 = vperm.slane %v4345_v48, 2  ;;  %vm4625_vm6 = vcmp.eq.s32.totalorder %v1754_v24, 1 }
 0x3b9   : > { %1108 = vperm.xlu2 %3293, %v1097_v6  }
 0x3ba   : > { %v1009_v38 = vpop.permute.xlu1 %1008  ;;  %v1128_v49 = vpop.permute.xlu0 %1127 }
 0x3bb   : > { %v1827_v15 = vsel %vm4585_vm1, %v1009_v38, -1e+30  ;;  %v1846_v35 = vsel %vm4605_vm8, %v1128_v49, -1e+30  ;;  %v1763_v38 = vperm.slane %v1733_v59, 0  ;;  %v1737_v59 = vsel %vm909_vm10, 1, %v5922_v3 }
 0x3bc   : > { %v4613_v7 = vsel %vm207_vm4, %v1827_v15, -inf  ;;  %v1957_v23 = vsel %vm207_vm4, %v1846_v35, -inf  ;;  %v1768_v34 = vperm.slane %v1737_v59, 0  ;;  %v5950_v59 = vmax.f32 %v4559_v51, %v4569_v55 }
 0x3bd   : > { %v1950_v15 = vmax.f32 %v1948_v39, %v1957_v23  ;;  %vm4634_vm3 = vcmp.eq.s32.totalorder %v1763_v38, 1  ;;  %v4643_v23 = vperm.slane %v4345_v48, 7  ;;  %v870_v55 = vrot.slane %v4410_v0, 5 }
 0x3be   : > { %vm4650_vm10 = vcmp.eq.s32.totalorder %v1768_v34, 1  ;;  %v4666_v34 = vperm.slane %v4355_v4, 4 }
 0x3bf   : > { %vm898_vm14 = vcmp.ne.s32.totalorder %v870_v55, 0 }
 0x3c0   : > { %3296 = vset.pattern.permute.xlu1 %v4327_v25  ;;  %1189 = vperm.xlu0 %3366, %v4618_v5  }
 0x3c1   : > { %3295 = vset.pattern.permute.xlu2 %v4330_v2 }
 0x3c2   : > { %v1253_v9 = vpop.permute.xlu0 %1252 }
 0x3c3   : > { %v1028_v26 = vpop.permute.xlu2 %1027  ;;  %v1866_v39 = vsel %vm4634_vm3, %v1253_v9, -1e+30 }
 0x3c4   : > { %v1830_v49 = vsel %vm4625_vm6, %v1028_v26, -1e+30  ;;  %v1967_v26 = vsel %vm207_vm4, %v1866_v39, -inf }
 0x3c5   : > { %v1949_v54 = vsel %vm207_vm4, %v1830_v49, -inf  ;;  %v886_v49 = vrot.slane %v4475_v10, 7 }
 0x3c6   : > { %v1952_v24 = vmax.f32 %v1950_v15, %v1949_v54 }
 0x3c7   : > { %vm914_vm11 = vcmp.ne.s32.totalorder %v886_v49, 0  ;;  %v890_v49 = vrot.slane %v4509_v1, 4 }
 0x3c8   : > { %v1954_v38 = vmax.f32 %v1952_v24, %v1967_v26  ;;  %1133 = vperm.xlu1 %3296, %v4382_v19   ;;  %1314 = vperm.xlu0 %3366, %v4643_v23   ;;  %v1742_v39 = vsel %vm914_vm11, 1, %v5922_v3 }
 0x3c9   : > { %1120 = vperm.xlu2 %3295, %v1097_v6   ;;  %v1773_v60 = vperm.slane %v1742_v39, 0  ;;  %vm918_vm11 = vcmp.ne.s32.totalorder %v890_v49, 0 }
 0x3ca   : > { %v1021_v54 = vpop.permute.xlu1 %1020  ;;  %v1378_v6 = vpop.permute.xlu0 %1377  ;;  %v1746_v39 = vsel %vm918_vm11, 1, %v5922_v3 }
 0x3cb   : > { %v1829_v27 = vsel %vm4585_vm1, %v1021_v54, -1e+30  ;;  %v1886_v24 = vsel %vm4650_vm10, %v1378_v6, -1e+30  ;;  %vm4679_vm1 = vcmp.eq.s32.totalorder %v1773_v60, 1  ;;  %v1726_v60 = vsel %vm898_vm14, 1, %v5922_v3 }
 0x3cc   : > { %v2136_v15 = vsel %vm207_vm4, %v1829_v27, -inf  ;;  %v1977_v16 = vsel %vm207_vm4, %v1886_v24, -inf  ;;  %v1755_v50 = vperm.slane %v1726_v60, 0 }
 0x3cd   : > { %v4661_v26 = vmax.f32 %v5950_v59, %v2136_v15  ;;  %v1956_v54 = vmax.f32 %v1954_v38, %v1977_v16  ;;  %v4689_v16 = vperm.slane %v4369_v52, 1 }
 0x3ce   : > { %vm4709_vm14 = vcmp.eq.s32.totalorder %v1755_v50, 1 }
 0x3d0   : > { %3298 = vset.pattern.permute.xlu1 %v4330_v2  ;;  %1439 = vperm.xlu0 %3366, %v4666_v34  }
 0x3d1   : > { %3297 = vset.pattern.permute.xlu2 %v4352_v36 }
 0x3d2   : > { %v1503_v15 = vpop.permute.xlu0 %1502 }
 0x3d3   : > { %v1046_v27 = vpop.permute.xlu2 %1045  ;;  %v1906_v24 = vsel %vm4679_vm1, %v1503_v15, -1e+30 }
 0x3d4   : > { %v1833_v6 = vsel %vm4625_vm6, %v1046_v27, -1e+30  ;;  %v1987_v59 = vsel %vm207_vm4, %v1906_v24, -inf  ;;  %v1778_v27 = vperm.slane %v1746_v39, 0  ;;  %v5953_v24 = vmov 0 }
 0x3d5   : > { %v4673_v51 = vsel %vm207_vm4, %v1833_v6, -inf  ;;  %v1958_v49 = vmax.f32 %v1956_v54, %v1987_v59  ;;  %v4707_v59 = vperm.slane %v4369_v52, 6 }
 0x3d6   : > { %vm4696_vm11 = vcmp.eq.s32.totalorder %v1778_v27, 1 }
 0x3d7   : > { %v5954_v24 = vsel %vm4696_vm11, 4294967295, %v5953_v24 }
 0x3d8   : > { %1145 = vperm.xlu1 %3298, %v4382_v19   ;;  %1564 = vperm.xlu0 %3366, %v4689_v16  }
 0x3d9   : > { %1139 = vperm.xlu2 %3297, %v4382_v19  }
 0x3da   : > { %v1040_v6 = vpop.permute.xlu1 %1039  ;;  %v1628_v4 = vpop.permute.xlu0 %1627 }
 0x3db   : > { %v1832_v15 = vsel %vm4625_vm6, %v1040_v6, -1e+30  ;;  %v1926_v54 = vsel %vm4696_vm11, %v1628_v4, -1e+30 }
 0x3dc   : > { %v2075_v55 = vsel %vm207_vm4, %v1832_v15, -inf  ;;  %v1997_v39 = vsel %vm207_vm4, %v1926_v54, -inf }
 0x3dd   : > { %v2074_v19 = vmax.f32 %v4595_v20, %v2075_v55  ;;  %v1960_v27 = vmax.f32 %v1958_v49, %v1997_v39  ;;  %v873_v20 = vrot.slane %v4428_v57, 1  ;;  %v878_v55 = vrot.slane %v4428_v57, 6 }
 0x3df   : > { %vm901_vm5 = vcmp.ne.s32.totalorder %v873_v20, 0 }
 0x3e0   : > { %3300 = vset.pattern.permute.xlu1 %v4352_v36  ;;  %1689 = vperm.xlu0 %3366, %v4707_v59   ;;  %v1729_v49 = vsel %vm901_vm5, 1, %v5922_v3  ;;  %vm906_vm5 = vcmp.ne.s32.totalorder %v878_v55, 0  ;;  %v879_v55 = vrot.slane %v4428_v57, 7 }
 0x3e1   : > { %3299 = vset.pattern.permute.xlu2 %v4308_v28  ;;  %v1759_v46 = vperm.slane %v1729_v49, 0 }
 0x3e3   : > { %v1059_v6 = vpop.permute.xlu2 %1058 }
 0x3e4   : > { %v1835_v4 = vsel %vm4709_vm14, %v1059_v6, -1e+30  ;;  %v4729_v6 = vperm.slane %v4369_v52, 7 }
 0x3e5   : > { %v2014_v20 = vsel %vm207_vm4, %v1835_v4, -inf }
 0x3e8   : > { %1164 = vperm.xlu1 %3300, %v4449_v44   ;;  %3375 = vset.pattern.permute.xlu0 %v4330_v2 }
 0x3e9   : > { %1152 = vperm.xlu2 %3299, %v4449_v44  }
 0x3ea   : > { %v1053_v50 = vpop.permute.xlu1 %1052  ;;  %v1034_v15 = vpop.permute.xlu0 %1033 }
 0x3eb   : > { %v1834_v60 = vsel %vm4709_vm14, %v1053_v50, -1e+30  ;;  %v1831_v39 = vsel %vm4625_vm6, %v1034_v15, -1e+30  ;;  %v5957_v50 = vmax.f32 %v4511_v21, %v4613_v7  ;;  %vm4742_vm6 = vcmp.eq.s32.totalorder %v1759_v46, 1 }
 0x3ec   : > { %v1951_v54 = vsel %vm207_vm4, %v1834_v60, -inf  ;;  %v2012_v63 = vsel %vm207_vm4, %v1831_v39, -inf  ;;  %v1734_v21 = vsel %vm906_vm5, 1, %v5922_v3 }
 0x3ed   : > { %v1962_v53 = vmax.f32 %v1960_v27, %v1951_v54  ;;  %v2013_v43 = vmax.f32 %v5957_v50, %v2012_v63  ;;  %v893_v27 = vrot.slane %v4509_v1, 7 }
 0x3ef   : > { %v2015_v52 = vmax.f32 %v2013_v43, %v2014_v20  ;;  %v1764_v43 = vperm.slane %v1734_v21, 0  ;;  %v872_v20 = vrot.slane %v4410_v0, 7 }
 0x3f0   : > { %3302 = vset.pattern.permute.xlu1 %v4308_v28  ;;  %1720 = vperm.xlu0 %3375, %v4729_v6  }
 0x3f1   : > { %3301 = vset.pattern.permute.xlu2 %v4330_v2  ;;  %vm4754_vm2 = vcmp.eq.s32.totalorder %v1764_v43, 1  ;;  %vm900_vm5 = vcmp.ne.s32.totalorder %v872_v20, 0 }
 0x3f2   : > { %v4747_v63 = vpop.permute.xlu0 %1158 }
 0x3f3   : > { %v1078_v37 = vpop.permute.xlu2 %1077 }
 0x3f4   : > { %v1838_v22 = vsel %vm4459_vm7, %v1078_v37, -1e+30  ;;  %v1851_v37 = vsel %vm4742_vm6, %v4747_v63, -1e+30 }
 0x3f5   : > { %v1953_v4 = vsel %vm207_vm4, %v1838_v22, -inf }
 0x3f6   : > { %v1964_v49 = vmax.f32 %v1962_v53, %v1953_v4 }
 0x3f8   : > { %1177 = vperm.xlu1 %3302, %v4618_v5  }
 0x3f9   : > { %1170 = vperm.xlu2 %3301, %v4449_v44   ;;  %v5962_v44 = vmax.f32 %v4661_v26, %v4673_v51  ;;  %v1728_v26 = vsel %vm900_vm5, 1, %v5922_v3 }
 0x3fa   : > { %v1071_v46 = vpop.permute.xlu1 %1070  ;;  %v4760_v60 = vpop.permute.xlu0 %1283  ;;  %v1757_v21 = vperm.slane %v1728_v26, 0 }
 0x3fb   : > { %v1837_v53 = vsel %vm4709_vm14, %v1071_v46, -1e+30 }
 0x3fc   : > { %v2140_v15 = vsel %vm207_vm4, %v1837_v53, -inf  ;;  %vm4788_vm11 = vcmp.eq.s32.totalorder %v1757_v21, 1 }
 0x3fd   : > { %v4769_v54 = vmax.f32 %v5962_v44, %v2140_v15 }
 0x400   : > { %3304 = vset.pattern.permute.xlu1 %v4330_v2 }
 0x401   : > { %3303 = vset.pattern.permute.xlu2 %v4327_v25 }
 0x402   : > { %v4779_v51 = vpop.permute.xlu0 %1408 }
 0x403   : > { %v1090_v39 = vpop.permute.xlu2 %1089 }
 0x404   : > { %v1840_v50 = vsel %vm4459_vm7, %v1090_v39, -1e+30 }
 0x405   : > { %v2079_v22 = vsel %vm207_vm4, %v1840_v50, -inf }
 0x406   : > { %v2076_v4 = vmax.f32 %v2074_v19, %v2079_v22 }
 0x408   : > { %1195 = vperm.xlu1 %3304, %v4618_v5  }
 0x409   : > { %1183 = vperm.xlu2 %3303, %v4618_v5  }
 0x40a   : > { %v1084_v43 = vpop.permute.xlu1 %1083  ;;  %v4795_v5 = vpop.permute.xlu0 %1533 }
 0x40b   : > { %v1839_v0 = vsel %vm4459_vm7, %v1084_v43, -1e+30 }
 0x40c   : > { %v2016_v46 = vsel %vm207_vm4, %v1839_v0, -inf }
 0x40d   : > { %v4785_v53 = vmax.f32 %v2015_v52, %v2016_v46 }
 0x410   : > { %3306 = vset.pattern.permute.xlu1 %v4327_v25 }
 0x411   : > { %3305 = vset.pattern.permute.xlu2 %v4308_v28 }
 0x412   : > { %v4801_v20 = vpop.permute.xlu0 %1658 }
 0x413   : > { %v1109_v15 = vpop.permute.xlu2 %1108 }
 0x414   : > { %v1843_v44 = vsel %vm4788_vm11, %v1109_v15, -1e+30  ;;  %v874_v15 = vrot.slane %v4428_v57, 2 }
 0x415   : > { %v2018_v40 = vsel %vm207_vm4, %v1843_v44, -inf  ;;  %v1222_v44 = vperm.slane %v4345_v48, 4 }
 0x416   : > { %v2019_v39 = vmax.f32 %v4785_v53, %v2018_v40  ;;  %vm902_vm7 = vcmp.ne.s32.totalorder %v874_v15, 0 }
 0x418   : > { %1208 = vperm.xlu1 %3306, %v4348_v47  }
 0x419   : > { %1202 = vperm.xlu2 %3305, %v4348_v47  }
 0x41a   : > { %v1103_v52 = vpop.permute.xlu1 %1102 }
 0x41b   : > { %v1842_v50 = vsel %vm4788_vm11, %v1103_v52, -1e+30 }
 0x41c   : > { %v1955_v22 = vsel %vm207_vm4, %v1842_v50, -inf }
 0x41d   : > { %v4806_v26 = vmax.f32 %v1964_v49, %v1955_v22  ;;  %v1730_v22 = vsel %vm902_vm7, 1, %v5922_v3 }
 0x420   : > { %3308 = vset.pattern.permute.xlu1 %v4308_v28 }
 0x421   : > { %3307 = vset.pattern.permute.xlu2 %v4352_v36 }
 0x422   : > { %v940_v53 = vpop.permute.xlu0 %939 }
 0x423   : > { %v1121_v21 = vpop.permute.xlu2 %1120  ;;  %v1816_v49 = vsel %vm4431_vm12, %v940_v53, -1e+30  ;;  %vm907_vm12 = vcmp.ne.s32.totalorder %v879_v55, 0 }
 0x424   : > { %v1845_v43 = vsel %vm4788_vm11, %v1121_v21, -1e+30  ;;  %v2068_v40 = vsel %vm207_vm4, %v1816_v49, -inf }
 0x425   : > { %v4813_v0 = vsel %vm207_vm4, %v1845_v43, -inf  ;;  %v2078_v52 = vmax.f32 %v2076_v4, %v2068_v40  ;;  %v1760_v4 = vperm.slane %v1730_v22, 0 }
 0x426   : > { %v2153_v46 = vmax.f32 %v4769_v54, %v4813_v0 }
 0x428   : > { %1227 = vperm.xlu1 %3308, %v1222_v44  }
 0x429   : > { %1214 = vperm.xlu2 %3307, %v4348_v47  }
 0x42a   : > { %v1115_v50 = vpop.permute.xlu1 %1114  ;;  %v1065_v43 = vpop.permute.xlu0 %1064 }
 0x42b   : > { %v1844_v21 = vsel %vm4788_vm11, %v1115_v50, -1e+30  ;;  %v1836_v48 = vsel %vm4709_vm14, %v1065_v43, -1e+30  ;;  %vm4836_vm11 = vcmp.eq.s32.totalorder %v1760_v4, 1 }
 0x42c   : > { %v2081_v56 = vsel %vm207_vm4, %v1844_v21, -inf  ;;  %v2077_v47 = vsel %vm207_vm4, %v1836_v48, -inf }
 0x42d   : > { %v2080_v53 = vmax.f32 %v2078_v52, %v2081_v56  ;;  %v1735_v52 = vsel %vm907_vm12, 1, %v5922_v3 }
 0x42e   : > { %v1765_v43 = vperm.slane %v1735_v52, 0 }
 0x42f   : > { %v2082_v15 = vmax.f32 %v2080_v53, %v2077_v47 }
 0x430   : > { %3310 = vset.pattern.permute.xlu1 %v4352_v36  ;;  %vm4844_vm14 = vcmp.eq.s32.totalorder %v1765_v43, 1  ;;  %v883_v43 = vrot.slane %v4475_v10, 4 }
 0x431   : > { %3309 = vset.pattern.permute.xlu2 %v4327_v25 }
 0x432   : > { %v1190_v21 = vpop.permute.xlu0 %1189  ;;  %vm911_vm5 = vcmp.ne.s32.totalorder %v883_v43, 0 }
 0x433   : > { %v1140_v49 = vpop.permute.xlu2 %1139  ;;  %v1856_v22 = vsel %vm4836_vm11, %v1190_v21, -1e+30 }
 0x434   : > { %v1848_v19 = vsel %vm4605_vm8, %v1140_v49, -1e+30  ;;  %v2087_v55 = vsel %vm207_vm4, %v1856_v22, -inf }
 0x435   : > { %v2083_v40 = vsel %vm207_vm4, %v1848_v19, -inf }
 0x436   : > { %v2084_v61 = vmax.f32 %v2082_v15, %v2083_v40  ;;  %v4855_v15 = vsel %vm207_vm4, %v1851_v37, -inf }
 0x438   : > { %v2086_v56 = vmax.f32 %v2084_v61, %v2087_v55  ;;  %1239 = vperm.xlu1 %3310, %v1222_v44  }
 0x439   : > { %1233 = vperm.xlu2 %3309, %v1222_v44  }
 0x43a   : > { %v1134_v53 = vpop.permute.xlu1 %1133  ;;  %v1315_v4 = vpop.permute.xlu0 %1314 }
 0x43b   : > { %v1847_v47 = vsel %vm4605_vm8, %v1134_v53, -1e+30  ;;  %v1876_v19 = vsel %vm4844_vm14, %v1315_v4, -1e+30  ;;  %v887_v53 = vrot.slane %v4509_v1, 1 }
 0x43c   : > { %v2020_v49 = vsel %vm207_vm4, %v1847_v47, -inf  ;;  %v2097_v61 = vsel %vm207_vm4, %v1876_v19, -inf  ;;  %v1739_v47 = vsel %vm911_vm5, 1, %v5922_v3 }
 0x43d   : > { %v2021_v40 = vmax.f32 %v2019_v39, %v2020_v49  ;;  %v2088_v52 = vmax.f32 %v2086_v56, %v2097_v61  ;;  %v892_v56 = vrot.slane %v4509_v1, 6  ;;  %vm915_vm7 = vcmp.ne.s32.totalorder %v887_v53, 0 }
 0x43e   : > { %v1770_v19 = vperm.slane %v1739_v47, 0 }
 0x43f   : > { %v2023_v22 = vmax.f32 %v2021_v40, %v4855_v15  ;;  %vm920_vm12 = vcmp.ne.s32.totalorder %v892_v56, 0 }
 0x440   : > { %3312 = vset.pattern.permute.xlu1 %v4327_v25  ;;  %v1748_v61 = vsel %vm920_vm12, 1, %v5922_v3  ;;  %vm4882_vm5 = vcmp.eq.s32.totalorder %v1770_v19, 1 }
 0x441   : > { %3311 = vset.pattern.permute.xlu2 %v4330_v2  ;;  %v1780_v43 = vperm.slane %v1748_v61, 0 }
 0x442   : > { %v1440_v39 = vpop.permute.xlu0 %1439 }
 0x443   : > { %v1153_v21 = vpop.permute.xlu2 %1152  ;;  %v1896_v54 = vsel %vm4882_vm5, %v1440_v39, -1e+30 }
 0x444   : > { %v1850_v63 = vsel %vm4742_vm6, %v1153_v21, -1e+30 }
 0x445   : > { %v1959_v37 = vsel %vm207_vm4, %v1850_v63, -inf }
 0x446   : > { %v1968_v55 = vmax.f32 %v4806_v26, %v1959_v37  ;;  %v1743_v26 = vsel %vm915_vm7, 1, %v5922_v3  ;;  %vm4899_vm7 = vcmp.eq.s32.totalorder %v1780_v43, 1 }
 0x447   : > { %v1775_v21 = vperm.slane %v1743_v26, 0 }
 0x448   : > { %1258 = vperm.xlu1 %3312, %v4387_v58  }
 0x449   : > { %1245 = vperm.xlu2 %3311, %v1222_v44  }
 0x44a   : > { %v1146_v4 = vpop.permute.xlu1 %1145  ;;  %v1565_v49 = vpop.permute.xlu0 %1564 }
 0x44b   : > { %v1849_v15 = vsel %vm4605_vm8, %v1146_v4, -1e+30  ;;  %vm4892_vm8 = vcmp.eq.s32.totalorder %v1775_v21, 1  ;;  %v2107_v4 = vsel %vm207_vm4, %v1896_v54, -inf }
 0x44c   : > { %v2146_v40 = vsel %vm207_vm4, %v1849_v15, -inf  ;;  %v1916_v56 = vsel %vm4892_vm8, %v1565_v49, -1e+30  ;;  %v2090_v19 = vmax.f32 %v2088_v52, %v2107_v4  ;;  %v6000_v15 = vmov (%p827_p0), 0  }
 0x44d   : > { %v2155_v44 = vmax.f32 %v2153_v46, %v2146_v40  ;;  %v2117_v26 = vsel %vm207_vm4, %v1916_v56, -inf  ;;  %3378 = vset.pattern.permute.xlu0 (%p827_p0), %v6000_v15 }
 0x44e   : > { %v2092_v49 = vmax.f32 %v2090_v19, %v2117_v26 }
 0x450   : > { %3314 = vset.pattern.permute.xlu1 %v4330_v2 }
 0x451   : > { %3313 = vset.pattern.permute.xlu2 %v4352_v36 }
 0x452   : > { %v1690_v47 = vpop.permute.xlu0 %1689 }
 0x453   : > { %v1171_v63 = vpop.permute.xlu2 %1170  ;;  %v1936_v39 = vsel %vm4899_vm7, %v1690_v47, -1e+30 }
 0x454   : > { %v1853_v32 = vsel %vm4742_vm6, %v1171_v63, -1e+30  ;;  %v2127_v40 = vsel %vm207_vm4, %v1936_v39, -inf }
 0x455   : > { %v2148_v0 = vsel %vm207_vm4, %v1853_v32, -inf  ;;  %v2094_v61 = vmax.f32 %v2092_v49, %v2127_v40 }
 0x456   : > { %v2157_v53 = vmax.f32 %v2155_v44, %v2148_v0 }
 0x458   : > { %1270 = vperm.xlu1 %3314, %v4387_v58  }
 0x459   : > { %1264 = vperm.xlu2 %3313, %v4387_v58  }
 0x45a   : > { %v1165_v44 = vpop.permute.xlu1 %1164 }
 0x45b   : > { %v1852_v21 = vsel %vm4742_vm6, %v1165_v44, -1e+30  ;;  %vm921_vm6 = vcmp.ne.s32.totalorder %v893_v27, 0 }
 0x45c   : > { %v2085_v63 = vsel %vm207_vm4, %v1852_v21, -inf  ;;  %v1749_v4 = vsel %vm921_vm6, 1, %v5922_v3 }
 0x45d   : > { %v4912_v32 = vmax.f32 %v2094_v61, %v2085_v63  ;;  %v2204_v61 = vld [vmem:[%s5739_s2 + $0x30] sm:$0xff] (%p827_p0) }
 0x460   : > { %3316 = vset.pattern.permute.xlu1 %v4352_v36 }
 0x461   : > { %3315 = vset.pattern.permute.xlu2 %v4308_v28 }
 0x462   : > { %v1721_v49 = vpop.permute.xlu0 %1720 }
 0x463   : > { %v1184_v43 = vpop.permute.xlu2 %1183 }
 0x464   : > { %v1855_v52 = vsel %vm4836_vm11, %v1184_v43, -1e+30 }
 0x465   : > { %v2024_v58 = vsel %vm207_vm4, %v1855_v52, -inf }
 0x466   : > { %v2025_v54 = vmax.f32 %v2023_v22, %v2024_v58  ;;  %v1781_v22 = vperm.slane %v1749_v4, 0 }
 0x468   : > { %1289 = vperm.xlu1 %3316, %v4469_v29   ;;  %vm4931_vm12 = vcmp.eq.s32.totalorder %v1781_v22, 1 }
 0x469   : > { %1277 = vperm.xlu2 %3315, %v4469_v29  }
 0x46a   : > { %v1178_v0 = vpop.permute.xlu1 %1177 }
 0x46b   : > { %v1854_v56 = vsel %vm4836_vm11, %v1178_v0, -1e+30 }
 0x46c   : > { %v1961_v47 = vsel %vm207_vm4, %v1854_v56, -inf  ;;  %v876_v56 = vrot.slane %v4428_v57, 4 }
 0x46d   : > { %v1970_v39 = vmax.f32 %v1968_v55, %v1961_v47  ;;  %v1941_v55 = vsel %vm4931_vm12, %v1721_v49, -1e+30 }
 0x46e   : > { %v2192_v21 = vsel %vm207_vm4, %v1941_v55, -inf  ;;  %vm904_vm6 = vcmp.ne.s32.totalorder %v876_v56, 0 }
 0x46f   : > { %v2159_v43 = vmax.f32 %v2157_v53, %v2192_v21  ;;  %v1732_v50 = vsel %vm904_vm6, 1, %v5922_v3 }
 0x470   : > { %3318 = vset.pattern.permute.xlu1 %v4308_v28  ;;  %v1762_v4 = vperm.slane %v1732_v50, 0 }
 0x471   : > { %3317 = vset.pattern.permute.xlu2 %v4330_v2 }
 0x473   : > { %v1203_v26 = vpop.permute.xlu2 %1202 }
 0x474   : > { %v1858_v19 = vsel %vm4480_vm13, %v1203_v26, -1e+30 }
 0x475   : > { %v1963_v40 = vsel %vm207_vm4, %v1858_v19, -inf }
 0x476   : > { %v1972_v44 = vmax.f32 %v1970_v39, %v1963_v40 }
 0x478   : > { %1302 = vperm.xlu1 %3318, %v4643_v23  }
 0x479   : > { %1295 = vperm.xlu2 %3317, %v4469_v29  }
 0x47a   : > { %v1196_v63 = vpop.permute.xlu1 %1195 }
 0x47b   : > { %v1857_v52 = vsel %vm4836_vm11, %v1196_v63, -1e+30  ;;  %vm4957_vm11 = vcmp.eq.s32.totalorder %v1762_v4, 1 }
 0x47c   : > { %v2150_v58 = vsel %vm207_vm4, %v1857_v52, -inf }
 0x47d   : > { %v2161_v27 = vmax.f32 %v2159_v43, %v2150_v58 }
 0x480   : > { %3320 = vset.pattern.permute.xlu1 %v4330_v2 }
 0x481   : > { %3319 = vset.pattern.permute.xlu2 %v4327_v25 }
 0x483   : > { %v1215_v0 = vpop.permute.xlu2 %1214 }
 0x484   : > { %v1860_v29 = vsel %vm4480_vm13, %v1215_v0, -1e+30  ;;  %v4978_v0 = vld [vmem:[%s4317_s16 + $0x10] sm:$0xff] }
 0x485   : > { %v2089_v47 = vsel %vm207_vm4, %v1860_v29, -inf  ;;  %v1347_v56 = vperm.slane %v4978_v0, 1 }
 0x486   : > { %v2098_v53 = vmax.f32 %v4912_v32, %v2089_v47 }
 0x488   : > { %1320 = vperm.xlu1 %3320, %v4643_v23  }
 0x489   : > { %1308 = vperm.xlu2 %3319, %v4643_v23  }
 0x48a   : > { %v1209_v39 = vpop.permute.xlu1 %1208 }
 0x48b   : > { %v1859_v57 = vsel %vm4480_vm13, %v1209_v39, -1e+30 }
 0x48c   : > { %v2026_v26 = vsel %vm207_vm4, %v1859_v57, -inf }
 0x48d   : > { %v2027_v22 = vmax.f32 %v2025_v54, %v2026_v26 }
 0x490   : > { %3322 = vset.pattern.permute.xlu1 %v4327_v25 }
 0x491   : > { %3321 = vset.pattern.permute.xlu2 %v4308_v28 }
 0x493   : > { %v1234_v32 = vpop.permute.xlu2 %1233 }
 0x494   : > { %v1863_v40 = vsel %vm4957_vm11, %v1234_v32, -1e+30 }
 0x495   : > { %v2028_v23 = vsel %vm207_vm4, %v1863_v40, -inf }
 0x496   : > { %v2029_v62 = vmax.f32 %v2027_v22, %v2028_v23 }
 0x498   : > { %1333 = vperm.xlu1 %3322, %v4359_v30  }
 0x499   : > { %1327 = vperm.xlu2 %3321, %v4359_v30  }
 0x49a   : > { %v1228_v54 = vpop.permute.xlu1 %1227 }
 0x49b   : > { %v1862_v49 = vsel %vm4957_vm11, %v1228_v54, -1e+30 }
 0x49c   : > { %v1965_v55 = vsel %vm207_vm4, %v1862_v49, -inf }
 0x49d   : > { %v4970_v21 = vmax.f32 %v1972_v44, %v1965_v55 }
 0x4a0   : > { %3324 = vset.pattern.permute.xlu1 %v4308_v28 }
 0x4a1   : > { %3323 = vset.pattern.permute.xlu2 %v4352_v36 }
 0x4a3   : > { %v1246_v63 = vpop.permute.xlu2 %1245 }
 0x4a4   : > { %v1865_v43 = vsel %vm4957_vm11, %v1246_v63, -1e+30 }
 0x4a5   : > { %v2154_v52 = vsel %vm207_vm4, %v1865_v43, -inf }
 0x4a6   : > { %v2163_v58 = vmax.f32 %v2161_v27, %v2154_v52 }
 0x4a8   : > { %1352 = vperm.xlu1 %3324, %v1347_v56  }
 0x4a9   : > { %1339 = vperm.xlu2 %3323, %v4359_v30  }
 0x4aa   : > { %v1240_v44 = vpop.permute.xlu1 %1239 }
 0x4ab   : > { %v1864_v29 = vsel %vm4957_vm11, %v1240_v44, -1e+30  ;;  %vm5992_vm11 = vnez %v5954_v24  ;;  %v5993_v24 = vld [vmem:[#allocation86_spill] sm:$0xff] }
 0x4ac   : > { %v2091_v47 = vsel %vm207_vm4, %v1864_v29, -inf }
 0x4ad   : > { %v2100_v50 = vmax.f32 %v2098_v53, %v2091_v47  ;;  %v5979_v53 = vsel %vm4754_vm2, %v4760_v60, -1e+30 }
 0x4ae   : > { %v2032_v22 = vsel %vm207_vm4, %v5979_v53, -inf }
 0x4b0   : > { %3326 = vset.pattern.permute.xlu1 %v4352_v36 }
 0x4b1   : > { %3325 = vset.pattern.permute.xlu2 %v4327_v25 }
 0x4b3   : > { %v1265_v4 = vpop.permute.xlu2 %1264 }
 0x4b4   : > { %v1868_v27 = vsel %vm4634_vm3, %v1265_v4, -1e+30 }
 0x4b5   : > { %v2093_v39 = vsel %vm207_vm4, %v1868_v27, -inf }
 0x4b6   : > { %v2102_v57 = vmax.f32 %v2100_v50, %v2093_v39 }
 0x4b8   : > { %1364 = vperm.xlu1 %3326, %v1347_v56  }
 0x4b9   : > { %1358 = vperm.xlu2 %3325, %v1347_v56  }
 0x4ba   : > { %v1259_v30 = vpop.permute.xlu1 %1258 }
 0x4bb   : > { %v1867_v26 = vsel %vm4634_vm3, %v1259_v30, -1e+30 }
 0x4bc   : > { %v2030_v19 = vsel %vm207_vm4, %v1867_v26, -inf }
 0x4bd   : > { %v2031_v32 = vmax.f32 %v2029_v62, %v2030_v19 }
 0x4bf   : > { %v4999_v23 = vmax.f32 %v2031_v32, %v2032_v22 }
 0x4c0   : > { %3328 = vset.pattern.permute.xlu1 %v4327_v25 }
 0x4c1   : > { %3327 = vset.pattern.permute.xlu2 %v4330_v2 }
 0x4c3   : > { %v1278_v40 = vpop.permute.xlu2 %1277 }
 0x4c4   : > { %v1870_v54 = vsel %vm4754_vm2, %v1278_v40, -1e+30 }
 0x4c5   : > { %v1969_v49 = vsel %vm207_vm4, %v1870_v54, -inf }
 0x4c6   : > { %v1976_v55 = vmax.f32 %v4970_v21, %v1969_v49 }
 0x4c8   : > { %1383 = vperm.xlu1 %3328, %v4392_v41  }
 0x4c9   : > { %1370 = vperm.xlu2 %3327, %v1347_v56  }
 0x4ca   : > { %v1271_v60 = vpop.permute.xlu1 %1270 }
 0x4cb   : > { %v1869_v62 = vsel %vm4634_vm3, %v1271_v60, -1e+30  ;;  %v880_v60 = vrot.slane %v4475_v10, 1 }
 0x4cc   : > { %v2156_v63 = vsel %vm207_vm4, %v1869_v62, -inf }
 0x4cd   : > { %v2165_v43 = vmax.f32 %v2163_v58, %v2156_v63 }
 0x4d0   : > { %3330 = vset.pattern.permute.xlu1 %v4330_v2 }
 0x4d1   : > { %3329 = vset.pattern.permute.xlu2 %v4352_v36 }
 0x4d3   : > { %v1296_v52 = vpop.permute.xlu2 %1295 }
 0x4d4   : > { %v1873_v44 = vsel %vm4754_vm2, %v1296_v52, -1e+30 }
 0x4d5   : > { %v2158_v21 = vsel %vm207_vm4, %v1873_v44, -inf }
 0x4d6   : > { %v5015_v56 = vmax.f32 %v2165_v43, %v2158_v21 }
 0x4d8   : > { %1395 = vperm.xlu1 %3330, %v4392_v41  }
 0x4d9   : > { %1389 = vperm.xlu2 %3329, %v4392_v41  }
 0x4da   : > { %v1290_v35 = vpop.permute.xlu1 %1289 }
 0x4db   : > { %v1872_v58 = vsel %vm4754_vm2, %v1290_v35, -1e+30  ;;  %vm908_vm2 = vcmp.ne.s32.totalorder %v880_v60, 0 }
 0x4dc   : > { %v2095_v29 = vsel %vm207_vm4, %v1872_v58, -inf  ;;  %v1736_v48 = vsel %vm908_vm2, 1, %v5922_v3 }
 0x4dd   : > { %v5022_v47 = vmax.f32 %v2102_v57, %v2095_v29  ;;  %v1767_v52 = vperm.slane %v1736_v48, 0 }
 0x4df   : > { %vm5060_vm13 = vcmp.eq.s32.totalorder %v1767_v52, 1 }
 0x4e0   : > { %3332 = vset.pattern.permute.xlu1 %v4352_v36 }
 0x4e1   : > { %3331 = vset.pattern.permute.xlu2 %v4308_v28 }
 0x4e3   : > { %v1309_v50 = vpop.permute.xlu2 %1308 }
 0x4e4   : > { %v1875_v4 = vsel %vm4844_vm14, %v1309_v50, -1e+30 }
 0x4e5   : > { %v2034_v27 = vsel %vm207_vm4, %v1875_v4, -inf }
 0x4e6   : > { %v2035_v41 = vmax.f32 %v4999_v23, %v2034_v27 }
 0x4e8   : > { %1414 = vperm.xlu1 %3332, %v4498_v13  }
 0x4e9   : > { %1402 = vperm.xlu2 %3331, %v4498_v13  }
 0x4ea   : > { %v1303_v7 = vpop.permute.xlu1 %1302 }
 0x4eb   : > { %v1874_v39 = vsel %vm4844_vm14, %v1303_v7, -1e+30 }
 0x4ec   : > { %v1971_v57 = vsel %vm207_vm4, %v1874_v39, -inf }
 0x4ed   : > { %v1978_v30 = vmax.f32 %v1976_v55, %v1971_v57  ;;  %v1472_v57 = vperm.slane %v4978_v0, 6 }
 0x4f0   : > { %3334 = vset.pattern.permute.xlu1 %v4308_v28 }
 0x4f1   : > { %3333 = vset.pattern.permute.xlu2 %v4330_v2 }
 0x4f3   : > { %v1328_v26 = vpop.permute.xlu2 %1327 }
 0x4f4   : > { %v1878_v53 = vsel %vm4513_vm0, %v1328_v26, -1e+30 }
 0x4f5   : > { %v1973_v22 = vsel %vm207_vm4, %v1878_v53, -inf  ;;  %v882_v53 = vrot.slane %v4475_v10, 3 }
 0x4f6   : > { %v1980_v19 = vmax.f32 %v1978_v30, %v1973_v22 }
 0x4f8   : > { %1427 = vperm.xlu1 %3334, %v4666_v34  }
 0x4f9   : > { %1420 = vperm.xlu2 %3333, %v4498_v13  }
 0x4fa   : > { %v1321_v32 = vpop.permute.xlu1 %1320 }
 0x4fb   : > { %v1877_v40 = vsel %vm4844_vm14, %v1321_v32, -1e+30 }
 0x4fc   : > { %v2160_v23 = vsel %vm207_vm4, %v1877_v40, -inf }
 0x4fd   : > { %v2169_v54 = vmax.f32 %v5015_v56, %v2160_v23 }
 0x500   : > { %3336 = vset.pattern.permute.xlu1 %v4330_v2 }
 0x501   : > { %3335 = vset.pattern.permute.xlu2 %v4327_v25 }
 0x503   : > { %v1340_v49 = vpop.permute.xlu2 %1339 }
 0x504   : > { %v1880_v55 = vsel %vm4513_vm0, %v1340_v49, -1e+30 }
 0x505   : > { %v2099_v13 = vsel %vm207_vm4, %v1880_v55, -inf }
 0x506   : > { %v2106_v62 = vmax.f32 %v5022_v47, %v2099_v13 }
 0x508   : > { %1445 = vperm.xlu1 %3336, %v4666_v34  }
 0x509   : > { %1433 = vperm.xlu2 %3335, %v4666_v34  }
 0x50a   : > { %v1334_v63 = vpop.permute.xlu1 %1333 }
 0x50b   : > { %v1879_v43 = vsel %vm4513_vm0, %v1334_v63, -1e+30  ;;  %vm910_vm0 = vcmp.ne.s32.totalorder %v882_v53, 0 }
 0x50c   : > { %v2036_v44 = vsel %vm207_vm4, %v1879_v43, -inf  ;;  %v1738_v23 = vsel %vm910_vm0, 1, %v5922_v3 }
 0x50d   : > { %v2037_v21 = vmax.f32 %v2035_v41, %v2036_v44 }
 0x510   : > { %3338 = vset.pattern.permute.xlu1 %v4327_v25 }
 0x511   : > { %3337 = vset.pattern.permute.xlu2 %v4308_v28 }
 0x513   : > { %v1359_v56 = vpop.permute.xlu2 %1358 }
 0x514   : > { %v1883_v34 = vsel %vm5060_vm13, %v1359_v56, -1e+30 }
 0x515   : > { %v2038_v58 = vsel %vm207_vm4, %v1883_v34, -inf }
 0x516   : > { %v2039_v45 = vmax.f32 %v2037_v21, %v2038_v58 }
 0x518   : > { %1458 = vperm.xlu1 %3338, %v4365_v42  }
 0x519   : > { %1452 = vperm.xlu2 %3337, %v4365_v42  }
 0x51a   : > { %v1353_v29 = vpop.permute.xlu1 %1352 }
 0x51b   : > { %v1882_v47 = vsel %vm5060_vm13, %v1353_v29, -1e+30 }
 0x51c   : > { %v1975_v50 = vsel %vm207_vm4, %v1882_v47, -inf }
 0x51d   : > { %v5073_v4 = vmax.f32 %v1980_v19, %v1975_v50 }
 0x520   : > { %3340 = vset.pattern.permute.xlu1 %v4308_v28 }
 0x521   : > { %3339 = vset.pattern.permute.xlu2 %v4352_v36 }
 0x523   : > { %v1371_v27 = vpop.permute.xlu2 %1370 }
 0x524   : > { %v1885_v41 = vsel %vm5060_vm13, %v1371_v27, -1e+30 }
 0x525   : > { %v2164_v7 = vsel %vm207_vm4, %v1885_v41, -inf }
 0x526   : > { %v2171_v39 = vmax.f32 %v2169_v54, %v2164_v7  ;;  %v1769_v54 = vperm.slane %v1738_v23, 0 }
 0x528   : > { %1477 = vperm.xlu1 %3340, %v1472_v57   ;;  %vm5092_vm3 = vcmp.eq.s32.totalorder %v1769_v54, 1 }
 0x529   : > { %1464 = vperm.xlu2 %3339, %v4365_v42   ;;  %v1891_v13 = vsel %vm5092_vm3, %v4779_v51, -1e+30 }
 0x52a   : > { %v1365_v30 = vpop.permute.xlu1 %1364  ;;  %v2042_v63 = vsel %vm207_vm4, %v1891_v13, -inf }
 0x52b   : > { %v1884_v26 = vsel %vm5060_vm13, %v1365_v30, -1e+30  ;;  %vm6009_vm13 = vcmask (%p827_p0), 261120  }
 0x52c   : > { %v2101_v22 = vsel %vm207_vm4, %v1884_v26, -inf }
 0x52d   : > { %v2108_v19 = vmax.f32 %v2106_v62, %v2101_v22 }
 0x530   : > { %3342 = vset.pattern.permute.xlu1 %v4352_v36 }
 0x531   : > { %3341 = vset.pattern.permute.xlu2 %v4327_v25 }
 0x533   : > { %v1390_v32 = vpop.permute.xlu2 %1389 }
 0x534   : > { %v1888_v40 = vsel %vm4650_vm10, %v1390_v32, -1e+30 }
 0x535   : > { %v2103_v42 = vsel %vm207_vm4, %v1888_v40, -inf }
 0x536   : > { %v2110_v0 = vmax.f32 %v2108_v19, %v2103_v42 }
 0x538   : > { %1489 = vperm.xlu1 %3342, %v1472_v57  }
 0x539   : > { %1483 = vperm.xlu2 %3341, %v1472_v57  }
 0x53a   : > { %v1384_v55 = vpop.permute.xlu1 %1383 }
 0x53b   : > { %v1887_v60 = vsel %vm4650_vm10, %v1384_v55, -1e+30 }
 0x53c   : > { %v2040_v62 = vsel %vm207_vm4, %v1887_v60, -inf  ;;  %v885_v60 = vrot.slane %v4475_v10, 6 }
 0x53d   : > { %v2041_v48 = vmax.f32 %v2039_v45, %v2040_v62 }
 0x53f   : > { %v2043_v52 = vmax.f32 %v2041_v48, %v2042_v63 }
 0x540   : > { %3344 = vset.pattern.permute.xlu1 %v4327_v25 }
 0x541   : > { %3343 = vset.pattern.permute.xlu2 %v4330_v2 }
 0x543   : > { %v1403_v43 = vpop.permute.xlu2 %1402 }
 0x544   : > { %v1890_v44 = vsel %vm5092_vm3, %v1403_v43, -1e+30 }
 0x545   : > { %v1979_v21 = vsel %vm207_vm4, %v1890_v44, -inf }
 0x546   : > { %v1984_v51 = vmax.f32 %v5073_v4, %v1979_v21 }
 0x548   : > { %1508 = vperm.xlu1 %3344, %v4397_v11  }
 0x549   : > { %1495 = vperm.xlu2 %3343, %v1472_v57  }
 0x54a   : > { %v1396_v56 = vpop.permute.xlu1 %1395 }
 0x54b   : > { %v1889_v35 = vsel %vm4650_vm10, %v1396_v56, -1e+30  ;;  %vm913_vm10 = vcmp.ne.s32.totalorder %v885_v60, 0 }
 0x54c   : > { %v2166_v34 = vsel %vm207_vm4, %v1889_v35, -inf  ;;  %v1741_v37 = vsel %vm913_vm10, 1, %v5922_v3  ;;  %vm6012_vm10 = vmmov (%p827_p0), %vm6009_vm13 }
 0x54d   : > { %v2173_v58 = vmax.f32 %v2171_v39, %v2166_v34  ;;  %v1772_v43 = vperm.slane %v1741_v37, 0 }
 0x54f   : > { %vm5162_vm14 = vcmp.eq.s32.totalorder %v1772_v43, 1 }
 0x550   : > { %3346 = vset.pattern.permute.xlu1 %v4330_v2 }
 0x551   : > { %3345 = vset.pattern.permute.xlu2 %v4352_v36 }
 0x553   : > { %v1421_v45 = vpop.permute.xlu2 %1420 }
 0x554   : > { %v1893_v29 = vsel %vm5092_vm3, %v1421_v45, -1e+30 }
 0x555   : > { %v2168_v47 = vsel %vm207_vm4, %v1893_v29, -inf }
 0x556   : > { %v5118_v50 = vmax.f32 %v2173_v58, %v2168_v47 }
 0x558   : > { %1520 = vperm.xlu1 %3346, %v4397_v11  }
 0x559   : > { %1514 = vperm.xlu2 %3345, %v4397_v11  }
 0x55a   : > { %v1415_v9 = vpop.permute.xlu1 %1414 }
 0x55b   : > { %v1892_v4 = vsel %vm5092_vm3, %v1415_v9, -1e+30  ;;  %v3377_v9 = vld [vmem:[%s4317_s16 + $0x18] sm:$0xff] }
 0x55c   : > { %v2105_v27 = vsel %vm207_vm4, %v1892_v4, -inf  ;;  %v1597_v4 = vperm.slane %v3377_v9, 3 }
 0x55d   : > { %v5125_v41 = vmax.f32 %v2110_v0, %v2105_v27 }
 0x560   : > { %3348 = vset.pattern.permute.xlu1 %v4352_v36 }
 0x561   : > { %3347 = vset.pattern.permute.xlu2 %v4308_v28 }
 0x563   : > { %v1434_v7 = vpop.permute.xlu2 %1433 }
 0x564   : > { %v1895_v39 = vsel %vm4882_vm5, %v1434_v7, -1e+30 }
 0x565   : > { %v2044_v57 = vsel %vm207_vm4, %v1895_v39, -inf }
 0x566   : > { %v2045_v30 = vmax.f32 %v2043_v52, %v2044_v57 }
 0x568   : > { %1539 = vperm.xlu1 %3348, %v4526_v17  }
 0x569   : > { %1527 = vperm.xlu2 %3347, %v4526_v17  }
 0x56a   : > { %v1428_v11 = vpop.permute.xlu1 %1427 }
 0x56b   : > { %v1894_v26 = vsel %vm4882_vm5, %v1428_v11, -1e+30 }
 0x56c   : > { %v1981_v53 = vsel %vm207_vm4, %v1894_v26, -inf }
 0x56d   : > { %v1986_v22 = vmax.f32 %v1984_v51, %v1981_v53 }
 0x570   : > { %3350 = vset.pattern.permute.xlu1 %v4308_v28 }
 0x571   : > { %3349 = vset.pattern.permute.xlu2 %v4330_v2 }
 0x573   : > { %v1453_v19 = vpop.permute.xlu2 %1452 }
 0x574   : > { %v1898_v32 = vsel %vm4538_vm15, %v1453_v19, -1e+30 }
 0x575   : > { %v1983_v40 = vsel %vm207_vm4, %v1898_v32, -inf }
 0x576   : > { %v1988_v42 = vmax.f32 %v1986_v22, %v1983_v40 }
 0x578   : > { %1552 = vperm.xlu1 %3350, %v4689_v16  }
 0x579   : > { %1545 = vperm.xlu2 %3349, %v4526_v17  }
 0x57a   : > { %v1446_v0 = vpop.permute.xlu1 %1445 }
 0x57b   : > { %v1897_v23 = vsel %vm4882_vm5, %v1446_v0, -1e+30 }
 0x57c   : > { %v2170_v54 = vsel %vm207_vm4, %v1897_v23, -inf }
 0x57d   : > { %v2177_v49 = vmax.f32 %v5118_v50, %v2170_v54 }
 0x580   : > { %3352 = vset.pattern.permute.xlu1 %v4330_v2 }
 0x581   : > { %3351 = vset.pattern.permute.xlu2 %v4327_v25 }
 0x583   : > { %v1465_v55 = vpop.permute.xlu2 %1464 }
 0x584   : > { %v1900_v13 = vsel %vm4538_vm15, %v1465_v55, -1e+30 }
 0x585   : > { %v2109_v17 = vsel %vm207_vm4, %v1900_v13, -inf }
 0x586   : > { %v2114_v62 = vmax.f32 %v5125_v41, %v2109_v17 }
 0x588   : > { %1570 = vperm.xlu1 %3352, %v4689_v16  }
 0x589   : > { %1558 = vperm.xlu2 %3351, %v4689_v16  }
 0x58a   : > { %v1459_v48 = vpop.permute.xlu1 %1458 }
 0x58b   : > { %v1899_v63 = vsel %vm4538_vm15, %v1459_v48, -1e+30 }
 0x58c   : > { %v2046_v52 = vsel %vm207_vm4, %v1899_v63, -inf }
 0x58d   : > { %v2047_v44 = vmax.f32 %v2045_v30, %v2046_v52 }
 0x590   : > { %3354 = vset.pattern.permute.xlu1 %v4327_v25 }
 0x591   : > { %3353 = vset.pattern.permute.xlu2 %v4308_v28 }
 0x593   : > { %v1484_v10 = vpop.permute.xlu2 %1483 }
 0x594   : > { %v1903_v16 = vsel %vm5162_vm14, %v1484_v10, -1e+30 }
 0x595   : > { %v2048_v14 = vsel %vm207_vm4, %v1903_v16, -inf }
 0x596   : > { %v2049_v51 = vmax.f32 %v2047_v44, %v2048_v14 }
 0x598   : > { %1583 = vperm.xlu1 %3354, %v4373_v8  }
 0x599   : > { %1577 = vperm.xlu2 %3353, %v4373_v8  }
 0x59a   : > { %v1478_v56 = vpop.permute.xlu1 %1477 }
 0x59b   : > { %v1902_v35 = vsel %vm5162_vm14, %v1478_v56, -1e+30 }
 0x59c   : > { %v1985_v34 = vsel %vm207_vm4, %v1902_v35, -inf }
 0x59d   : > { %v5175_v58 = vmax.f32 %v1988_v42, %v1985_v34 }
 0x5a0   : > { %3357 = vset.pattern.permute.xlu1 %v4308_v28 }
 0x5a1   : > { %3355 = vset.pattern.permute.xlu2 %v4352_v36 }
 0x5a3   : > { %v1496_v45 = vpop.permute.xlu2 %1495 }
 0x5a4   : > { %v1905_v29 = vsel %vm5162_vm14, %v1496_v45, -1e+30 }
 0x5a5   : > { %v2174_v47 = vsel %vm207_vm4, %v1905_v29, -inf }
 0x5a6   : > { %v2179_v50 = vmax.f32 %v2177_v49, %v2174_v47 }
 0x5a8   : > { %1602 = vperm.xlu1 %3357, %v1597_v4  }
 0x5a9   : > { %1589 = vperm.xlu2 %3355, %v4373_v8   ;;  %v1774_v8 = vperm.slane %v4509_v1, 0 }
 0x5aa   : > { %v1490_v27 = vpop.permute.xlu1 %1489 }
 0x5ab   : > { %v1904_v41 = vsel %vm5162_vm14, %v1490_v27, -1e+30  ;;  %vm5193_vm15 = vcmp.eq.s32.totalorder %v1774_v8, 1 }
 0x5ac   : > { %v2111_v7 = vsel %vm207_vm4, %v1904_v41, -inf  ;;  %v1911_v19 = vsel %vm5193_vm15, %v4795_v5, -1e+30 }
 0x5ad   : > { %v2116_v39 = vmax.f32 %v2114_v62, %v2111_v7  ;;  %v2052_v0 = vsel %vm207_vm4, %v1911_v19, -inf }
 0x5b0   : > { %3359 = vset.pattern.permute.xlu1 %v4352_v36 }
 0x5b1   : > { %3358 = vset.pattern.permute.xlu2 %v4327_v25 }
 0x5b3   : > { %v1515_v57 = vpop.permute.xlu2 %1514 }
 0x5b4   : > { %v1908_v30 = vsel %vm4679_vm1, %v1515_v57, -1e+30 }
 0x5b5   : > { %v2113_v11 = vsel %vm207_vm4, %v1908_v30, -inf }
 0x5b6   : > { %v2118_v26 = vmax.f32 %v2116_v39, %v2113_v11  ;;  %v5994_v11 = vld [vmem:[#allocation87_spill] sm:$0xff] }
 0x5b8   : > { %1614 = vperm.xlu1 %3359, %v1597_v4  }
 0x5b9   : > { %1608 = vperm.xlu2 %3358, %v1597_v4  }
 0x5ba   : > { %v1509_v22 = vpop.permute.xlu1 %1508 }
 0x5bb   : > { %v1907_v32 = vsel %vm4679_vm1, %v1509_v22, -1e+30 }
 0x5bc   : > { %v2050_v40 = vsel %vm207_vm4, %v1907_v32, -inf }
 0x5bd   : > { %v2051_v42 = vmax.f32 %v2049_v51, %v2050_v40 }
 0x5bf   : > { %v5205_v54 = vmax.f32 %v2051_v42, %v2052_v0 }
 0x5c0   : > { %3362 = vset.pattern.permute.xlu1 %v4327_v25 }
 0x5c1   : > { %3360 = vset.pattern.permute.xlu2 %v4330_v2 }
 0x5c3   : > { %v1528_v23 = vpop.permute.xlu2 %1527 }
 0x5c4   : > { %v1910_v49 = vsel %vm5193_vm15, %v1528_v23, -1e+30 }
 0x5c5   : > { %v1989_v5 = vsel %vm207_vm4, %v1910_v49, -inf }
 0x5c6   : > { %v1992_v55 = vmax.f32 %v5175_v58, %v1989_v5 }
 0x5c8   : > { %1633 = vperm.xlu1 %3362, %v4405_v31  }
 0x5c9   : > { %1620 = vperm.xlu2 %3360, %v1597_v4  }
 0x5ca   : > { %v1521_v13 = vpop.permute.xlu1 %1520 }
 0x5cb   : > { %v1909_v17 = vsel %vm4679_vm1, %v1521_v13, -1e+30 }
 0x5cc   : > { %v2176_v60 = vsel %vm207_vm4, %v1909_v17, -inf }
 0x5cd   : > { %v2181_v62 = vmax.f32 %v2179_v50, %v2176_v60 }
 0x5d0   : > { %3364 = vset.pattern.permute.xlu1 %v4330_v2 }
 0x5d1   : > { %3363 = vset.pattern.permute.xlu2 %v4352_v36 }
 0x5d3   : > { %v1546_v37 = vpop.permute.xlu2 %1545 }
 0x5d4   : > { %v1913_v48 = vsel %vm5193_vm15, %v1546_v37, -1e+30 }
 0x5d5   : > { %v2178_v63 = vsel %vm207_vm4, %v1913_v48, -inf }
 0x5d6   : > { %v5221_v43 = vmax.f32 %v2181_v62, %v2178_v63 }
 0x5d8   : > { %1645 = vperm.xlu1 %3364, %v4405_v31  }
 0x5d9   : > { %1639 = vperm.xlu2 %3363, %v4405_v31  }
 0x5da   : > { %v1540_v38 = vpop.permute.xlu1 %1539 }
 0x5db   : > { %v1912_v52 = vsel %vm5193_vm15, %v1540_v38, -1e+30 }
 0x5dc   : > { %v2115_v44 = vsel %vm207_vm4, %v1912_v52, -inf }
 0x5dd   : > { %v5228_v10 = vmax.f32 %v2118_v26, %v2115_v44 }
 0x5e0   : > { %3367 = vset.pattern.permute.xlu1 %v4352_v36 }
 0x5e1   : > { %3365 = vset.pattern.permute.xlu2 %v4308_v28 }
 0x5e3   : > { %v1559_v21 = vpop.permute.xlu2 %1558 }
 0x5e4   : > { %v1915_v16 = vsel %vm4892_vm8, %v1559_v21, -1e+30 }
 0x5e5   : > { %v2054_v14 = vsel %vm207_vm4, %v1915_v16, -inf }
 0x5e6   : > { %v2055_v31 = vmax.f32 %v5205_v54, %v2054_v14 }
 0x5e8   : > { %1664 = vperm.xlu1 %3367, %v4551_v18  }
 0x5e9   : > { %1652 = vperm.xlu2 %3365, %v4551_v18  }
 0x5ea   : > { %v1553_v51 = vpop.permute.xlu1 %1552 }
 0x5eb   : > { %v1914_v56 = vsel %vm4892_vm8, %v1553_v51, -1e+30 }
 0x5ec   : > { %v1991_v35 = vsel %vm207_vm4, %v1914_v56, -inf }
 0x5ed   : > { %v5241_v34 = vmax.f32 %v1992_v55, %v1991_v35 }
 0x5f0   : > { %3369 = vset.pattern.permute.xlu1 %v4308_v28 }
 0x5f1   : > { %3368 = vset.pattern.permute.xlu2 %v4330_v2 }
 0x5f8   : > { %1677 = vperm.xlu1 %3369, %v4707_v59  }
 0x5f9   : > { %1670 = vperm.xlu2 %3368, %v4551_v18   ;;  %v1578_v18 = vpop.permute.xlu2 %1577 }
 0x5fa   : > { %v1571_v58 = vpop.permute.xlu1 %1570 }
 0x5fb   : > { %v1917_v45 = vsel %vm4892_vm8, %v1571_v58, -1e+30 }
 0x5fc   : > { %v5250_v29 = vsel %vm207_vm4, %v1917_v45, -inf }
 0x5fd   : > { %v2185_v47 = vmax.f32 %v5221_v43, %v5250_v29 }
 0x600   : > { %3371 = vset.pattern.permute.xlu1 %v4330_v2  ;;  %v889_v2 = vrot.slane %v4509_v1, 3 }
 0x601   : > { %3370 = vset.pattern.permute.xlu2 %v4327_v25 }
 0x602   : > { %vm917_vm1 = vcmp.ne.s32.totalorder %v889_v2, 0 }
 0x603   : > { %v1590_v50 = vpop.permute.xlu2 %1589 }
 0x604   : > { %v1920_v35 = vsel %vm4561_vm9, %v1590_v50, -1e+30 }
 0x608   : > { %1695 = vperm.xlu1 %3371, %v4707_v59  }
 0x609   : > { %1683 = vperm.xlu2 %3370, %v4707_v59   ;;  %v891_v59 = vrot.slane %v4509_v1, 5 }
 0x60a   : > { %v1584_v46 = vpop.permute.xlu1 %1583 }
 0x60b   : > { %vm919_vm5 = vcmp.ne.s32.totalorder %v891_v59, 0 }
 0x60c   : > { %v1747_v41 = vsel %vm919_vm5, 1, %v5922_v3 }
 0x60d   : > { %v1779_v39 = vperm.slane %v1747_v41, 0 }
 0x60f   : > { %vm5278_vm6 = vcmp.eq.s32.totalorder %v1779_v39, 1 }
 0x610   : > { %3373 = vset.pattern.permute.xlu1 %v4327_v25  ;;  %v1931_v26 = vsel %vm5278_vm6, %v4801_v20, -1e+30  ;;  %v1918_v20 = vsel %vm4561_vm9, %v1578_v18, -1e+30 }
 0x611   : > { %3372 = vset.pattern.permute.xlu2 %v4308_v28  ;;  %v1745_v28 = vsel %vm917_vm1, 1, %v5922_v3  ;;  %v2062_v32 = vsel %vm207_vm4, %v1931_v26, -inf  ;;  %v1993_v13 = vsel %vm207_vm4, %v1918_v20, -inf  ;;  %vm6014_vm1 = vmmov (%p827_p0), %vm6012_vm10 }
 0x612   : > { %v1777_v25 = vperm.slane %v1745_v28, 0  ;;  %v1996_v62 = vmax.f32 %v5241_v34, %v1993_v13  ;;  %v2205_v13 = vld [vmem:[%s5739_s2 + $0x38] sm:$0xff] (%p827_p0) }
 0x613   : > { %v1609_v4 = vpop.permute.xlu2 %1608 }
 0x614   : > { %vm5270_vm8 = vcmp.eq.s32.totalorder %v1777_v25, 1 }
 0x615   : > { %v1923_v7 = vsel %vm5270_vm8, %v1609_v4, -1e+30 }
 0x616   : > { %v2058_v57 = vsel %vm207_vm4, %v1923_v7, -inf }
 0x618   : > { %1708 = vperm.xlu1 %3373, %v4729_v6  }
 0x619   : > { %1702 = vperm.xlu2 %3372, %v4729_v6  }
 0x61a   : > { %v1603_v9 = vpop.permute.xlu1 %1602 }
 0x61b   : > { %v1922_v55 = vsel %vm5270_vm8, %v1603_v9, -1e+30 }
 0x61c   : > { %v1995_v60 = vsel %vm207_vm4, %v1922_v55, -inf }
 0x61d   : > { %v1998_v63 = vmax.f32 %v1996_v62, %v1995_v60  ;;  %v6003_v60 = vld [vmem:[#allocation58_spill] sm:$0xff] (%p827_p0) }
 0x621   : > { %3374 = vset.pattern.permute.xlu2 %v4352_v36  ;;  %v1919_v36 = vsel %vm4561_vm9, %v1584_v46, -1e+30  ;;  %vm2212_vm9 = vcmp.gt.f32.partialorder (%p827_p0), %v2204_v61, 0.0 }
 0x622   : > { %v2056_v1 = vsel %vm207_vm4, %v1919_v36, -inf  ;;  %v2252_v55 = vsel (%p827_p0), %vm2212_vm9, 1, %v6000_v15 }
 0x623   : > { %v2057_v30 = vmax.f32 %v2055_v31, %v2056_v1  ;;  %v1621_v42 = vpop.permute.xlu2 %1620  ;;  %2273 = vperm.xlu0 (%p827_p0), %3378, %v2252_v55  }
 0x624   : > { %v1925_v16 = vsel %vm5270_vm8, %v1621_v42, -1e+30 }
 0x625   : > { %v2059_v8 = vmax.f32 %v2057_v30, %v2058_v57  ;;  %v2184_v34 = vsel %vm207_vm4, %v1925_v16, -inf  ;;  %v6010_v16 = vld [vmem:[#allocation52_spill] sm:$0xff] (%p827_p0) }
 0x626   : > { %v2187_v12 = vmax.f32 %v2185_v47, %v2184_v34  ;;  %v2198_v34 = vld [vmem:[%s5739_s2] sm:$0xff] (%p827_p0) }
 0x627   :  { %vm2206_vm14 = vcmp.gt.f32.partialorder (%p827_p0), %v2198_v34, 0.0 }
 0x629   : > { %1714 = vperm.xlu2 %3374, %v4729_v6  }
 0x62a   : > { %v1615_v27 = vpop.permute.xlu1 %1614 }
 0x62b   : > { %v1924_v46 = vsel %vm5270_vm8, %v1615_v27, -1e+30 }
 0x62c   : > { %v2121_v28 = vsel %vm207_vm4, %v1924_v46, -inf }
 0x631   :  { %3379 = vset.pattern.permute.xlu2 (%p827_p0), %v6000_v15 }
 0x633   : > { %v1640_v0 = vpop.permute.xlu2 %1639 }
 0x634   : > { %v1928_v50 = vsel %vm5992_vm11, %v1640_v0, -1e+30 }
 0x635   : > { %v2123_v41 = vsel %vm207_vm4, %v1928_v50, -inf  ;;  %v6017_v50 = vld [vmem:[#allocation24_spill] sm:$0xff] (%p827_p0) }
 0x63a   : > { %v1634_v3 = vpop.permute.xlu1 %1633 }
 0x63b   : > { %v1927_v53 = vsel %vm5992_vm11, %v1634_v3, -1e+30 }
 0x63c   : > { %v2060_v22 = vsel %vm207_vm4, %v1927_v53, -inf }
 0x63d   : > { %v5288_v19 = vmax.f32 %v2059_v8, %v2060_v22 }
 0x63f   : > { %v2063_v40 = vmax.f32 %v5288_v19, %v2062_v32 }
 0x643   : > { %v1653_v23 = vpop.permute.xlu2 %1652 }
 0x644   : > { %v1930_v17 = vsel %vm5278_vm6, %v1653_v23, -1e+30 }
 0x645   : > { %v1999_v48 = vsel %vm207_vm4, %v1930_v17, -inf  ;;  %v6002_v17 = vld [vmem:[#allocation55_spill] sm:$0xff] (%p827_p0) }
 0x646   : > { %v2000_v52 = vmax.f32 %v1998_v63, %v1999_v48  ;;  %2745 = vmatpush.msrb.mxu0 (%p827_p0), %v6002_v17  ;;  %v6004_v48 = vld [vmem:[#allocation54_spill] sm:$0xff] (%p827_p0)  ;;  %v6005_v63 = vld [vmem:[#allocation57_spill] sm:$0xff] (%p827_p0) }
 0x648   :  { %2746 = vmatpush.msrb.mxu0 (%p827_p0), %v6004_v48 }
 0x64a   : > { %v1646_v54 = vpop.permute.xlu1 %1645 }
 0x64b   : > { %v1929_v31 = vsel %vm5992_vm11, %v1646_v54, -1e+30 }
 0x64c   : > { %v2186_v2 = vsel %vm207_vm4, %v1929_v31, -inf }
 0x64d   : > { %v2189_v25 = vmax.f32 %v2187_v12, %v2186_v2 }
 0x653   : > { %v1671_v49 = vpop.permute.xlu2 %1670 }
 0x654   : > { %v1933_v45 = vsel %vm5278_vm6, %v1671_v49, -1e+30  ;;  %v5995_v49 = vld [vmem:[#allocation88_spill] sm:$0xff] }
 0x655   : > { %v2188_v59 = vsel %vm207_vm4, %v1933_v45, -inf  ;;  %v2199_v45 = vld [vmem:[%s5739_s2 + $0x8] sm:$0xff] (%p827_p0) }
 0x656   : > { %v2191_v36 = vmax.f32 %v2189_v25, %v2188_v59  ;;  %vm2207_vm15 = vcmp.gt.f32.partialorder (%p827_p0), %v2199_v45, 0.0  ;;  %v6020_v25 = vld [vmem:[#allocation14_spill] sm:$0xff] (%p827_p0) }
 0x657   :  { %v2247_v2 = vsel (%p827_p0), %vm2207_vm15, 1, %v6000_v15  ;;  %vm2417_vm9 = vcmp.ge.s32.totalorder (%p827_p0), %v6020_v25, 0 }
 0x658   : > { %v2193_v7 = vmax.f32 %v2191_v36, %v5993_v24  ;;  %v6023_v36 = vld [vmem:[#allocation16_spill] sm:$0xff] (%p827_p0)  ;;  %v6027_v24 = vld [vmem:[#allocation15_spill] sm:$0xff] (%p827_p0) }
 0x65a   : > { %v1665_v5 = vpop.permute.xlu1 %1664 }
 0x65b   : > { %v1932_v27 = vsel %vm5278_vm6, %v1665_v5, -1e+30  ;;  %v6001_v5 = vld [vmem:[#allocation59_spill] sm:$0xff] (%p827_p0)  ;;  %vm6018_vm6 = vmmov (%p827_p0), %vm6014_vm1 }
 0x65c   : > { %v2125_v43 = vsel %vm207_vm4, %v1932_v27, -inf  ;;  %2680 = vmatpush.msrb.mxu2 (%p827_p0), %v6001_v5  ;;  %v6021_v27 = vld [vmem:[#allocation21_spill] sm:$0xff] (%p827_p0) }
 0x65e   :  { %2681 = vmatpush.msrb.mxu2 (%p827_p0), %v6003_v60 }
 0x660   :  { %2682 = vmatpush.msrb.mxu2 (%p827_p0), %v6005_v63 }
 0x663   : > { %v1684_v37 = vpop.permute.xlu2 %1683 }
 0x664   : > { %v1935_v22 = vsel %vm4899_vm7, %v1684_v37, -1e+30 }
 0x665   : > { %v2064_v19 = vsel %vm207_vm4, %v1935_v22, -inf }
 0x666   : > { %v2065_v42 = vmax.f32 %v2063_v40, %v2064_v19  ;;  %v2202_v40 = vld [vmem:[%s5739_s2 + $0x20] sm:$0xff] (%p827_p0) }
 0x66a   : > { %v1678_v38 = vpop.permute.xlu1 %1677 }
 0x66b   : > { %v1934_v44 = vsel %vm4899_vm7, %v1678_v38, -1e+30  ;;  %v6006_v38 = vld [vmem:[#allocation53_spill] sm:$0xff] (%p827_p0) }
 0x66c   : > { %v2001_v21 = vsel %vm207_vm4, %v1934_v44, -inf  ;;  %2747 = vmatpush.msrb.mxu0 (%p827_p0), %v6006_v38 }
 0x66d   : > { %v2002_v14 = vmax.f32 %v2000_v52, %v2001_v21  ;;  %v6007_v52 = vld [vmem:[#allocation56_spill] sm:$0xff] (%p827_p0)  ;;  %v6008_v21 = vld [vmem:[#allocation25_spill] sm:$0xff] (%p827_p0) }
 0x66e   :  { %2683 = vmatpush.msrb.mxu2 (%p827_p0), %v6007_v52  ;;  %2748 = vmatpush.msrb.mxu0 (%p827_p0), %v6010_v16 }
 0x66f   : > { %v2004_v56 = vmax.f32 %v2002_v14, %v3511_v33  ;;  %v2119_v33 = vsel %vm207_vm4, %v1920_v35, -inf  ;;  %3083 = vmatmul.msk.f32.vlgmr.msrb.gmra.mxu2 (%p827_p0), %vm6009_vm13, %v6008_v21  ;;  %v2200_v14 = vld [vmem:[%s5739_s2 + $0x10] sm:$0xff] (%p827_p0)  ;;  %v6011_v35 = vld [vmem:[#allocation26_spill] sm:$0xff] (%p827_p0)  ;;  %vm6026_vm13 = vmmov (%p827_p0), %vm6014_vm1 }
 0x670   : > { %v2122_v4 = vmax.f32 %v5228_v10, %v2119_v33  ;;  %vm2208_vm0 = vcmp.gt.f32.partialorder (%p827_p0), %v2200_v14, 0.0 }
 0x672   : > { %v2124_v6 = vmax.f32 %v2122_v4, %v2121_v28  ;;  %v6019_v28 = vld [vmem:[#allocation17_spill] sm:$0xff] (%p827_p0) }
 0x673   : > { %v1703_v51 = vpop.permute.xlu2 %1702  ;;  %vm2420_vm11 = vcmp.ge.s32.totalorder (%p827_p0), %v6019_v28, 0 }
 0x674   : > { %v1938_v58 = vsel %vm4931_vm12, %v1703_v51, -1e+30  ;;  %v2126_v29 = vmax.f32 %v2124_v6, %v2123_v41  ;;  %v2201_v51 = vld [vmem:[%s5739_s2 + $0x18] sm:$0xff] (%p827_p0)  ;;  %v2436_v4 = vsel (%p827_p0), %vm2420_vm11, 1, %v6000_v15  ;;  %v2433_v41 = vsel (%p827_p0), %vm2417_vm9, 1, %v6000_v15  ;;  %v6024_v6 = vld [vmem:[#allocation13_spill] sm:$0xff] (%p827_p0) }
 0x675   : > { %v2003_v18 = vsel %vm207_vm4, %v1938_v58, -inf  ;;  %vm2209_vm3 = vcmp.gt.f32.partialorder (%p827_p0), %v2201_v51, 0.0 }
 0x676   : > { %v2194_v9 = vmax.f32 %v2003_v18, %v2004_v56   ;;  %v2128_v1 = vmax.f32 %v2126_v29, %v2125_v43  ;;  %v2248_v56 = vsel (%p827_p0), %vm2208_vm0, 1, %v6000_v15  ;;  %v2249_v58 = vsel (%p827_p0), %vm2209_vm3, 1, %v6000_v15  ;;  %v6025_v29 = vld [vmem:[#allocation22_spill] sm:$0xff] (%p827_p0) }
 0x677   :  { %3084 = vmatmul.msk.f32.gmra.mxu2 (%p827_p0), %vm6012_vm10, %v6011_v35  ;;  %v2246_v18 = vsel (%p827_p0), %vm2206_vm14, 1, %v6000_v15  ;;  %vm2416_vm0 = vcmp.ge.s32.totalorder (%p827_p0), %v6027_v24, 0  ;;  %vm6030_vm10 = vmmov (%p827_p0), %vm6014_vm1 }
 0x678   : > { %v2130_v3 = vmax.f32 %v2128_v1, %v5994_v11  ;;  %v5999_v33 = vmov %v2194_v9  ;;  %2214 = vxpose.xlu1.b32.start [1/4] (short) (narrow) (%p827_p0), %v2194_v9, 64  ;;  %v6015_v9 = vld [vmem:[#allocation19_spill] sm:$0xff] (%p827_p0)  ;;  %v6029_v1 = vld [vmem:[#allocation9_spill] sm:$0xff] (%p827_p0) }
 0x679   :  { %vm2421_vm5 = vcmp.ge.s32.totalorder (%p827_p0), %v6015_v9, 0  ;;  %v6016_v33 = vld [vmem:[#allocation18_spill] sm:$0xff] (%p827_p0) }
 0x67a   : > { %v1696_v47 = vpop.permute.xlu1 %1695  ;;  %vm2419_vm8 = vcmp.ge.s32.totalorder (%p827_p0), %v6016_v33, 0  ;;  %v2437_v12 = vsel (%p827_p0), %vm2421_vm5, 1, %v6000_v15 }
 0x67b   : > { %v1937_v39 = vsel %vm4899_vm7, %v1696_v47, -1e+30  ;;  %vm2210_vm7 = vcmp.gt.f32.partialorder (%p827_p0), %v2202_v40, 0.0  ;;  %v2435_v59 = vsel (%p827_p0), %vm2419_vm8, 1, %v6000_v15 }
 0x67c   : > { %v2190_v57 = vsel %vm207_vm4, %v1937_v39, -inf  ;;  %v2250_v62 = vsel (%p827_p0), %vm2210_vm7, 1, %v6000_v15  ;;  %vm6022_vm7 = vmmov (%p827_p0), %vm6014_vm1  ;;  %v2432_v39 = vsel (%p827_p0), %vm2416_vm0, 1, %v6000_v15 }
 0x67d   : > { %v5338_v10 = vmax.f32 %v2190_v57, %v2193_v7   ;;  %2267 = vperm.xlu2 (%p827_p0), %3379, %v2250_v62   ;;  %v6028_v7 = vld [vmem:[#allocation12_spill] sm:$0xff] (%p827_p0) }
 0x67e   :  { %vm2413_vm3 = vcmp.ge.s32.totalorder (%p827_p0), %v6028_v7, 0  ;;  %v6039_v7 = vld [vmem:[#allocation37_spill] sm:$0xff] (%p827_p0) }
 0x67f   : > { %v5996_v37 = vmov %v5338_v10  ;;  %v2429_v57 = vsel (%p827_p0), %vm2413_vm3, 1, %v6000_v15 }
 0x680   :  { %v2203_v37 = vld [vmem:[%s5739_s2 + $0x28] sm:$0xff] (%p827_p0) }
 0x681   :  { %vm2211_vm2 = vcmp.gt.f32.partialorder (%p827_p0), %v2203_v37, 0.0 }
 0x682   :  { %v2251_v31 = vsel (%p827_p0), %vm2211_vm2, 1, %v6000_v15  ;;  %vm2415_vm2 = vcmp.ge.s32.totalorder (%p827_p0), %v6024_v6, 0 }
 0x683   : > { %v1715_v30 = vpop.permute.xlu2 %1714  ;;  %v2431_v47 = vsel (%p827_p0), %vm2415_vm2, 1, %v6000_v15 }
 0x684   : > { %v1940_v26 = vsel %vm4931_vm12, %v1715_v30, -1e+30  ;;  %v6032_v30 = vld [vmem:[#allocation5_spill] sm:$0xff] (%p827_p0) }
 0x685   : > { %v2129_v8 = vsel %vm207_vm4, %v1940_v26, -inf  ;;  %2270 = vperm.xlu2 (%p827_p0), %3379, %v2251_v31   ;;  %vm2411_vm15 = vcmp.ge.s32.totalorder (%p827_p0), %v6032_v30, 0 }
 0x686   : > { %v2196_v53 = vmax.f32 %v2129_v8, %v2130_v3   ;;  %v6033_v3 = vld [vmem:[#allocation10_spill] sm:$0xff] (%p827_p0)  ;;  %v2427_v26 = vsel (%p827_p0), %vm2411_vm15, 1, %v6000_v15  ;;  %v6034_v8 = vld [vmem:[#allocation8_spill] sm:$0xff] (%p827_p0) }
 0x687   :  { %vm2412_vm5 = vcmp.ge.s32.totalorder (%p827_p0), %v6034_v8, 0 }
 0x688   : > { %v5997_v43 = vmov %v2196_v53  ;;  %v2428_v22 = vsel (%p827_p0), %vm2412_vm5, 1, %v6000_v15 }
 0x68a   : > { %v1709_v32 = vpop.permute.xlu1 %1708 }
 0x68b   : > { %v1939_v0 = vsel %vm4931_vm12, %v1709_v32, -1e+30  ;;  %vm2213_vm12 = vcmp.gt.f32.partialorder (%p827_p0), %v2205_v13, 0.0  ;;  %v6036_v32 = vld [vmem:[#allocation6_spill] sm:$0xff] (%p827_p0) }
 0x68c   : > { %v2066_v23 = vsel %vm207_vm4, %v1939_v0, -inf  ;;  %v2253_v44 = vsel (%p827_p0), %vm2213_vm12, 1, %v6000_v15  ;;  %vm2418_vm12 = vcmp.ge.s32.totalorder (%p827_p0), %v6023_v36, 0 }
 0x68d   : > { %v2067_v54 = vmax.f32 %v2065_v42, %v2066_v23  ;;  %829 = sbr.rel (!%p827_p0) target bundleno = 749 (0x2ed), region = 45  ;;  %2276 = vperm.xlu0 (%p827_p0), %3378, %v2253_v44   ;;  %2264 = vperm.xlu2 (%p827_p0), %3379, %v2249_v58   ;;  %v2434_v43 = vsel (%p827_p0), %vm2418_vm12, 1, %v6000_v15  ;;  %v6037_v42 = vld [vmem:[#allocation4_spill] sm:$0xff] (%p827_p0) }
 0x68e   :  { %vm2407_vm11 = vcmp.ge.s32.totalorder (%p827_p0), %v6037_v42, 0 }
 0x68f   : > { %v2195_v20 = vmax.f32 %v5995_v49, %v2067_v54   ;;  %v2423_v23 = vsel (%p827_p0), %vm2407_vm11, 1, %v6000_v15  ;;  %v6038_v54 = vld [vmem:[#allocation7_spill] sm:$0xff] (%p827_p0) }
 0x690   :  { %vm2408_vm9 = vcmp.ge.s32.totalorder (%p827_p0), %v6038_v54, 0 }
 0x691   : > { %v5998_v46 = vmov %v2195_v20  ;;  %2215 = vxpose.xlu1.b32.cont [2/4] (short) (narrow) (%p827_p0), %v2195_v20, 64  ;;  %v2424_v49 = vsel (%p827_p0), %vm2408_vm9, 1, %v6000_v15 }
 0x692   :  { %v6013_v46 = vld [vmem:[#allocation23_spill] sm:$0xff] }
 0x693   :  { %3085 = vmatmul.msk.f32.gmra.mxu2 %vm6014_vm1, %v6013_v46 }
 0x695   :  { %2261 = vperm.xlu0 %3378, %v2248_v56   ;;  %2258 = vperm.xlu2 %3379, %v2247_v2   ;;  %v2274_v13 = vpop.permute.xlu0 %2273 }
 0x699   :  { %2216 = vxpose.xlu1.b32.cont [3/4] (short) (narrow) %v2196_v53, 64  ;;  %v6035_v53 = vld [vmem:[#allocation3_spill] sm:$0xff] }
 0x69a   :  { %vm2409_vm8 = vcmp.ge.s32.totalorder %v6035_v53, 0 }
 0x69b   :  { %3086 = vmatmul.msk.f32.gmra.mxu2 %vm6018_vm6, %v6017_v50  ;;  %v2425_v19 = vsel %vm2409_vm8, 1, %v6000_v15  ;;  %vm2410_vm6 = vcmp.ge.s32.totalorder %v6036_v32, 0 }
 0x69c   :  { %v2426_v0 = vsel %vm2410_vm6, 1, %v6000_v15 }
 0x69d   :  { %2255 = vperm.xlu0 %3378, %v2246_v18   ;;  %2476 = vperm.xlu2 %3379, %v2435_v59  }
 0x6a1   :  { %2217 = vxpose.xlu1.b32.end [4/4] (short) (narrow) %v5338_v10, 64  ;;  %v6031_v10 = vld [vmem:[#allocation11_spill] sm:$0xff] }
 0x6a2   :  { %vm2414_vm14 = vcmp.ge.s32.totalorder %v6031_v10, 0  ;;  %v6043_v10 = vld [vmem:[#allocation44_spill] sm:$0xff] }
 0x6a3   :  { %3087 = vmatmul.msk.f32.gmra.mxu2 %vm6022_vm7, %v6021_v27  ;;  %v2430_v11 = vsel %vm2414_vm14, 1, %v6000_v15  ;;  %vm2284_vm7 = vcmp.eq.s32.totalorder %v2274_v13, 1  ;;  %v6048_v13 = vld [vmem:[#allocation70_spill] sm:$0xff] }
 0x6a5   :  { %2482 = vperm.xlu0 %3378, %v2437_v12   ;;  %2470 = vperm.xlu2 %3379, %v2433_v41  }
 0x6ab   :  { %3088 = vmatmul.msk.f32.gmra.mxu2 %vm6026_vm13, %v6025_v29 }
 0x6ad   :  { %2479 = vperm.xlu0 %3378, %v2436_v4   ;;  %2464 = vperm.xlu2 %3379, %v2431_v47  }
 0x6b3   :  { %3089 = vmatmul.msk.f32.gmra.mxu2 %vm6030_vm10, %v6029_v1  ;;  %v6041_v1 = vld [vmem:[#allocation49_spill] sm:$0xff] }
 0x6b5   :  { %2473 = vperm.xlu0 %3378, %v2434_v43   ;;  %2458 = vperm.xlu2 %3379, %v2429_v57   ;;  %v6042_v57 = vld [vmem:[#allocation51_spill] sm:$0xff] }
 0x6bb   :  { %3090 = vmatmul.msk.f32.gmra.mxu2 %vm6014_vm1, %v6033_v3 }
 0x6bd   :  { %2467 = vperm.xlu0 %3378, %v2432_v39   ;;  %2452 = vperm.xlu2 %3379, %v2427_v26   ;;  %v6040_v39 = vld [vmem:[#allocation42_spill] sm:$0xff]  ;;  %v6044_v26 = vld [vmem:[#allocation43_spill] sm:$0xff] }
 0x6c5   :  { %2461 = vperm.xlu0 %3378, %v2430_v11   ;;  %2446 = vperm.xlu2 %3379, %v2425_v19   ;;  %v6045_v19 = vld [vmem:[#allocation47_spill] sm:$0xff] }
 0x6cd   :  { %2455 = vperm.xlu0 %3378, %v2428_v22   ;;  %2440 = vperm.xlu2 %3379, %v2423_v23  }
 0x6d5   :  { %2449 = vperm.xlu0 %3378, %v2426_v0   ;;  %v6046_v0 = vld [vmem:[#allocation20_spill] sm:$0xff] }
 0x6d6   :  { %vm2422_vm15 = vcmp.ge.s32.totalorder %v6046_v0, 0 }
 0x6d7   :  { %v2268_v55 = vpop.permute.xlu2 %2267  ;;  %v2438_v23 = vsel %vm2422_vm15, 1, %v6000_v15 }
 0x6d8   :  { %vm2282_vm2 = vcmp.eq.s32.totalorder %v2268_v55, 1 }
 0x6dd   :  { %2443 = vperm.xlu0 %3378, %v2424_v49   ;;  %v6047_v49 = vld [vmem:[#allocation50_spill] sm:$0xff] }
 0x6df   :  { %v2271_v60 = vpop.permute.xlu2 %2270 }
 0x6e0   :  { %vm2283_vm12 = vcmp.eq.s32.totalorder %v2271_v60, 1 }
 0x6e7   :  { %v2265_v63 = vpop.permute.xlu2 %2264 }
 0x6e8   :  { %vm2281_vm0 = vcmp.eq.s32.totalorder %v2265_v63, 1 }
 0x6ef   :  { %v2259_v35 = vpop.permute.xlu2 %2258 }
 0x6f0   :  { %vm2279_vm10 = vcmp.eq.s32.totalorder %v2259_v35, 1  ;;  %v6050_v35 = vld [vmem:[#allocation72_spill] sm:$0xff] }
 0x6f4   :  { %3380 = vset.pattern.permute.xlu1 %v6000_v15  ;;  %v6049_v15 = vld [vmem:[#allocation71_spill] sm:$0xff] }
 0x6f7   :  { %v5489_v11 = vpop.permute.xlu2 %2476 }
 0x6ff   :  { %v2277_v37 = vpop.permute.xlu0 %2276  ;;  %v5495_v8 = vpop.permute.xlu2 %2470 }
 0x700   :  { %vm2285_vm13 = vcmp.eq.s32.totalorder %v2277_v37, 1 }
 0x707   :  { %v2262_v38 = vpop.permute.xlu0 %2261  ;;  %v5499_v22 = vpop.permute.xlu2 %2464 }
 0x708   :  { %vm2280_vm3 = vcmp.eq.s32.totalorder %v2262_v38, 1 }
 0x70f   :  { %v2256_v46 = vpop.permute.xlu0 %2255  ;;  %v5505_v42 = vpop.permute.xlu2 %2458 }
 0x710   :  { %vm2278_vm14 = vcmp.eq.s32.totalorder %v2256_v46, 1 }
 0x717   :  { %v5487_v30 = vpop.permute.xlu0 %2482 }
 0x71b   :  { %2485 = vperm.xlu1 %3380, %v2438_v23  }
 0x71f   :  { %v5491_v3 = vpop.permute.xlu0 %2479 }
 0x727   :  { %v5497_v53 = vpop.permute.xlu0 %2473 }
 0x72d   :  { %v2230_v20 = vpop.trf.xlu1 }
 0x72e   :  { %v2286_v25 = vsel %vm2278_vm14, %v2230_v20, 0.0  ;;  %v2453_v20 = vpop.permute.xlu2 %2452 }
 0x72f   :  { %v5472_v36 = vpack.c.bf16 %v2286_v25, %v2286_v25  ;;  %v5503_v32 = vpop.permute.xlu0 %2467  ;;  %vm2491_vm11 = vcmp.eq.s32.totalorder %v2453_v20, 1 }
 0x731   :  { %v2310_v47 = vunpack.c.l.b16 %v5472_v36 }
 0x735   :  { %v2231_v61 = vpop.trf.xlu1 }
 0x736   :  { %v2287_v50 = vsel %vm2279_vm10, %v2231_v61, 0.0 }
 0x737   :  { %v5469_v4 = vpack.c.bf16 %v2287_v50, %v2287_v50  ;;  %v5509_v54 = vpop.permute.xlu0 %2461  ;;  %v6051_v50 = vld [vmem:[#allocation73_spill] sm:$0xff] }
 0x739   :  { %v2311_v43 = vunpack.c.l.b16 %v5469_v4 }
 0x73b   :  { %v2318_v24 = vpack.c.b16 %v2311_v43, %v2310_v47 }
 0x73d   :  { %v2232_v40 = vpop.trf.xlu1 }
 0x73e   :  { %v2288_v2 = vsel %vm2280_vm3, %v2232_v40, 0.0  ;;  %v2447_v40 = vpop.permute.xlu2 %2446 }
 0x73f   :  { %v5466_v59 = vpack.c.bf16 %v2288_v2, %v2288_v2  ;;  %v2456_v61 = vpop.permute.xlu0 %2455  ;;  %vm2489_vm8 = vcmp.eq.s32.totalorder %v2447_v40, 1 }
 0x740   :  { %vm2492_vm9 = vcmp.eq.s32.totalorder %v2456_v61, 1  ;;  %v6055_v61 = vld [vmem:[#allocation77_spill] sm:$0xff] }
 0x741   :  { %v2312_v6 = vunpack.c.l.b16 %v5466_v59 }
 0x745   :  { %v2233_v5 = vpop.trf.xlu1 }
 0x746   :  { %v2289_v34 = vsel %vm2281_vm0, %v2233_v5, 0.0  ;;  %v2441_v60 = vpop.permute.xlu2 %2440 }
 0x747   :  { %v5463_v9 = vpack.c.bf16 %v2289_v34, %v2289_v34  ;;  %v2450_v5 = vpop.permute.xlu0 %2449  ;;  %vm2487_vm1 = vcmp.eq.s32.totalorder %v2441_v60, 1 }
 0x748   :  { %vm2490_vm6 = vcmp.eq.s32.totalorder %v2450_v5, 1 }
 0x749   :  { %v2313_v27 = vunpack.c.l.b16 %v5463_v9 }
 0x74b   :  { %v2319_v29 = vpack.c.b16 %v2313_v27, %v2312_v6 }
 0x74d   :  { %v2234_v17 = vpop.trf.xlu1 }
 0x74e   :  { %v2290_v14 = vsel %vm2282_vm2, %v2234_v17, 0.0 }
 0x74f   :  { %v5459_v58 = vpack.c.bf16 %v2290_v14, %v2290_v14  ;;  %v2444_v63 = vpop.permute.xlu0 %2443 }
 0x750   :  { %vm2488_vm5 = vcmp.eq.s32.totalorder %v2444_v63, 1 }
 0x751   :  { %v2314_v28 = vunpack.c.l.b16 %v5459_v58 }
 0x755   :  { %v2235_v62 = vpop.trf.xlu1 }
 0x756   :  { %v2291_v44 = vsel %vm2283_vm12, %v2235_v62, 0.0  ;;  %vm2494_vm12 = vcmp.eq.s32.totalorder %v5509_v54, 1  ;;  %v3520_v54 = vmov 1.0|1.0  }
 0x757   :  { %v5455_v51 = vpack.c.bf16 %v2291_v44, %v2291_v44 }
 0x759   :  { %v2315_v33 = vunpack.c.l.b16 %v5455_v51 }
 0x75b   :  { %v2320_v41 = vpack.c.b16 %v2315_v33, %v2314_v28 }
 0x75d   :  { %v2236_v48 = vpop.trf.xlu1 }
 0x75e   :  { %v2292_v52 = vsel %vm2284_vm7, %v2236_v48, 0.0  ;;  %vm2493_vm7 = vcmp.eq.s32.totalorder %v5505_v42, 1 }
 0x75f   :  { %v5453_v21 = vpack.c.bf16 %v2292_v52, %v2292_v52 }
 0x761   :  { %v2316_v45 = vunpack.c.l.b16 %v5453_v21 }
 0x765   :  { %v2237_v16 = vpop.trf.xlu1 }
 0x766   :  { %v2293_v31 = vsel %vm2285_vm13, %v2237_v16, 0.0 }
 0x767   :  { %v5457_v56 = vpack.c.bf16 %v2293_v31, %v2293_v31 }
 0x769   :  { %v2317_v18 = vunpack.c.l.b16 %v5457_v56 }
 0x76b   :  { %v2321_v12 = vpack.c.b16 %v2317_v18, %v2316_v45 }
 0x76d   :  { %2330 = vmatpush.bf16.msra.mxu3 %v2321_v12 }
 0x771   :  { %2331 = vmatpush.bf16.msra.mxu3 %v2320_v41 }
 0x775   :  { %2332 = vmatpush.bf16.msra.mxu3 %v2319_v29  ;;  %v6052_v29 = vld [vmem:[#allocation74_spill] sm:$0xff] }
 0x779   :  { %2333 = vmatpush.bf16.msra.mxu3 %v2318_v24 }
 0x77c   :  { %3075 = vmatmul.msk.bf16.vlgmr.msra.gmra.mxu3 %vm207_vm4, %v6039_v7 }
 0x78c   :  { %3076 = vmatmul.msk.bf16.gmra.mxu3 %vm207_vm4, %v6040_v39 }
 0x79c   :  { %3077 = vmatmul.msk.bf16.gmra.mxu3 %vm207_vm4, %v6041_v1 }
 0x7ac   :  { %3078 = vmatmul.msk.bf16.gmra.mxu3 %vm207_vm4, %v6042_v57 }
 0x7bc   :  { %3079 = vmatmul.msk.bf16.gmra.mxu3 %vm207_vm4, %v6043_v10 }
 0x7cc   :  { %3080 = vmatmul.msk.bf16.gmra.mxu3 %vm207_vm4, %v6044_v26  ;;  %v6053_v26 = vld [vmem:[#allocation75_spill] sm:$0xff] }
 0x7dc   :  { %3081 = vmatmul.msk.bf16.gmra.mxu3 %vm207_vm4, %v6045_v19 }
 0x7ec   :  { %3082 = vmatmul.msk.bf16.gmra.mxu3 %vm207_vm4, %v6047_v49 }
 0x7ff   :  { %v2335_v55 = vpop.f32.mrf.mxu3 }
 0x800   :  { %v2375_v17 = vsub.f32 %v6048_v13, %v2335_v55  ;;  %v6054_v55 = vld [vmem:[#allocation76_spill] sm:$0xff] }
 0x802   :  { %v2391_v62 = vmul.f32 12.0, %v2375_v17 }
 0x804   :  { %v2503_v37 = vsel %vm2487_vm1, %v2391_v62, -100.0 }
 0x805   :  { %v2519_v52 = vmul.f32 1.442695, %v2503_v37 }
 0x807   :  { %v2337_v48 = vpop.f32.mrf.mxu3  ;;  %3381 = vpow2.f32 %v2519_v52 }
 0x808   :  { %v2376_v38 = vsub.f32 %v6049_v15, %v2337_v48 }
 0x80a   :  { %v2392_v44 = vmul.f32 12.0, %v2376_v38 }
 0x80c   :  { %v2504_v16 = vsel %vm2488_vm5, %v2392_v44, -100.0 }
 0x80d   :  { %v2521_v14 = vmul.f32 1.442695, %v2504_v16  ;;  %v5516_v18 = vpop.eup %3381 }
 0x80f   :  { %3383 = vpow2.f32 %v2521_v14  ;;  %v2340_v31 = vpop.f32.mrf.mxu3 }
 0x810   :  { %v2377_v34 = vsub.f32 %v6050_v35, %v2340_v31 }
 0x812   :  { %v2393_v45 = vmul.f32 12.0, %v2377_v34  ;;  %v6056_v34 = vld [vmem:[#allocation29_spill] sm:$0xff] }
 0x814   :  { %v2505_v33 = vsel %vm2489_vm8, %v2393_v45, -100.0  ;;  %v6057_v45 = vld [vmem:[#allocation36_spill] sm:$0xff] }
 0x815   :  { %v5518_v46 = vpop.eup %3383  ;;  %v2523_v25 = vmul.f32 1.442695, %v2505_v33  ;;  %vm6058_vm2 = vcmp.eq.s32.totalorder %v6056_v34, %v6057_v45  ;;  %v6059_v33 = vld [vmem:[#allocation48_spill] sm:$0xff] }
 0x816   :  { %v2551_v2 = vpack.c.bf16 %v5518_v46, %v5516_v18  ;;  %vm6060_vm13 = vcmp.eq.s32.totalorder %v6056_v34, %v6059_v33  ;;  %v6093_v45 = vld [vmem:[#allocation80_spill] sm:$0xff] }
 0x817   :  { %v2342_v12 = vpop.f32.mrf.mxu3  ;;  %3385 = vpow2.f32 %v2523_v25  ;;  %vm3127_vm0 = vmpackc.low %vm6060_vm13, %vm6058_vm2  ;;  %v6065_v25 = vld [vmem:[#allocation40_spill] sm:$0xff] }
 0x818   :  { %v2378_v28 = vsub.f32 %v6051_v50, %v2342_v12  ;;  %3128 = vmatpush.lsf.msk.bf16.msk.msrb.mxu1 %vm3127_vm0, %v3520_v54  ;;  %v6061_v12 = vld [vmem:[#allocation46_spill] sm:$0xff]  ;;  %v6063_v50 = vld [vmem:[#allocation45_spill] sm:$0xff]  ;;  %vm6066_vm15 = vcmp.eq.s32.totalorder %v6056_v34, %v6065_v25  ;;  %v6095_v25 = vld [vmem:[#allocation79_spill] sm:$0xff] }
 0x819   :  { %vm6062_vm3 = vcmp.eq.s32.totalorder %v6056_v34, %v6061_v12  ;;  %vm6064_vm10 = vcmp.eq.s32.totalorder %v6056_v34, %v6063_v50  ;;  %v6094_v12 = vld [vmem:[#allocation85_spill] sm:$0xff] }
 0x81a   :  { %v2394_v27 = vmul.f32 12.0, %v2378_v28  ;;  %vm3129_vm14 = vmpackc.low %vm6064_vm10, %vm6062_vm3 }
 0x81c   :  { %v2506_v41 = vsel %vm2490_vm6, %v2394_v27, -100.0  ;;  %3130 = vmatpush.lsf.msk.bf16.msk.msrb.mxu1 %vm3129_vm14, %v3520_v54  ;;  %v6067_v27 = vld [vmem:[#allocation33_spill] sm:$0xff] }
 0x81d   :  { %v2525_v6 = vmul.f32 1.442695, %v2506_v41  ;;  %v5524_v7 = vpop.eup %3385  ;;  %vm6068_vm1 = vcmp.eq.s32.totalorder %v6056_v34, %v6067_v27  ;;  %v6069_v41 = vld [vmem:[#allocation30_spill] sm:$0xff] }
 0x81e   :  { %vm3131_vm5 = vmpackc.low %vm6068_vm1, %vm6066_vm15  ;;  %vm6070_vm8 = vcmp.eq.s32.totalorder %v6056_v34, %v6069_v41 }
 0x81f   :  { %3387 = vpow2.f32 %v2525_v6  ;;  %v2345_v43 = vpop.f32.mrf.mxu3  ;;  %v6071_v6 = vld [vmem:[#allocation41_spill] sm:$0xff] }
 0x820   :  { %v2379_v47 = vsub.f32 %v6052_v29, %v2345_v43  ;;  %3132 = vmatpush.lsf.msk.bf16.msk.msrb.mxu1 %vm3131_vm5, %v3520_v54  ;;  %vm6072_vm6 = vcmp.eq.s32.totalorder %v6056_v34, %v6071_v6  ;;  %v6073_v29 = vld [vmem:[#allocation39_spill] sm:$0xff] }
 0x822   :  { %v2395_v24 = vmul.f32 12.0, %v2379_v47  ;;  %v6075_v47 = vld [vmem:[#allocation38_spill] sm:$0xff] }
 0x824   :  { %v2507_v57 = vsel %vm2491_vm11, %v2395_v24, -100.0  ;;  %vm3133_vm11 = vmpackc.low %vm6072_vm6, %vm6070_vm8  ;;  %v6077_v24 = vld [vmem:[#allocation27_spill] sm:$0xff]  ;;  %vm2501_vm8 = vcmp.eq.s32.totalorder %v5487_v30, 1  ;;  %vm2500_vm6 = vcmp.eq.s32.totalorder %v5491_v3, 1 }
 0x825   :  { %v5526_v39 = vpop.eup %3387  ;;  %v2527_v0 = vmul.f32 1.442695, %v2507_v57  ;;  %3134 = vmatpush.lsf.msk.bf16.msk.msrb.mxu1 %vm3133_vm11, %v3520_v54  ;;  %vm6078_vm2 = vcmp.eq.s32.totalorder %v6056_v34, %v6077_v24  ;;  %v6079_v57 = vld [vmem:[#allocation28_spill] sm:$0xff] }
 0x826   :  { %v2552_v1 = vpack.c.bf16 %v5526_v39, %v5524_v7  ;;  %vm6080_vm13 = vcmp.eq.s32.totalorder %v6056_v34, %v6079_v57  ;;  %v6103_v7 = vld [vmem:[#allocation61_spill] sm:$0xff]  ;;  %v6104_v39 = vld [vmem:[#allocation60_spill] sm:$0xff] }
 0x827   :  { %v2347_v10 = vpop.f32.mrf.mxu3  ;;  %3389 = vpow2.f32 %v2527_v0  ;;  %vm3137_vm0 = vmpackc.low %vm6080_vm13, %vm6078_vm2  ;;  %v6085_v0 = vld [vmem:[#allocation32_spill] sm:$0xff]  ;;  %vm2496_vm2 = vcmp.eq.s32.totalorder %v5503_v32, 1  ;;  %vm2495_vm13 = vcmp.eq.s32.totalorder %v5499_v22, 1 }
 0x828   :  { %v2380_v19 = vsub.f32 %v6053_v26, %v2347_v10  ;;  %v6081_v26 = vld [vmem:[#allocation31_spill] sm:$0xff]  ;;  %vm6086_vm15 = vcmp.eq.s32.totalorder %v6056_v34, %v6085_v0 }
 0x829   :  { %vm6082_vm3 = vcmp.eq.s32.totalorder %v6056_v34, %v6081_v26 }
 0x82a   :  { %v2396_v23 = vmul.f32 12.0, %v2380_v19  ;;  %v6083_v19 = vld [vmem:[#allocation34_spill] sm:$0xff] }
 0x82b   :  { %vm6084_vm10 = vcmp.eq.s32.totalorder %v6056_v34, %v6083_v19 }
 0x82c   :  { %v2508_v49 = vsel %vm2492_vm9, %v2396_v23, -100.0  ;;  %vm6074_vm9 = vcmp.eq.s32.totalorder %v6056_v34, %v6073_v29  ;;  %vm3139_vm14 = vmpackc.low %vm6084_vm10, %vm6082_vm3  ;;  %v6087_v23 = vld [vmem:[#allocation35_spill] sm:$0xff] }
 0x82d   :  { %v2529_v40 = vmul.f32 1.442695, %v2508_v49  ;;  %v5532_v60 = vpop.eup %3389  ;;  %vm6088_vm1 = vcmp.eq.s32.totalorder %v6056_v34, %v6087_v23 }
 0x82e   :  { %vm3141_vm5 = vmpackc.low %vm6088_vm1, %vm6086_vm15 }
 0x82f   :  { %3391 = vpow2.f32 %v2529_v40  ;;  %v2350_v5 = vpop.f32.mrf.mxu3 }
 0x830   :  { %v2381_v13 = vsub.f32 %v6054_v55, %v2350_v5  ;;  %v6089_v5 = vld [vmem:[#allocation84_spill] sm:$0xff] }
 0x832   :  { %v2397_v17 = vmul.f32 12.0, %v2381_v13  ;;  %v6090_v13 = vld [vmem:[#allocation83_spill] sm:$0xff] }
 0x834   :  { %v2509_v37 = vsel %vm2493_vm7, %v2397_v17, -100.0  ;;  %vm6076_vm7 = vcmp.eq.s32.totalorder %v6056_v34, %v6075_v47 }
 0x835   :  { %v5534_v20 = vpop.eup %3391  ;;  %v2531_v15 = vmul.f32 1.442695, %v2509_v37 }
 0x836   :  { %v2553_v62 = vpack.c.bf16 %v5534_v20, %v5532_v60  ;;  %v6101_v60 = vld [vmem:[#allocation63_spill] sm:$0xff]  ;;  %v6102_v20 = vld [vmem:[#allocation62_spill] sm:$0xff] }
 0x837   :  { %v2352_v48 = vpop.f32.mrf.mxu3  ;;  %3393 = vpow2.f32 %v2531_v15 }
 0x838   :  { %v2382_v63 = vsub.f32 %v6055_v61, %v2352_v48  ;;  %v6091_v48 = vld [vmem:[#allocation82_spill] sm:$0xff] }
 0x83a   :  { %v2398_v38 = vmul.f32 12.0, %v2382_v63  ;;  %v6092_v63 = vld [vmem:[#allocation81_spill] sm:$0xff] }
 0x83c   :  { %v2510_v52 = vsel %vm2494_vm12, %v2398_v38, -100.0  ;;  %vm3135_vm12 = vmpackc.low %vm6076_vm7, %vm6074_vm9  ;;  %vm2499_vm9 = vcmp.eq.s32.totalorder %v5489_v11, 1  ;;  %vm2498_vm7 = vcmp.eq.s32.totalorder %v5497_v53, 1 }
 0x83d   :  { %v2533_v44 = vmul.f32 1.442695, %v2510_v52  ;;  %v5541_v14 = vpop.eup %3393  ;;  %3136 = vmatpush.lsf.msk.bf16.msk.msrb.mxu1 %vm3135_vm12, %v3520_v54  ;;  %v2486_v52 = vpop.permute.xlu1 %2485  ;;  %vm2497_vm12 = vcmp.eq.s32.totalorder %v5495_v8, 1 }
 0x83e   :  { %vm2502_vm11 = vcmp.eq.s32.totalorder %v2486_v52, 1  ;;  %v6097_v52 = vld [vmem:[#allocation67_spill] sm:$0xff] }
 0x83f   :  { %3395 = vpow2.f32 %v2533_v44  ;;  %v2355_v16 = vpop.f32.mrf.mxu3 }
 0x841   :  { %3138 = vmatpush.lsf.msk.bf16.msk.msrb.mxu1 %vm3137_vm0, %v3520_v54  ;;  %vm6105_vm0 = vcmask 261120  }
 0x842   :  { %vm6106_vm3 = vmmov %vm6105_vm0 }
 0x843   :  { %vm6107_vm10 = vmmov %vm6105_vm0 }
 0x844   :  { %vm6109_vm15 = vmmov %vm6105_vm0 }
 0x845   :  { %v5543_v31 = vpop.eup %3395  ;;  %3140 = vmatpush.lsf.msk.bf16.msk.msrb.mxu1 %vm3139_vm14, %v3520_v54  ;;  %vm6108_vm14 = vmmov %vm6105_vm0 }
 0x846   :  { %v2554_v42 = vpack.c.bf16 %v5543_v31, %v5541_v14  ;;  %v6100_v14 = vld [vmem:[#allocation64_spill] sm:$0xff]  ;;  %vm6110_vm1 = vmmov %vm6105_vm0 }
 0x847   :  { %v2357_v35 = vpop.f32.mrf.mxu3 }
 0x848   :  { %v2384_v27 = vsub.f32 %v6095_v25, %v2357_v35 }
 0x849   :  { %3142 = vmatpush.lsf.msk.bf16.msk.msrb.mxu1 %vm3141_vm5, %v3520_v54  ;;  %vm6111_vm5 = vmmov %vm6105_vm0 }
 0x84a   :  { %v2400_v19 = vmul.f32 12.0, %v2384_v27  ;;  %v2629_v27 = vunpack.c.l.bf16 %v5469_v4  ;;  %v2631_v4 = vunpack.c.l.bf16 %v5463_v9  ;;  %v2633_v9 = vunpack.c.l.bf16 %v5455_v51 }
 0x84b   :  { %3118 = vllmr.8.mxu1 }
 0x84f   :  { %v2360_v28 = vpop.f32.mrf.mxu3 }
 0x850   :  { %v2385_v33 = vsub.f32 %v6093_v45, %v2360_v28 }
 0x852   :  { %v2401_v24 = vmul.f32 12.0, %v2385_v33 }
 0x854   :  { %v2513_v23 = vsel %vm2497_vm12, %v2401_v24, -100.0 }
 0x857   :  { %v2362_v43 = vpop.f32.mrf.mxu3 }
 0x858   :  { %v2386_v15 = vsub.f32 %v6092_v63, %v2362_v43  ;;  %v6096_v43 = vld [vmem:[#allocation78_spill] sm:$0xff] }
 0x859   :  { %v2383_v47 = vsub.f32 %v6096_v43, %v2355_v16  ;;  %v2512_v16 = vsel %vm2496_vm2, %v2400_v19, -100.0 }
 0x85a   :  { %v2402_v41 = vmul.f32 12.0, %v2386_v15 }
 0x85b   :  { %v2399_v0 = vmul.f32 12.0, %v2383_v47 }
 0x85c   :  { %v2514_v3 = vsel %vm2498_vm7, %v2402_v41, -100.0 }
 0x85d   :  { %v2541_v11 = vmul.f32 1.442695, %v2514_v3 }
 0x85f   :  { %v2365_v10 = vpop.f32.mrf.mxu3 }
 0x860   :  { %v2387_v61 = vsub.f32 %v6091_v48, %v2365_v10 }
 0x862   :  { %v2403_v54 = vmul.f32 12.0, %v2387_v61 }
 0x864   :  { %v2515_v57 = vsel %vm2499_vm9, %v2403_v54, -100.0 }
 0x865   :  { %v2543_v35 = vmul.f32 1.442695, %v2515_v57 }
 0x867   :  { %v2367_v49 = vpop.f32.mrf.mxu3 }
 0x868   :  { %v2388_v17 = vsub.f32 %v6090_v13, %v2367_v49  ;;  %v2539_v49 = vmul.f32 1.442695, %v2513_v23 }
 0x86a   :  { %v2404_v38 = vmul.f32 12.0, %v2388_v17 }
 0x86c   :  { %v2516_v6 = vsel %vm2500_vm6, %v2404_v38, -100.0 }
 0x86d   :  { %v2545_v28 = vmul.f32 1.442695, %v2516_v6 }
 0x86f   :  { %v2370_v40 = vpop.f32.mrf.mxu3 }
 0x870   :  { %v2389_v55 = vsub.f32 %v6089_v5, %v2370_v40  ;;  %v2511_v40 = vsel %vm2495_vm13, %v2399_v0, -100.0 }
 0x871   :  { %v2535_v17 = vmul.f32 1.442695, %v2511_v40 }
 0x872   :  { %v2405_v37 = vmul.f32 12.0, %v2389_v55  ;;  %v2537_v55 = vmul.f32 1.442695, %v2512_v16 }
 0x874   :  { %v2517_v44 = vsel %vm2501_vm8, %v2405_v37, -100.0  ;;  %vm6112_vm8 = vmmov %vm6105_vm0 }
 0x875   :  { %v2547_v29 = vmul.f32 1.442695, %v2517_v44  ;;  %v6098_v44 = vld [vmem:[#allocation66_spill] sm:$0xff] }
 0x877   :  { %v2372_v34 = vpop.f32.mrf.mxu3  ;;  %3397 = vpow2.f32 %v2547_v29 }
 0x878   :  { %v2390_v50 = vsub.f32 %v6094_v12, %v2372_v34  ;;  %v6099_v34 = vld [vmem:[#allocation65_spill] sm:$0xff] }
 0x87a   :  { %v2406_v30 = vmul.f32 12.0, %v2390_v50 }
 0x87c   :  { %v2518_v10 = vsel %vm2502_vm11, %v2406_v30, -100.0 }
 0x87d   :  { %v2549_v26 = vmul.f32 1.442695, %v2518_v10  ;;  %v3398_v53 = vpop.eup %3397 }
 0x87f   :  { %3399 = vpow2.f32 %v2549_v26 }
 0x880   :  { %3401 = vpow2.f32 %v2545_v28 }
 0x881   :  { %3403 = vpow2.f32 %v2543_v35 }
 0x882   :  { %3405 = vpow2.f32 %v2541_v11 }
 0x883   :  { %3407 = vpow2.f32 %v2539_v49 }
 0x884   :  { %3409 = vpow2.f32 %v2537_v55 }
 0x885   :  { %v3400_v5 = vpop.eup %3399  ;;  %3411 = vpow2.f32 %v2535_v17 }
 0x886   :  { %v2558_v13 = vpack.c.bf16 %v3400_v5, %v3398_v53  ;;  %v3402_v8 = vpop.eup %3401 }
 0x887   :  { %v3404_v37 = vpop.eup %3403 }
 0x888   :  { %2575 = vmatpush.bf16.msra.mxu1 %v2558_v13  ;;  %v2557_v32 = vpack.c.bf16 %v3402_v8, %v3404_v37  ;;  %v3406_v48 = vpop.eup %3405 }
 0x889   :  { %v3408_v61 = vpop.eup %3407 }
 0x88a   :  { %v2556_v22 = vpack.c.bf16 %v3406_v48, %v3408_v61  ;;  %v3410_v63 = vpop.eup %3409 }
 0x88b   :  { %v3412_v15 = vpop.eup %3411 }
 0x88c   :  { %2576 = vmatpush.bf16.msra.mxu1 %v2557_v32  ;;  %v2555_v38 = vpack.c.bf16 %v3410_v63, %v3412_v15 }
 0x890   :  { %2577 = vmatpush.bf16.msra.mxu1 %v2556_v22 }
 0x894   :  { %2578 = vmatpush.bf16.msra.mxu1 %v2555_v38 }
 0x898   :  { %2579 = vmatpush.bf16.msra.mxu1 %v2554_v42  ;;  %v2628_v42 = vunpack.c.l.bf16 %v5472_v36  ;;  %v2630_v36 = vunpack.c.l.bf16 %v5466_v59  ;;  %v2632_v59 = vunpack.c.l.bf16 %v5459_v58  ;;  %v2634_v58 = vunpack.c.l.bf16 %v5453_v21 }
 0x89c   :  { %2580 = vmatpush.bf16.msra.mxu1 %v2553_v62 }
 0x8a0   :  { %2581 = vmatpush.bf16.msra.mxu1 %v2552_v1 }
 0x8a4   :  { %2582 = vmatpush.bf16.msra.mxu1 %v2551_v2 }
 0x8a7   :  { %3119 = vmatmul.lmr.bf16.vlgmr.msra.gmra.8.mxu1 }
 0x8a8   :  { %2952 = vmatpush.msra.mxu1 %v6097_v52  ;;  %v2635_v52 = vunpack.c.l.bf16 %v5457_v56 }
 0x8aa   :  { %2953 = vmatpush.msra.mxu1 %v6098_v44 }
 0x8ac   :  { %2954 = vmatpush.msra.mxu1 %v6099_v34  ;;  %v2685_v34 = vpop.f32.mrf.mxu2 }
 0x8ae   :  { %2955 = vmatpush.msra.mxu1 %v6100_v14 }
 0x8af   :  { %3120 = vmatmul.lmr.bf16.gmra.8.mxu1 }
 0x8b0   :  { %2956 = vmatpush.msra.mxu1 %v6101_v60  ;;  %v6113_v60 = vld [vmem:[#allocation68_spill] sm:$0xff] }
 0x8b2   :  { %2957 = vmatpush.msra.mxu1 %v6102_v20  ;;  %v5647_v20 = vperm.slane %v6113_v60, 0 }
 0x8b4   :  { %2958 = vmatpush.msra.mxu1 %v6103_v7  ;;  %v2688_v14 = vpop.f32.mrf.mxu2 }
 0x8b6   :  { %2959 = vmatpush.msra.mxu1 %v6104_v39 }
 0x8b7   :  { %3121 = vmatmul.lmr.bf16.gmra.8.mxu1 }
 0x8bf   :  { %3122 = vmatmul.lmr.bf16.gmra.8.mxu1 }
 0x8c7   :  { %3123 = vmatmul.lmr.bf16.gmra.8.mxu1 }
 0x8cf   :  { %3124 = vmatmul.lmr.bf16.gmra.8.mxu1 }
 0x8d7   :  { %3125 = vmatmul.lmr.bf16.gmra.8.mxu1 }
 0x8df   :  { %3126 = vmatmul.lmr.bf16.gmra.8.mxu1 }
 0x924   :  { %v2584_v18 = vpop.f32.mrf.mxu1 }
 0x925   :  { %v2585_v46 = vadd.f32 1e-16, %v2584_v18  ;;  %v2691_v18 = vpop.f32.mrf.mxu2 }
 0x927   :  { %3413 = vlog2.f32 %v2585_v46 }
 0x92c   :  { %v2586_v2 = vpop.f32.mrf.mxu1 }
 0x92d   :  { %v3414_v1 = vpop.eup %3413  ;;  %v2587_v62 = vadd.f32 1e-16, %v2586_v2 }
 0x92e   :  { %v2605_v31 = vmul.f32 0.6931472, %v3414_v1 }
 0x92f   :  { %3415 = vlog2.f32 %v2587_v62 }
 0x930   :  { %v2620_v45 = vmul.f32 0.083333336, %v2605_v31 }
 0x932   :  { %v2636_v33 = vadd.f32 %v2628_v42, %v2620_v45  ;;  %v2694_v45 = vpop.f32.mrf.mxu2 }
 0x934   :  { %v2589_v54 = vpop.f32.mrf.mxu1  ;;  %3091 = vmatmul.msk.f32.vlgmr.msrb.gmra.mxu0 %vm6105_vm0, %v2636_v33 }
 0x935   :  { %v3416_v12 = vpop.eup %3415  ;;  %v2590_v50 = vadd.f32 1e-16, %v2589_v54 }
 0x936   :  { %v2607_v25 = vmul.f32 0.6931472, %v3416_v12 }
 0x937   :  { %3417 = vlog2.f32 %v2590_v50 }
 0x938   :  { %v2621_v41 = vmul.f32 0.083333336, %v2607_v25 }
 0x93a   :  { %v2637_v6 = vadd.f32 %v2629_v27, %v2621_v41 }
 0x93c   :  { %v2591_v29 = vpop.f32.mrf.mxu1  ;;  %3092 = vmatmul.msk.f32.gmra.mxu0 %vm6106_vm3, %v2637_v6  ;;  %vm6115_vm3 = vmmov %vm6110_vm1 }
 0x93d   :  { %v3418_v30 = vpop.eup %3417  ;;  %v2592_v43 = vadd.f32 1e-16, %v2591_v29 }
 0x93e   :  { %v2609_v47 = vmul.f32 0.6931472, %v3418_v30 }
 0x93f   :  { %3419 = vlog2.f32 %v2592_v43 }
 0x940   :  { %v2622_v24 = vmul.f32 0.083333336, %v2609_v47 }
 0x942   :  { %v2638_v57 = vadd.f32 %v2630_v36, %v2622_v24  ;;  %v2697_v24 = vpop.f32.mrf.mxu2 }
 0x944   :  { %v2594_v10 = vpop.f32.mrf.mxu1  ;;  %3093 = vmatmul.msk.f32.gmra.mxu0 %vm6107_vm10, %v2638_v57  ;;  %vm6116_vm10 = vmmov %vm6110_vm1 }
 0x945   :  { %v3420_v28 = vpop.eup %3419  ;;  %v2595_v26 = vadd.f32 1e-16, %v2594_v10 }
 0x946   :  { %v2611_v19 = vmul.f32 0.6931472, %v3420_v28 }
 0x947   :  { %3421 = vlog2.f32 %v2595_v26 }
 0x948   :  { %v2623_v3 = vmul.f32 0.083333336, %v2611_v19 }
 0x94a   :  { %v2639_v35 = vadd.f32 %v2631_v4, %v2623_v3 }
 0x94c   :  { %v2596_v0 = vpop.f32.mrf.mxu1  ;;  %3094 = vmatmul.msk.f32.gmra.mxu0 %vm6108_vm14, %v2639_v35  ;;  %vm6117_vm14 = vmmov %vm6110_vm1 }
 0x94d   :  { %v3422_v23 = vpop.eup %3421  ;;  %v2597_v11 = vadd.f32 1e-16, %v2596_v0 }
 0x94e   :  { %v2613_v16 = vmul.f32 0.6931472, %v3422_v23 }
 0x94f   :  { %3423 = vlog2.f32 %v2597_v11 }
 0x950   :  { %v2624_v49 = vmul.f32 0.083333336, %v2613_v16 }
 0x952   :  { %v2640_v53 = vadd.f32 %v2632_v59, %v2624_v49 }
 0x954   :  { %v2599_v40 = vpop.f32.mrf.mxu1  ;;  %3095 = vmatmul.msk.f32.gmra.mxu0 %vm6109_vm15, %v2640_v53  ;;  %vm6119_vm15 = vmmov %vm6110_vm1 }
 0x955   :  { %v3424_v5 = vpop.eup %3423  ;;  %v2600_v55 = vadd.f32 1e-16, %v2599_v40 }
 0x956   :  { %v2615_v13 = vmul.f32 0.6931472, %v3424_v5 }
 0x957   :  { %3425 = vlog2.f32 %v2600_v55 }
 0x958   :  { %v2625_v8 = vmul.f32 0.083333336, %v2615_v13 }
 0x95a   :  { %v2641_v17 = vadd.f32 %v2633_v9, %v2625_v8 }
 0x95c   :  { %v2601_v37 = vpop.f32.mrf.mxu1  ;;  %3096 = vmatmul.msk.f32.gmra.mxu0 %vm6110_vm1, %v2641_v17  ;;  %v2700_v17 = vpop.f32.mrf.mxu2 }
 0x95d   :  { %v3426_v32 = vpop.eup %3425  ;;  %v2602_v48 = vadd.f32 1e-16, %v2601_v37 }
 0x95e   :  { %v2617_v61 = vmul.f32 0.6931472, %v3426_v32 }
 0x95f   :  { %3427 = vlog2.f32 %v2602_v48 }
 0x960   :  { %v2626_v22 = vmul.f32 0.083333336, %v2617_v61 }
 0x962   :  { %v2642_v63 = vadd.f32 %v2634_v58, %v2626_v22 }
 0x964   :  { %3097 = vmatmul.msk.f32.gmra.mxu0 %vm6111_vm5, %v2642_v63  ;;  %vm6120_vm5 = vmmov %vm6110_vm1 }
 0x965   :  { %v3428_v15 = vpop.eup %3427 }
 0x966   :  { %v2619_v38 = vmul.f32 0.6931472, %v3428_v15 }
 0x968   :  { %v2627_v51 = vmul.f32 0.083333336, %v2619_v38 }
 0x96a   :  { %v2643_v44 = vadd.f32 %v2635_v52, %v2627_v51 }
 0x96c   :  { %3098 = vmatmul.msk.f32.gmra.mxu0 %vm6112_vm8, %v2643_v44  ;;  %vm6121_vm8 = vmmov %vm6110_vm1 }
 0x9b1   :  { %v2750_v7 = vpop.f32.mrf.mxu0 }
 0x9b2   :  { %v2751_v39 = vadd.f32 %v2750_v7, %v2685_v34 }
 0x9b4   :  { %v5650_v21 = vadd.f32 %v5647_v20, %v2751_v39 }
 0x9b6   :  { %v2791_v46 = vand.u32 2147483647, %v5650_v21  ;;  %v2783_v23 = vmax.f32 %v5650_v21, 0.0 }
 0x9b8   :  { %v2799_v2 = vsub.f32 0.0, %v2791_v46 }
 0x9b9   :  { %v2753_v1 = vpop.f32.mrf.mxu0 }
 0x9ba   :  { %v2807_v56 = vmul.f32 1.442695, %v2799_v2  ;;  %v2754_v62 = vadd.f32 %v2753_v1, %v2688_v14 }
 0x9bc   :  { %3429 = vpow2.f32 %v2807_v56  ;;  %v5654_v31 = vadd.f32 %v5647_v20, %v2754_v62 }
 0x9be   :  { %v2792_v42 = vand.u32 2147483647, %v5654_v31  ;;  %v2784_v22 = vmax.f32 %v5654_v31, 0.0 }
 0x9c0   :  { %v2800_v33 = vsub.f32 0.0, %v2792_v42 }
 0x9c1   :  { %v2756_v54 = vpop.f32.mrf.mxu0 }
 0x9c2   :  { %v3430_v12 = vpop.eup %3429  ;;  %v2809_v50 = vmul.f32 1.442695, %v2800_v33  ;;  %v2757_v25 = vadd.f32 %v2756_v54, %v2691_v18 }
 0x9c3   :  { %v2823_v27 = vadd.f32 1.0, %v3430_v12  ;;  %v2826_v41 = vmul.f32 -0.5, %v3430_v12  ;;  %v2829_v47 = vand.u32 2147483647, %v3430_v12 }
 0x9c4   :  { %3431 = vpow2.f32 %v2809_v50  ;;  %v5658_v6 = vadd.f32 %v5647_v20, %v2757_v25 }
 0x9c5   :  { %3433 = vlog2.f32 %v2823_v27  ;;  %v2827_v30 = vadd.f32 1.0, %v2826_v41  ;;  %vm2830_vm6 = vcmp.lt.f32.partialorder %v2829_v47, 0.0004427343 }
 0x9c6   :  { %v2793_v29 = vand.u32 2147483647, %v5658_v6 }
 0x9c7   :  { %v2828_v19 = vmul.f32 %v3430_v12, %v2827_v30 }
 0x9c8   :  { %v2801_v43 = vsub.f32 0.0, %v2793_v29 }
 0x9c9   :  { %v2759_v36 = vpop.f32.mrf.mxu0 }
 0x9ca   :  { %v3432_v57 = vpop.eup %3431  ;;  %v2811_v10 = vmul.f32 1.442695, %v2801_v43  ;;  %v2760_v28 = vadd.f32 %v2759_v36, %v2694_v45  ;;  %v2703_v45 = vpop.f32.mrf.mxu2 }
 0x9cb   :  { %v3434_v26 = vpop.eup %3433  ;;  %v2832_v4 = vadd.f32 1.0, %v3432_v57  ;;  %v2835_v0 = vmul.f32 -0.5, %v3432_v57  ;;  %v2838_v5 = vand.u32 2147483647, %v3432_v57 }
 0x9cc   :  { %v2825_v3 = vmul.f32 0.6931472, %v3434_v26  ;;  %3435 = vpow2.f32 %v2811_v10  ;;  %v5662_v35 = vadd.f32 %v5647_v20, %v2760_v28 }
 0x9cd   :  { %3437 = vlog2.f32 %v2832_v4  ;;  %v2836_v53 = vadd.f32 1.0, %v2835_v0  ;;  %vm2839_vm11 = vcmp.lt.f32.partialorder %v2838_v5, 0.0004427343 }
 0x9ce   :  { %v2831_v11 = vsel %vm2830_vm6, %v2828_v19, %v2825_v3  ;;  %v2794_v16 = vand.u32 2147483647, %v5662_v35 }
 0x9cf   :  { %v2895_v59 = vadd.f32 %v2831_v11, %v2783_v23  ;;  %v2837_v58 = vmul.f32 %v3432_v57, %v2836_v53 }
 0x9d0   :  { %v2802_v49 = vsub.f32 0.0, %v2794_v16 }
 0x9d1   :  { %3439 = vtanh.f32 %v2895_v59  ;;  %v2762_v40 = vpop.f32.mrf.mxu0 }
 0x9d2   :  { %v3436_v55 = vpop.eup %3435  ;;  %v2813_v13 = vmul.f32 1.442695, %v2802_v49  ;;  %v2763_v9 = vadd.f32 %v2762_v40, %v2697_v24  ;;  %v2706_v23 = vpop.f32.mrf.mxu2 }
 0x9d3   :  { %v3438_v8 = vpop.eup %3437  ;;  %v2841_v37 = vadd.f32 1.0, %v3436_v55  ;;  %v2844_v32 = vmul.f32 -0.5, %v3436_v55  ;;  %v2847_v60 = vand.u32 2147483647, %v3436_v55 }
 0x9d4   :  { %3441 = vpow2.f32 %v2813_v13  ;;  %v5667_v48 = vadd.f32 %v5647_v20, %v2763_v9  ;;  %v2834_v61 = vmul.f32 0.6931472, %v3438_v8 }
 0x9d5   :  { %3443 = vlog2.f32 %v2841_v37  ;;  %v2845_v51 = vadd.f32 1.0, %v2844_v32  ;;  %vm2848_vm9 = vcmp.lt.f32.partialorder %v2847_v60, 0.0004427343 }
 0x9d6   :  { %v2795_v63 = vand.u32 2147483647, %v5667_v48  ;;  %v2840_v15 = vsel %vm2839_vm11, %v2837_v58, %v2834_v61  ;;  %v2787_v58 = vmax.f32 %v5667_v48, 0.0 }
 0x9d7   :  { %v3440_v38 = vpop.eup %3439  ;;  %v2896_v52 = vadd.f32 %v2840_v15, %v2784_v22  ;;  %v2846_v2 = vmul.f32 %v3436_v55, %v2845_v51 }
 0x9d8   :  { %v2911_v44 = vmul.f32 %v3440_v38, %v5650_v21  ;;  %v2803_v34 = vsub.f32 0.0, %v2795_v63  ;;  %v2785_v21 = vmax.f32 %v5658_v6, 0.0 }
 0x9d9   :  { %v2765_v14 = vpop.f32.mrf.mxu0  ;;  %3445 = vtanh.f32 %v2896_v52 }
 0x9da   :  { %v3442_v7 = vpop.eup %3441  ;;  %v2815_v39 = vmul.f32 1.442695, %v2803_v34  ;;  %v2766_v18 = vadd.f32 %v2765_v14, %v2700_v17  ;;  %3099 = vmatmul.msk.f32.vlgmr.msra.gmra.mxu1 %vm207_vm4, %v2911_v44 }
 0x9db   :  { %v3444_v46 = vpop.eup %3443  ;;  %v2850_v1 = vadd.f32 1.0, %v3442_v7  ;;  %v2853_v42 = vmul.f32 -0.5, %v3442_v7  ;;  %v2856_v30 = vand.u32 2147483647, %v3442_v7 }
 0x9dc   :  { %3447 = vpow2.f32 %v2815_v39  ;;  %v5674_v56 = vadd.f32 %v5647_v20, %v2766_v18  ;;  %v2843_v62 = vmul.f32 0.6931472, %v3444_v46 }
 0x9dd   :  { %3449 = vlog2.f32 %v2850_v1  ;;  %v2854_v41 = vadd.f32 1.0, %v2853_v42  ;;  %vm2857_vm7 = vcmp.lt.f32.partialorder %v2856_v30, 0.0004427343 }
 0x9de   :  { %v2796_v33 = vand.u32 2147483647, %v5674_v56  ;;  %v2849_v54 = vsel %vm2848_vm9, %v2846_v2, %v2843_v62  ;;  %v2788_v46 = vmax.f32 %v5674_v56, 0.0 }
 0x9df   :  { %v3446_v12 = vpop.eup %3445  ;;  %v2897_v50 = vadd.f32 %v2849_v54, %v2785_v21  ;;  %v2855_v19 = vmul.f32 %v3442_v7, %v2854_v41 }
 0x9e0   :  { %v2804_v25 = vsub.f32 0.0, %v2796_v33  ;;  %v2912_v27 = vmul.f32 %v3446_v12, %v5654_v31  ;;  %v2786_v31 = vmax.f32 %v5662_v35, 0.0 }
 0x9e1   :  { %v2768_v29 = vpop.f32.mrf.mxu0  ;;  %3451 = vtanh.f32 %v2897_v50 }
 0x9e2   :  { %v3448_v43 = vpop.eup %3447  ;;  %v2817_v47 = vmul.f32 1.442695, %v2804_v25  ;;  %v2769_v36 = vadd.f32 %v2768_v29, %v2703_v45  ;;  %3100 = vmatmul.msk.f32.gmra.mxu1 %vm207_vm4, %v2912_v27 }
 0x9e3   :  { %v3450_v24 = vpop.eup %3449  ;;  %v2859_v57 = vadd.f32 1.0, %v3448_v43  ;;  %v2862_v10 = vmul.f32 -0.5, %v3448_v43  ;;  %v2865_v40 = vand.u32 2147483647, %v3448_v43 }
 0x9e4   :  { %3453 = vpow2.f32 %v2817_v47  ;;  %v5681_v28 = vadd.f32 %v5647_v20, %v2769_v36  ;;  %v2852_v26 = vmul.f32 0.6931472, %v3450_v24 }
 0x9e5   :  { %3455 = vlog2.f32 %v2859_v57  ;;  %v2863_v16 = vadd.f32 1.0, %v2862_v10  ;;  %vm2866_vm12 = vcmp.lt.f32.partialorder %v2865_v40, 0.0004427343 }
 0x9e6   :  { %v2797_v4 = vand.u32 2147483647, %v5681_v28  ;;  %v2858_v3 = vsel %vm2857_vm7, %v2855_v19, %v2852_v26  ;;  %v2789_v27 = vmax.f32 %v5681_v28, 0.0 }
 0x9e7   :  { %v3452_v0 = vpop.eup %3451  ;;  %v2898_v11 = vadd.f32 %v2858_v3, %v2786_v31  ;;  %v2864_v8 = vmul.f32 %v3448_v43, %v2863_v16 }
 0x9e8   :  { %v2805_v59 = vsub.f32 0.0, %v2797_v4  ;;  %v2913_v49 = vmul.f32 %v3452_v0, %v5658_v6  ;;  %v6114_v0 = vld [vmem:[#allocation69_spill] sm:$0xff] }
 0x9e9   :  { %v2771_v53 = vpop.f32.mrf.mxu0  ;;  %3457 = vtanh.f32 %v2898_v11 }
 0x9ea   :  { %v3454_v5 = vpop.eup %3453  ;;  %v2819_v55 = vmul.f32 1.442695, %v2805_v59  ;;  %v2772_v13 = vadd.f32 %v2771_v53, %v2706_v23  ;;  %3101 = vmatmul.msk.f32.gmra.mxu1 %vm207_vm4, %v2913_v49  ;;  %v2919_v23 = vperm.slane %v6114_v0, 0 }
 0x9eb   :  { %v3456_v9 = vpop.eup %3455  ;;  %v2868_v17 = vadd.f32 1.0, %v3454_v5  ;;  %v2871_v61 = vmul.f32 -0.5, %v3454_v5  ;;  %v2874_v44 = vand.u32 2147483647, %v3454_v5 }
 0x9ec   :  { %3459 = vpow2.f32 %v2819_v55  ;;  %v5688_v37 = vadd.f32 %v5647_v20, %v2772_v13  ;;  %v2861_v32 = vmul.f32 0.6931472, %v3456_v9 }
 0x9ed   :  { %3461 = vlog2.f32 %v2868_v17  ;;  %v2872_v51 = vadd.f32 1.0, %v2871_v61  ;;  %vm2875_vm2 = vcmp.lt.f32.partialorder %v2874_v44, 0.0004427343 }
 0x9ee   :  { %v2798_v6 = vand.u32 2147483647, %v5688_v37  ;;  %v2867_v22 = vsel %vm2866_vm12, %v2864_v8, %v2861_v32  ;;  %v2790_v10 = vmax.f32 %v5688_v37, 0.0 }
 0x9ef   :  { %v3458_v63 = vpop.eup %3457  ;;  %v2899_v15 = vadd.f32 %v2867_v22, %v2787_v58  ;;  %v2873_v39 = vmul.f32 %v3454_v5, %v2872_v51 }
 0x9f0   :  { %v2806_v38 = vsub.f32 0.0, %v2798_v6  ;;  %v2914_v52 = vmul.f32 %v3458_v63, %v5662_v35 }
 0x9f1   :  { %3463 = vtanh.f32 %v2899_v15 }
 0x9f2   :  { %v3460_v34 = vpop.eup %3459  ;;  %v2821_v20 = vmul.f32 1.442695, %v2806_v38  ;;  %3102 = vmatmul.msk.f32.gmra.mxu1 %vm207_vm4, %v2914_v52 }
 0x9f3   :  { %v3462_v14 = vpop.eup %3461  ;;  %v2877_v60 = vadd.f32 1.0, %v3460_v34  ;;  %v2880_v18 = vmul.f32 -0.5, %v3460_v34  ;;  %v2883_v21 = vand.u32 2147483647, %v3460_v34 }
 0x9f4   :  { %3465 = vpow2.f32 %v2821_v20  ;;  %v2870_v7 = vmul.f32 0.6931472, %v3462_v14 }
 0x9f5   :  { %3467 = vlog2.f32 %v2877_v60  ;;  %v2881_v42 = vadd.f32 1.0, %v2880_v18  ;;  %vm2884_vm13 = vcmp.lt.f32.partialorder %v2883_v21, 0.0004427343 }
 0x9f6   :  { %v2876_v2 = vsel %vm2875_vm2, %v2873_v39, %v2870_v7 }
 0x9f7   :  { %v3464_v1 = vpop.eup %3463  ;;  %v2900_v35 = vadd.f32 %v2876_v2, %v2788_v46  ;;  %v2882_v50 = vmul.f32 %v3460_v34, %v2881_v42 }
 0x9f8   :  { %v2915_v62 = vmul.f32 %v3464_v1, %v5667_v48 }
 0x9f9   :  { %3469 = vtanh.f32 %v2900_v35 }
 0x9fa   :  { %v3466_v45 = vpop.eup %3465  ;;  %3103 = vmatmul.msk.f32.gmra.mxu1 %vm207_vm4, %v2915_v62 }
 0x9fb   :  { %v3468_v33 = vpop.eup %3467  ;;  %v2886_v54 = vadd.f32 1.0, %v3466_v45  ;;  %v2889_v25 = vmul.f32 -0.5, %v3466_v45  ;;  %v2892_v47 = vand.u32 2147483647, %v3466_v45 }
 0x9fc   :  { %v2879_v12 = vmul.f32 0.6931472, %v3468_v33 }
 0x9fd   :  { %3471 = vlog2.f32 %v2886_v54  ;;  %v2890_v43 = vadd.f32 1.0, %v2889_v25  ;;  %vm2893_vm0 = vcmp.lt.f32.partialorder %v2892_v47, 0.0004427343 }
 0x9fe   :  { %v2885_v41 = vsel %vm2884_vm13, %v2882_v50, %v2879_v12 }
 0x9ff   :  { %v3470_v29 = vpop.eup %3469  ;;  %v2901_v30 = vadd.f32 %v2885_v41, %v2789_v27  ;;  %v2891_v57 = vmul.f32 %v3466_v45, %v2890_v43 }
 0xa00   :  { %v2916_v48 = vmul.f32 %v3470_v29, %v5674_v56 }
 0xa01   :  { %3473 = vtanh.f32 %v2901_v30 }
 0xa02   :  { %3104 = vmatmul.msk.f32.gmra.mxu1 %vm207_vm4, %v2916_v48 }
 0xa03   :  { %v3472_v36 = vpop.eup %3471 }
 0xa04   :  { %v2888_v24 = vmul.f32 0.6931472, %v3472_v36 }
 0xa06   :  { %v2894_v26 = vsel %vm2893_vm0, %v2891_v57, %v2888_v24 }
 0xa07   :  { %v3474_v19 = vpop.eup %3473  ;;  %v2902_v31 = vadd.f32 %v2894_v26, %v2790_v10 }
 0xa08   :  { %v2917_v4 = vmul.f32 %v3474_v19, %v5681_v28 }
 0xa09   :  { %3475 = vtanh.f32 %v2902_v31 }
 0xa0a   :  { %3105 = vmatmul.msk.f32.gmra.mxu1 %vm207_vm4, %v2917_v4 }
 0xa0f   :  { %v3476_v56 = vpop.eup %3475 }
 0xa10   :  { %v2918_v3 = vmul.f32 %v3476_v56, %v5688_v37 }
 0xa12   :  { %3106 = vmatmul.msk.f32.gmra.mxu1 %vm207_vm4, %v2918_v3  ;;  %vm6118_vm4 = vmmov %vm6110_vm1 }
 0xa57   :  { %v2961_v11 = vpop.f32.mrf.mxu1 }
 0xa58   :  { %v2962_v16 = vadd.f32 %v2961_v11, %v2919_v23 }
 0xa5a   :  { %2985 = vst.msk [vmem:[%s5740_s4] sm:$0xff] %vm6115_vm3, %v2962_v16 }
 0xa5f   :  { %v2964_v59 = vpop.f32.mrf.mxu1 }
 0xa60   :  { %v2965_v49 = vadd.f32 %v2964_v59, %v2919_v23 }
 0xa62   :  { %2986 = vst.msk [vmem:[%s5740_s4 + $0x8] sm:$0xff] %vm6116_vm10, %v2965_v49 }
 0xa67   :  { %v2967_v28 = vpop.f32.mrf.mxu1 }
 0xa68   :  { %v2968_v53 = vadd.f32 %v2967_v28, %v2919_v23 }
 0xa6a   :  { %2987 = vst.msk [vmem:[%s5740_s4 + $0x10] sm:$0xff] %vm6117_vm14, %v2968_v53 }
 0xa6f   :  { %v2970_v40 = vpop.f32.mrf.mxu1 }
 0xa70   :  { %v2971_v5 = vadd.f32 %v2970_v40, %v2919_v23 }
 0xa72   :  { %2988 = vst.msk [vmem:[%s5740_s4 + $0x18] sm:$0xff] %vm6118_vm4, %v2971_v5 }
 0xa77   :  { %v2973_v55 = vpop.f32.mrf.mxu1 }
 0xa78   :  { %v2974_v13 = vadd.f32 %v2973_v55, %v2919_v23 }
 0xa7a   :  { %2989 = vst.msk [vmem:[%s5740_s4 + $0x20] sm:$0xff] %vm6119_vm15, %v2974_v13 }
 0xa7f   :  { %v2976_v9 = vpop.f32.mrf.mxu1 }
 0xa80   :  { %v2977_v8 = vadd.f32 %v2976_v9, %v2919_v23 }
 0xa82   :  { %2990 = vst.msk [vmem:[%s5740_s4 + $0x28] sm:$0xff] %vm6110_vm1, %v2977_v8 }
 0xa87   :  { %v2979_v17 = vpop.f32.mrf.mxu1 }
 0xa88   :  { %v2980_v37 = vadd.f32 %v2979_v17, %v2919_v23 }
 0xa8a   :  { %2991 = vst.msk [vmem:[%s5740_s4 + $0x30] sm:$0xff] %vm6120_vm5, %v2980_v37 }
 0xa8f   :  { %v2982_v32 = vpop.f32.mrf.mxu1 }
 0xa90   :  { %v2983_v61 = vadd.f32 %v2982_v32, %v2919_v23 }
 0xa92   :  { %2992 = vst.msk [vmem:[%s5740_s4 + $0x38] sm:$0xff] %vm6121_vm8, %v2983_v61 }

</bundles_post_ra>
